<compile_context>
chip_gen: v7x
topology: tpu7x:2x2x1
jax: 0.10.0
libtpu: 0.0.40
codegen_flags: <defaults>
</compile_context>

<pallas_src>
import jax
import jax.numpy as jnp
from jax.experimental import pallas as pl
from jax.experimental.pallas import tpu as pltpu

FEATURE_DIM = 64        # stands in for convnext_small's 768 (kept small, divisible by 16)
REDUCTION = 16
HIDDEN = 512
NUM_CLASSES = 5
LOGIT_PAD = 64          # logits padded to 64 lanes; packed with h (64) -> 128-lane store
PATCH = 4
BN_EPS = 1e-5


# ---------------------------------------------------------------------------
# exact-erf GELU helper (Abramowitz & Stegun 7.1.26; |err|<1.5e-7, VPU+EUP)
# ---------------------------------------------------------------------------
def _erf(x):
    a1, a2, a3, a4, a5 = (0.254829592, -0.284496736, 1.421413741,
                          -1.453152027, 1.061405429)
    p = 0.3275911
    ax = jnp.abs(x)
    t = 1.0 / (1.0 + p * ax)
    poly = ((((a5 * t + a4) * t + a3) * t + a2) * t + a1) * t
    y = 1.0 - poly * jnp.exp(-ax * ax)
    return jnp.where(x >= 0, y, -y)


# ---------------------------------------------------------------------------
# 7x7 "same" conv (2->1 channels, padding 3, no bias) as a single matmul operand.
# Row layout matches jnp.concatenate([avg, max], axis=-1): rows [0:HW) are the avg
# channel's input pixels, rows [HW:2*HW) the max channel's.
# ---------------------------------------------------------------------------
def _build_spatial_conv_matrix(conv_sp_w, H, W):
    w = conv_sp_w.reshape(2, 7, 7).astype(jnp.float32)
    di = jnp.arange(H)[:, None] - jnp.arange(H)[None, :] + 3       # (h_in, h_out)
    dj = jnp.arange(W)[:, None] - jnp.arange(W)[None, :] + 3       # (w_in, w_out)
    vi = (di >= 0) & (di < 7)
    vj = (dj >= 0) & (dj < 7)
    m = w[:, jnp.clip(di, 0, 6)[:, :, None, None],
          jnp.clip(dj, 0, 6)[None, None, :, :]]                    # (c,h_in,h_out,w_in,w_out)
    m = m * vi[None, :, :, None, None] * vj[None, None, None, :, :]
    m = m.transpose(0, 1, 3, 2, 4).reshape(2, H * W, H * W)        # (c, in_pix, out_pix)
    # TODO(synk): at real ConvNeXt map sizes (HW ~1.5k-3k) this dense matrix is
    # quadratic in HW and exceeds v7x's 64 MiB VMEM; tile the out-pixel axis or fall
    # back to 49 pltpu.roll-shifted MACs exploiting the banded structure there.
    return m.reshape(2 * H * W, H * W)                             # (2*HW, HW)


# ---------------------------------------------------------------------------
# Fused kernel: LesionAttention + global mean pool + classifier head
# ---------------------------------------------------------------------------
def _fused_head_kernel(x_ref, fc1t_ref, fc2t_ref, convm_ref, w1t_ref, b1_ref,
                       w2t_ref, b2_ref, out_ref):
    _, Bt, C, HW = x_ref.shape
    x = x_ref[0].astype(jnp.float32)                          # (Bt, C, HW)

    # ---- channel attention: batched shared MLP on [avg; max] pooled rows ----
    avg_p = jnp.sum(x, axis=-1) * (1.0 / HW)                  # (Bt, C)
    max_p = jnp.max(x, axis=-1)                               # (Bt, C)
    pooled = jnp.concatenate([avg_p, max_p], axis=0).astype(jnp.bfloat16)   # (2*Bt, C)
    hid = jnp.maximum(
        jnp.dot(pooled, fc1t_ref[...], preferred_element_type=jnp.float32), 0.0)
    mo = jnp.dot(hid.astype(jnp.bfloat16), fc2t_ref[...],
                 preferred_element_type=jnp.float32)          # (2*Bt, C)
    ch_att = jax.nn.sigmoid(mo[:Bt] + mo[Bt:])                # (Bt, C)   f32 on VPU/EUP
    x_ch = x * ch_att[:, :, None]                             # (Bt, C, HW)

    # ---- spatial attention: 7x7 conv as ONE MXU dot with the unrolled-conv matrix ----
    sp_avg = jnp.sum(x_ch, axis=1) * (1.0 / C)                # (Bt, HW)
    sp_max = jnp.max(x_ch, axis=1)                            # (Bt, HW)
    sp_cat = jnp.concatenate([sp_avg, sp_max], axis=-1).astype(jnp.bfloat16)  # (Bt, 2*HW)
    sp_att = jax.nn.sigmoid(
        jnp.dot(sp_cat, convm_ref[...], preferred_element_type=jnp.float32))  # (Bt, HW)

    attended = x_ch * sp_att[:, None, :]                      # (Bt, C, HW)
    h = jnp.sum(attended, axis=-1) * (1.0 / HW)               # (Bt, C)  global mean pool

    # ---- classifier: Linear (BN folded) -> GELU(erf) -> Linear ----
    z = jnp.dot(h.astype(jnp.bfloat16), w1t_ref[...],
                preferred_element_type=jnp.float32) + b1_ref[...]
    g = 0.5 * z * (1.0 + _erf(z * 0.7071067811865476))        # exact-erf GELU, f32
    logits = jnp.dot(g.astype(jnp.bfloat16), w2t_ref[...],
                     preferred_element_type=jnp.float32) + b2_ref[...]   # (Bt, LOGIT_PAD)

    # single lane-dense 128-wide store: [logits(64 padded) | h(64)]
    out_ref[0] = jnp.concatenate([logits, h], axis=-1)


def _pick_batch_tile(B):
    # v7x: keep grid >= 2 so both TensorCores get a step; v5e/v6e: single step for small B.
    if B >= 16 and B % 2 == 0:
        return B // 2
    return B


def lesion_attention_classifier(feats, params, batch_tile=None):
    """feats: (B, C, H, W) NCHW. Returns (logits (B, NUM_CLASSES), h (B, C))."""
    B, C, H, W = feats.shape
    HW = H * W
    r = C // REDUCTION
    assert C <= LOGIT_PAD, "packed output layout assumes C <= 64 at this toy size"
    bt = batch_tile if batch_tile is not None else _pick_batch_tile(B)
    if B % bt != 0:
        bt = B
    g = B // bt

    # lane-dense spatial axis + bf16 feature block (halves the dominant HBM read)
    x = feats.astype(jnp.bfloat16).reshape(g, bt, C, HW)

    # ---- host-side weight prep (bf16 MXU operands, BN folded into Linear1) ----
    fc1_t = params['fc1_w'].reshape(r, C).T.astype(jnp.bfloat16)        # (C, r)
    fc2_t = params['fc2_w'].reshape(C, r).T.astype(jnp.bfloat16)        # (r, C)
    convm = _build_spatial_conv_matrix(params['conv_sp_w'], H, W).astype(jnp.bfloat16)
    bn_scale = (params['gamma'] * jax.lax.rsqrt(params['rv'] + BN_EPS)).astype(jnp.float32)
    w1_t = (params['w1'].T.astype(jnp.float32) * bn_scale[None, :]).astype(jnp.bfloat16)
    b1 = ((params['b1'] - params['rm']) * bn_scale + params['beta'])[None, :].astype(jnp.float32)
    nc = params['w2'].shape[0]
    w2_t = jnp.zeros((HIDDEN, LOGIT_PAD), jnp.float32).at[:, :nc].set(
        params['w2'].T).astype(jnp.bfloat16)
    b2 = jnp.zeros((1, LOGIT_PAD), jnp.float32).at[:, :nc].set(params['b2'][None, :])

    # TODO(synk): these weight operands have constant index_maps; mark them
    # pipeline_mode=pl.Buffered(1) (single-buffered) once safe, to halve their VMEM.
    def rep_spec(arr):
        zeros = (0,) * arr.ndim
        return pl.BlockSpec(arr.shape, lambda i, z=zeros: z)

    out_w = LOGIT_PAD + C
    out = pl.pallas_call(
        _fused_head_kernel,
        out_shape=jax.ShapeDtypeStruct((g, bt, out_w), jnp.float32),
        grid_spec=pltpu.PrefetchScalarGridSpec(
            num_scalar_prefetch=0,
            grid=(g,),
            in_specs=[
                pl.BlockSpec((1, bt, C, HW), lambda i: (i, 0, 0, 0)),
                rep_spec(fc1_t), rep_spec(fc2_t), rep_spec(convm),
                rep_spec(w1_t), rep_spec(b1), rep_spec(w2_t), rep_spec(b2),
            ],
            out_specs=pl.BlockSpec((1, bt, out_w), lambda i: (i, 0, 0)),
        ),
        compiler_params=pltpu.CompilerParams(
            dimension_semantics=("parallel",)),
    )(x, fc1_t, fc2_t, convm, w1_t, b1, w2_t, b2)

    out = out.reshape(B, out_w)
    logits = out[:, :nc]
    h = out[:, LOGIT_PAD:LOGIT_PAD + C]
    return logits, h


# ---------------------------------------------------------------------------
# Stand-in backbone (plain-JAX glue)
# ---------------------------------------------------------------------------
def standin_backbone(x, stem_w, stem_b):
    # TODO(synk): timm ConvNeXt-Small forward_features not reproduced; patchify stem stand-in.
    B, Cin, H, W = x.shape
    p = x.reshape(B, Cin, H // PATCH, PATCH, W // PATCH, PATCH)
    p = p.transpose(0, 2, 4, 1, 3, 5).reshape(
        B, (H // PATCH) * (W // PATCH), Cin * PATCH * PATCH)
    feats = jnp.einsum('bpk,kc->bpc', p, stem_w) + stem_b
    feats = feats.reshape(B, H // PATCH, W // PATCH, FEATURE_DIM).transpose(0, 3, 1, 2)
    return feats                                              # (B, C, H/4, W/4) NCHW


def enhanced_dr_classifier_forward(x, params):
    feats = standin_backbone(x, params['stem_w'], params['stem_b'])
    logits, h = lesion_attention_classifier(feats, params)
    return logits, feats, h


# ---------------------------------------------------------------------------
# Pure-JAX reference (attention + classifier) for sanity check
# ---------------------------------------------------------------------------
def _reference_head(feats, p):
    B, C, H, W = feats.shape
    avg_p = feats.mean(axis=(2, 3))
    max_p = feats.max(axis=(2, 3))
    W1 = p['fc1_w'].reshape(C // REDUCTION, C)
    W2 = p['fc2_w'].reshape(C, C // REDUCTION)
    mlp = lambda q: jnp.maximum(q @ W1.T, 0.0) @ W2.T
    ch = jax.nn.sigmoid(mlp(avg_p) + mlp(max_p))
    x_ch = feats * ch[:, :, None, None]
    sp_in = jnp.stack([x_ch.mean(axis=1), x_ch.max(axis=1)], axis=1)
    sp = jax.lax.conv_general_dilated(sp_in, p['conv_sp_w'], (1, 1), [(3, 3), (3, 3)],
                                      dimension_numbers=('NCHW', 'OIHW', 'NCHW'))
    att = x_ch * jax.nn.sigmoid(sp)
    h = att.mean(axis=(2, 3))
    z = h @ p['w1'].T + p['b1']
    z = (z - p['rm']) * jax.lax.rsqrt(p['rv'] + BN_EPS) * p['gamma'] + p['beta']
    g = 0.5 * z * (1.0 + jax.scipy.special.erf(z / jnp.sqrt(2.0)))   # exact-erf GELU
    return g @ p['w2'].T + p['b2'], h


if __name__ == "__main__":
    key = jax.random.PRNGKey(0)
    ks = jax.random.split(key, 13)
    B = 16                                                    # -> Bt=8 (sublane-full), grid=2
    C, r = FEATURE_DIM, FEATURE_DIM // REDUCTION

    x = jax.random.normal(ks[0], (B, 3, 32, 32), jnp.float32)

    params = dict(
        stem_w=0.05 * jax.random.normal(ks[1], (3 * PATCH * PATCH, C), jnp.float32),
        stem_b=jnp.zeros((C,), jnp.float32),
        fc1_w=0.1 * jax.random.normal(ks[2], (r, C, 1, 1), jnp.float32),
        fc2_w=0.1 * jax.random.normal(ks[3], (C, r, 1, 1), jnp.float32),
        conv_sp_w=0.1 * jax.random.normal(ks[4], (1, 2, 7, 7), jnp.float32),
        w1=0.05 * jax.random.normal(ks[5], (HIDDEN, C), jnp.float32),
        b1=0.01 * jax.random.normal(ks[7], (HIDDEN,), jnp.float32),
        gamma=1.0 + 0.1 * jax.random.normal(ks[8], (HIDDEN,), jnp.float32),
        beta=0.05 * jax.random.normal(ks[9], (HIDDEN,), jnp.float32),
        rm=0.05 * jax.random.normal(ks[10], (HIDDEN,), jnp.float32),
        rv=1.0 + 0.1 * jax.random.uniform(ks[11], (HIDDEN,), jnp.float32),
        w2=0.05 * jax.random.normal(ks[6], (NUM_CLASSES, HIDDEN), jnp.float32),
        b2=0.01 * jax.random.normal(ks[12], (NUM_CLASSES,), jnp.float32),
    )

    logits, feats, h = enhanced_dr_classifier_forward(x, params)
    logits = jax.block_until_ready(logits)

    ref_logits, ref_h = _reference_head(feats, params)
    assert logits.shape == (B, NUM_CLASSES)
    assert h.shape == (B, C)
    # tolerances loosened slightly for bf16 MXU operands (f32 accumulation)
    assert jnp.max(jnp.abs(h - ref_h)) < 1e-2, "Pallas h mismatch vs JAX reference"
    assert jnp.max(jnp.abs(logits - ref_logits)) < 2e-2, "Pallas logits mismatch vs JAX reference"

    print("KERNEL_OK")
</pallas_src>

<mosaic_0001>
module attributes {stable_mosaic.version = 11 : i64} {
  func.func @_fused_head_kernel(%arg0: i32, %arg1: memref<1x8x64x64xbf16, #tpu.memory_space<vmem>>, %arg2: memref<64x4xbf16, #tpu.memory_space<vmem>>, %arg3: memref<4x64xbf16, #tpu.memory_space<vmem>>, %arg4: memref<128x64xbf16, #tpu.memory_space<vmem>>, %arg5: memref<64x512xbf16, #tpu.memory_space<vmem>>, %arg6: memref<1x512xf32, #tpu.memory_space<vmem>>, %arg7: memref<512x64xbf16, #tpu.memory_space<vmem>>, %arg8: memref<1x64xf32, #tpu.memory_space<vmem>>, %arg9: memref<1x8x128xf32, #tpu.memory_space<vmem>>) attributes {dimension_semantics = [#tpu.dimension_semantics<parallel>], iteration_bounds = array<i64: 2>, scalar_prefetch = 0 : i64, scratch_operands = 0 : i64, tpu.core_type = #tpu.core_type<tc>, window_params = [{transform_indices = @transform_0, window_bounds = array<i64: 1, 8, 64, 64>}, {pipeline_mode = #tpu.pipeline_mode<synchronous>, transform_indices = @transform_1, window_bounds = array<i64: 64, 4>}, {pipeline_mode = #tpu.pipeline_mode<synchronous>, transform_indices = @transform_2, window_bounds = array<i64: 4, 64>}, {pipeline_mode = #tpu.pipeline_mode<synchronous>, transform_indices = @transform_3, window_bounds = array<i64: 128, 64>}, {pipeline_mode = #tpu.pipeline_mode<synchronous>, transform_indices = @transform_4, window_bounds = array<i64: 64, 512>}, {pipeline_mode = #tpu.pipeline_mode<synchronous>, transform_indices = @transform_5, window_bounds = array<i64: 1, 512>}, {pipeline_mode = #tpu.pipeline_mode<synchronous>, transform_indices = @transform_6, window_bounds = array<i64: 512, 64>}, {pipeline_mode = #tpu.pipeline_mode<synchronous>, transform_indices = @transform_7, window_bounds = array<i64: 1, 64>}, {transform_indices = @transform_8, window_bounds = array<i64: 1, 8, 128>}]} {
    %c0 = arith.constant 0 : index
    %c0_0 = arith.constant 0 : index
    %c0_1 = arith.constant 0 : index
    %c0_2 = arith.constant 0 : index
    %0 = vector.load %arg1[%c0, %c0_0, %c0_1, %c0_2] : memref<1x8x64x64xbf16, #tpu.memory_space<vmem>>, vector<1x8x64x64xbf16>
    %1 = vector.shape_cast %0 : vector<1x8x64x64xbf16> to vector<8x64x64xbf16>
    %2 = arith.extf %1 : vector<8x64x64xbf16> to vector<8x64x64xf32>
    %cst = arith.constant dense<0.000000e+00> : vector<8x64xf32>
    %3 = vector.multi_reduction <add>, %2, %cst [2] : vector<8x64x64xf32> to vector<8x64xf32>
    %cst_3 = arith.constant 1.562500e-02 : f32
    %4 = vector.broadcast %cst_3 : f32 to vector<8x64xf32>
    %5 = arith.mulf %3, %4 : vector<8x64xf32>
    %cst_4 = arith.constant dense<0xFF800000> : vector<8x64xf32>
    %6 = vector.multi_reduction <maximumf>, %2, %cst_4 [2] : vector<8x64x64xf32> to vector<8x64xf32>
    %7 = tpu.concatenate %5, %6 in 0 : vector<8x64xf32>, vector<8x64xf32> -> vector<16x64xf32>
    %8 = arith.truncf %7 : vector<16x64xf32> to vector<16x64xbf16>
    %c0_5 = arith.constant 0 : index
    %c0_6 = arith.constant 0 : index
    %9 = vector.load %arg2[%c0_5, %c0_6] : memref<64x4xbf16, #tpu.memory_space<vmem>>, vector<64x4xbf16>
    %cst_7 = arith.constant dense<0.000000e+00> : vector<16x4xf32>
    %10 = tpu.matmul %8, %9, %cst_7 {dimension_numbers = #tpu.dot_dimension_numbers<[1], [0], [0], [1], [0, 0, 1, 1], [], []>} : vector<16x64xbf16>, vector<64x4xbf16>, vector<16x4xf32> -> vector<16x4xf32>
    %cst_8 = arith.constant 0.000000e+00 : f32
    %11 = vector.broadcast %cst_8 : f32 to vector<16x4xf32>
    %12 = arith.maximumf %10, %11 : vector<16x4xf32>
    %13 = arith.truncf %12 : vector<16x4xf32> to vector<16x4xbf16>
    %c0_9 = arith.constant 0 : index
    %c0_10 = arith.constant 0 : index
    %14 = vector.load %arg3[%c0_9, %c0_10] : memref<4x64xbf16, #tpu.memory_space<vmem>>, vector<4x64xbf16>
    %cst_11 = arith.constant dense<0.000000e+00> : vector<16x64xf32>
    %15 = tpu.matmul %13, %14, %cst_11 {dimension_numbers = #tpu.dot_dimension_numbers<[1], [0], [0], [1], [0, 0, 1, 1], [], []>} : vector<16x4xbf16>, vector<4x64xbf16>, vector<16x64xf32> -> vector<16x64xf32>
    %16 = vector.extract_strided_slice %15 {offsets = [0, 0], sizes = [8, 64], strides = [1, 1]} : vector<16x64xf32> to vector<8x64xf32>
    %17 = vector.extract_strided_slice %15 {offsets = [8, 0], sizes = [8, 64], strides = [1, 1]} : vector<16x64xf32> to vector<8x64xf32>
    %18 = arith.addf %16, %17 : vector<8x64xf32>
    %19 = arith.negf %18 : vector<8x64xf32>
    %20 = math.exp %19 : vector<8x64xf32>
    %cst_12 = arith.constant 1.000000e+00 : f32
    %21 = vector.broadcast %cst_12 : f32 to vector<8x64xf32>
    %22 = arith.addf %21, %20 : vector<8x64xf32>
    %23 = arith.divf %21, %22 : vector<8x64xf32>
    %24 = vector.shape_cast %23 : vector<8x64xf32> to vector<8x64x1xf32>
    %25 = vector.broadcast %24 : vector<8x64x1xf32> to vector<8x64x64xf32>
    %26 = arith.mulf %2, %25 : vector<8x64x64xf32>
    %cst_13 = arith.constant dense<0.000000e+00> : vector<8x64xf32>
    %27 = vector.multi_reduction <add>, %26, %cst_13 [1] : vector<8x64x64xf32> to vector<8x64xf32>
    %cst_14 = arith.constant 1.562500e-02 : f32
    %28 = vector.broadcast %cst_14 : f32 to vector<8x64xf32>
    %29 = arith.mulf %27, %28 : vector<8x64xf32>
    %cst_15 = arith.constant dense<0xFF800000> : vector<8x64xf32>
    %30 = vector.multi_reduction <maximumf>, %26, %cst_15 [1] : vector<8x64x64xf32> to vector<8x64xf32>
    %31 = tpu.concatenate %29, %30 in 1 : vector<8x64xf32>, vector<8x64xf32> -> vector<8x128xf32>
    %32 = arith.truncf %31 : vector<8x128xf32> to vector<8x128xbf16>
    %c0_16 = arith.constant 0 : index
    %c0_17 = arith.constant 0 : index
    %33 = vector.load %arg4[%c0_16, %c0_17] : memref<128x64xbf16, #tpu.memory_space<vmem>>, vector<128x64xbf16>
    %cst_18 = arith.constant dense<0.000000e+00> : vector<8x64xf32>
    %34 = tpu.matmul %32, %33, %cst_18 {dimension_numbers = #tpu.dot_dimension_numbers<[1], [0], [0], [1], [0, 0, 1, 1], [], []>} : vector<8x128xbf16>, vector<128x64xbf16>, vector<8x64xf32> -> vector<8x64xf32>
    %35 = arith.negf %34 : vector<8x64xf32>
    %36 = math.exp %35 : vector<8x64xf32>
    %cst_19 = arith.constant 1.000000e+00 : f32
    %37 = vector.broadcast %cst_19 : f32 to vector<8x64xf32>
    %38 = arith.addf %37, %36 : vector<8x64xf32>
    %39 = arith.divf %37, %38 : vector<8x64xf32>
    %40 = vector.shape_cast %39 : vector<8x64xf32> to vector<8x1x64xf32>
    %41 = vector.broadcast %40 : vector<8x1x64xf32> to vector<8x64x64xf32>
    %42 = arith.mulf %26, %41 : vector<8x64x64xf32>
    %cst_20 = arith.constant dense<0.000000e+00> : vector<8x64xf32>
    %43 = vector.multi_reduction <add>, %42, %cst_20 [2] : vector<8x64x64xf32> to vector<8x64xf32>
    %cst_21 = arith.constant 1.562500e-02 : f32
    %44 = vector.broadcast %cst_21 : f32 to vector<8x64xf32>
    %45 = arith.mulf %43, %44 : vector<8x64xf32>
    %46 = arith.truncf %45 : vector<8x64xf32> to vector<8x64xbf16>
    %c0_22 = arith.constant 0 : index
    %c0_23 = arith.constant 0 : index
    %47 = vector.load %arg5[%c0_22, %c0_23] : memref<64x512xbf16, #tpu.memory_space<vmem>>, vector<64x512xbf16>
    %cst_24 = arith.constant dense<0.000000e+00> : vector<8x512xf32>
    %48 = tpu.matmul %46, %47, %cst_24 {dimension_numbers = #tpu.dot_dimension_numbers<[1], [0], [0], [1], [0, 0, 1, 1], [], []>} : vector<8x64xbf16>, vector<64x512xbf16>, vector<8x512xf32> -> vector<8x512xf32>
    %c0_25 = arith.constant 0 : index
    %c0_26 = arith.constant 0 : index
    %49 = vector.load %arg6[%c0_25, %c0_26] : memref<1x512xf32, #tpu.memory_space<vmem>>, vector<1x512xf32>
    %50 = vector.broadcast %49 : vector<1x512xf32> to vector<8x512xf32>
    %51 = arith.addf %48, %50 : vector<8x512xf32>
    %cst_27 = arith.constant 5.000000e-01 : f32
    %52 = vector.broadcast %cst_27 : f32 to vector<8x512xf32>
    %53 = arith.mulf %52, %51 : vector<8x512xf32>
    %cst_28 = arith.constant 0.707106769 : f32
    %54 = vector.broadcast %cst_28 : f32 to vector<8x512xf32>
    %55 = arith.mulf %51, %54 : vector<8x512xf32>
    %56 = math.absf %55 : vector<8x512xf32>
    %cst_29 = arith.constant 0.327591091 : f32
    %57 = vector.broadcast %cst_29 : f32 to vector<8x512xf32>
    %58 = arith.mulf %57, %56 : vector<8x512xf32>
    %cst_30 = arith.constant 1.000000e+00 : f32
    %59 = vector.broadcast %cst_30 : f32 to vector<8x512xf32>
    %60 = arith.addf %59, %58 : vector<8x512xf32>
    %cst_31 = arith.constant 1.000000e+00 : f32
    %61 = vector.broadcast %cst_31 : f32 to vector<8x512xf32>
    %62 = arith.divf %61, %60 : vector<8x512xf32>
    %cst_32 = arith.constant 1.06140542 : f32
    %63 = vector.broadcast %cst_32 : f32 to vector<8x512xf32>
    %64 = arith.mulf %63, %62 : vector<8x512xf32>
    %cst_33 = arith.constant -1.45315206 : f32
    %65 = vector.broadcast %cst_33 : f32 to vector<8x512xf32>
    %66 = arith.addf %64, %65 : vector<8x512xf32>
    %67 = arith.mulf %66, %62 : vector<8x512xf32>
    %cst_34 = arith.constant 1.42141378 : f32
    %68 = vector.broadcast %cst_34 : f32 to vector<8x512xf32>
    %69 = arith.addf %67, %68 : vector<8x512xf32>
    %70 = arith.mulf %69, %62 : vector<8x512xf32>
    %cst_35 = arith.constant -0.284496725 : f32
    %71 = vector.broadcast %cst_35 : f32 to vector<8x512xf32>
    %72 = arith.addf %70, %71 : vector<8x512xf32>
    %73 = arith.mulf %72, %62 : vector<8x512xf32>
    %cst_36 = arith.constant 0.254829586 : f32
    %74 = vector.broadcast %cst_36 : f32 to vector<8x512xf32>
    %75 = arith.addf %73, %74 : vector<8x512xf32>
    %76 = arith.mulf %75, %62 : vector<8x512xf32>
    %cst_37 = arith.constant 0.000000e+00 : f32
    %77 = vector.broadcast %cst_37 : f32 to vector<8x512xf32>
    %78 = arith.subf %77, %56 : vector<8x512xf32>
    %79 = arith.mulf %78, %56 : vector<8x512xf32>
    %80 = math.exp %79 : vector<8x512xf32>
    %81 = arith.mulf %76, %80 : vector<8x512xf32>
    %cst_38 = arith.constant 1.000000e+00 : f32
    %82 = vector.broadcast %cst_38 : f32 to vector<8x512xf32>
    %83 = arith.subf %82, %81 : vector<8x512xf32>
    %cst_39 = arith.constant 0.000000e+00 : f32
    %84 = vector.broadcast %cst_39 : f32 to vector<8x512xf32>
    %85 = arith.cmpf oge, %55, %84 : vector<8x512xf32>
    %cst_40 = arith.constant 0.000000e+00 : f32
    %86 = vector.broadcast %cst_40 : f32 to vector<8x512xf32>
    %87 = arith.subf %86, %83 : vector<8x512xf32>
    %88 = arith.select %85, %83, %87 : vector<8x512xi1>, vector<8x512xf32>
    %cst_41 = arith.constant 1.000000e+00 : f32
    %89 = vector.broadcast %cst_41 : f32 to vector<8x512xf32>
    %90 = arith.addf %89, %88 : vector<8x512xf32>
    %91 = arith.mulf %53, %90 : vector<8x512xf32>
    %92 = arith.truncf %91 : vector<8x512xf32> to vector<8x512xbf16>
    %c0_42 = arith.constant 0 : index
    %c0_43 = arith.constant 0 : index
    %93 = vector.load %arg7[%c0_42, %c0_43] : memref<512x64xbf16, #tpu.memory_space<vmem>>, vector<512x64xbf16>
    %cst_44 = arith.constant dense<0.000000e+00> : vector<8x64xf32>
    %94 = tpu.matmul %92, %93, %cst_44 {dimension_numbers = #tpu.dot_dimension_numbers<[1], [0], [0], [1], [0, 0, 1, 1], [], []>} : vector<8x512xbf16>, vector<512x64xbf16>, vector<8x64xf32> -> vector<8x64xf32>
    %c0_45 = arith.constant 0 : index
    %c0_46 = arith.constant 0 : index
    %95 = vector.load %arg8[%c0_45, %c0_46] : memref<1x64xf32, #tpu.memory_space<vmem>>, vector<1x64xf32>
    %96 = vector.broadcast %95 : vector<1x64xf32> to vector<8x64xf32>
    %97 = arith.addf %94, %96 : vector<8x64xf32>
    %98 = tpu.concatenate %97, %45 in 1 : vector<8x64xf32>, vector<8x64xf32> -> vector<8x128xf32>
    %c0_47 = arith.constant 0 : index
    %c0_48 = arith.constant 0 : index
    %c0_49 = arith.constant 0 : index
    %99 = vector.load %arg9[%c0_47, %c0_48, %c0_49] : memref<1x8x128xf32, #tpu.memory_space<vmem>>, vector<1x8x128xf32>
    %100 = vector.shape_cast %99 : vector<1x8x128xf32> to vector<8x128xf32>
    %101 = vector.shape_cast %98 : vector<8x128xf32> to vector<1x8x128xf32>
    tpu.vector_store %arg9[%c0_47, %c0_48, %c0_49], %101 {strides = array<i32>} : memref<1x8x128xf32, #tpu.memory_space<vmem>>, vector<1x8x128xf32>,
    return
  }
  func.func @transform_0(%arg0: i32) -> (i32, i32, i32, i32) {
    %c0_i32 = arith.constant 0 : i32
    %c0_i32_0 = arith.constant 0 : i32
    %c0_i32_1 = arith.constant 0 : i32
    %c0_i32_2 = arith.constant 0 : i32
    return %arg0, %c0_i32, %c0_i32_0, %c0_i32_1 : i32, i32, i32, i32
  }
  func.func @transform_1(%arg0: i32) -> (i32, i32) {
    %c0_i32 = arith.constant 0 : i32
    %c0_i32_0 = arith.constant 0 : i32
    %c0_i32_1 = arith.constant 0 : i32
    return %c0_i32, %c0_i32_0 : i32, i32
  }
  func.func @transform_2(%arg0: i32) -> (i32, i32) {
    %c0_i32 = arith.constant 0 : i32
    %c0_i32_0 = arith.constant 0 : i32
    %c0_i32_1 = arith.constant 0 : i32
    return %c0_i32, %c0_i32_0 : i32, i32
  }
  func.func @transform_3(%arg0: i32) -> (i32, i32) {
    %c0_i32 = arith.constant 0 : i32
    %c0_i32_0 = arith.constant 0 : i32
    %c0_i32_1 = arith.constant 0 : i32
    return %c0_i32, %c0_i32_0 : i32, i32
  }
  func.func @transform_4(%arg0: i32) -> (i32, i32) {
    %c0_i32 = arith.constant 0 : i32
    %c0_i32_0 = arith.constant 0 : i32
    %c0_i32_1 = arith.constant 0 : i32
    return %c0_i32, %c0_i32_0 : i32, i32
  }
  func.func @transform_5(%arg0: i32) -> (i32, i32) {
    %c0_i32 = arith.constant 0 : i32
    %c0_i32_0 = arith.constant 0 : i32
    %c0_i32_1 = arith.constant 0 : i32
    return %c0_i32, %c0_i32_0 : i32, i32
  }
  func.func @transform_6(%arg0: i32) -> (i32, i32) {
    %c0_i32 = arith.constant 0 : i32
    %c0_i32_0 = arith.constant 0 : i32
    %c0_i32_1 = arith.constant 0 : i32
    return %c0_i32, %c0_i32_0 : i32, i32
  }
  func.func @transform_7(%arg0: i32) -> (i32, i32) {
    %c0_i32 = arith.constant 0 : i32
    %c0_i32_0 = arith.constant 0 : i32
    %c0_i32_1 = arith.constant 0 : i32
    return %c0_i32, %c0_i32_0 : i32, i32
  }
  func.func @transform_8(%arg0: i32) -> (i32, i32, i32) {
    %c0_i32 = arith.constant 0 : i32
    %c0_i32_0 = arith.constant 0 : i32
    %c0_i32_1 = arith.constant 0 : i32
    return %arg0, %c0_i32, %c0_i32_0 : i32, i32, i32
  }
}

</mosaic_0001>

<bundles_post_ra>
// kernel: tpu_custom_call.1
= control target key start
LH: loop header
LB: loop body
LE: loop exit
PB: predicated region body
PF: predicated region fallthrough
CT: control target
= control target key end

     0   :  { %13 = vsyncpa [#allocation3], 0  ;;  %s7787_s0 = inlined_call_operand.vmem [shape: bf16[2,8,64,64], index: 0, kind: input, shape index: {}]   ;;  %s7788_s1 = inlined_call_operand.vmem [shape: bf16[64,4], index: 1, kind: input, shape index: {}]   ;;  %s7789_s2 = inlined_call_operand.vmem [shape: bf16[4,64], index: 2, kind: input, shape index: {}]   ;;  %s7790_s3 = inlined_call_operand.vmem [shape: bf16[128,64], index: 3, kind: input, shape index: {}]   ;;  %s7791_s4 = inlined_call_operand.hbm [shape: bf16[64,512], index: 4, kind: input, shape index: {}]   ;;  %s7792_s5 = inlined_call_operand.vmem [shape: f32[1,512], index: 5, kind: input, shape index: {}]   ;;  %s7793_s6 = inlined_call_operand.vmem [shape: bf16[512,64], index: 6, kind: input, shape index: {}]   ;;  %s7794_s7 = inlined_call_operand.vmem [shape: f32[1,64], index: 7, kind: input, shape index: {}]   ;;  %s7795_s8 = inlined_call_operand.hbm [shape: f32[2,8,128], index: 8, kind: output, shape index: {}]  }
   0x1   :  { %14 = vsyncpa [#allocation4], 0 }
   0x2   :  { %16 = vsyncpa [#allocation4 + $0x1], 0  ;;  %s5298_s27 = smov 0   ;;  %s5300_s28 = smov 0  }
   0x3   :  { %s5302_s29 = smov 0   ;;  %s5304_s30 = smov 0  }
   0x4 LB: > { %s5319_s9 = sadd.s32 4294967295, %s5242_s30   ;;  %s4661_s10 = sadd.s32 4294967294, %s5242_s30   ;;  %s5242_s30 = sphi %s5304_s30, %s8296_s30   ;;  %s5238_s29 = sphi %s5302_s29, %s8295_s29   ;;  %s5234_s28 = sphi %s5300_s28, %s8294_s28   ;;  %s5230_s27 = sphi %s5298_s27, %s8293_s27  }
   0x5   : > { %s5323_s11 = sadd.s32 1, %s5242_s30   ;;  %s202_s12 = sadd.s32 1, %s5238_s29 }
   0x6   : > { %s199_s13 = ssub.s32 %s5242_s30, %s5323_s11  ;;  %p212_p0 = scmp.ne.s32.totalorder %s5238_s29, %s5234_s28 }
   0x7   : > { %p200_p1 = scmp.eq.s32.totalorder %s199_s13, 0  ;;  %p213_p2 = scmp.eq.s32.totalorder %s5319_s9, 1 }
   0x8   : > { %p218_p3 = scmp.ne.s32.totalorder %s5234_s28, %s5230_s27  ;;  %p219_p4 = scmp.eq.s32.totalorder %s4661_s10, 1 }
   0x9   : > { %s5334_s14 = scalar_select %p200_p1, %s5238_s29, %s202_s12  }
   0xa   : > { %p5336_p5 = por %p213_p2, %p212_p0  ;;  %p5340_p6 = por %p219_p4, %p218_p3 }
   0xb   : > { %p4662_p7 = scmp.ge.s32.totalorder %s5242_s30, 1  ;;  %p226_p8 = scmp.lt.s32.totalorder %s5242_s30, 3 }
   0xc   : > { %s7977_s15 = scalar_select %p5336_p5, 1, 0 }
   0xd   : > { %s7978_s16 = scalar_select %p5340_p6, 1, 0 }
   0xe   : > { %p7796_p9 = scmp.eq.s32.totalorder %s5319_s9, 0  ;;  %p5347_p10 = pnand %p4662_p7, %p226_p8 }
   0xf   : > { %s5244_s18 = smov [#allocation2]   ;;  %s5148_s23 = scalar_lea.hbm %s7791_s4, 2048 }
  0x10   : > { %s7979_s17 = scalar_select %p5347_p10, 1, 0 }
  0x11   : > { %s247_s19 = sshll.u32 %s5244_s18, 4  ;;  %p5005_p11 = pneg %p5347_p10  ;;  %s248_s19 = int_to_ptr.vmem [resolvable:$true] %s247_s19 }
  0x12   : > { %p5149_p13 = scmp.ne.s32.totalorder %s7791_s4, %s5148_s23  ;;  %p5155_p3 = scmp.lt.u32.totalorder %s5148_s23, %s7791_s4 }
  0x13   : > { %p5355_p12 = pnand %p7796_p9, %p5005_p11 }
  0x15   : > { %p5150_p0 = pneg %p5355_p12 }
  0x17   : > { %p5151_p1 = pnand %p5150_p0, %p5149_p13 }
  0x19   : > { %p5152_p2 = pneg %p5151_p1 }
  0x1b   : > { %p5157_p4 = pnand %p5155_p3, %p5152_p2 }
  0x1d   : > { %5160 = shalt.err (!%p5157_p4)
}
  0x1e   : > { %s5161_s12 = scalar_lea.vmem %s248_s19, 2048  ;;  %p5169_p9 = scmp.lt.s32.totalorder %s248_s19, %s248_s19 }
  0x1f   : > { %p5162_p7 = scmp.ne.s32.totalorder %s248_s19, %s5161_s12  ;;  %p5170_p6 = scmp.lt.s32.totalorder %s5161_s12, %s5161_s12 }
  0x21   : > { %p5164_p8 = pnand %p5162_p7, %p5150_p0  ;;  %p5171_p5 = por %p5170_p6, %p5169_p9 }
  0x23   : > { %p5165_p11 = pneg %p5164_p8 }
  0x25   : > { %p5172_p10 = pnand %p5171_p5, %p5165_p11 }
  0x27   : > { %5175 = shalt.err (!%p5172_p10)
}
  0x28   : > { %s5245_s13 = smov 256   ;;  %s5246_s18 = smov 16  }
  0x29   : > { %5008 = dma.hbm_to_vmem [thread:$0]  (!%p5355_p12), %s7791_s4, 2048, %s248_s19, [#allocation3], %s5245_s13, %s5245_s13, %s5246_s18  }
  0x2a   : > { %p7981_p13 = scmp.ne.s32.totalorder %s7979_s17, 0 }
  0x2c   : > { %280 = sbr.rel (%p7981_p13) target bundleno = 2352 (0x930), region = 52 }
  0x33   : > { %p7982_p1 = scmp.eq.s32.totalorder %s5319_s9, 0 }
  0x35   : > { %5221 = dma.done.wait (%p7982_p1), [#allocation3], 2048   ;;  %p7983_p0 = pmov %p7982_p1 }
  0x36   : > { %p314_p5 = scmp.lt.s32.totalorder %s5319_s9, 1  ;;  %vm7972_vm0 = vcmask 523264   ;;  %vm972_vm1 = vcmask 130112   ;;  %vm979_vm2 = vcmask 195712   ;;  %vm986_vm3 = vcmask 261312   ;;  %s5249_s17 = smov 64  }
  0x37   : > { %5223 = vsyncadd (%p7983_p0), [#allocation3], 4294965248  ;;  %vm993_vm4 = vcmask 326912   ;;  %vm7869_vm5 = vcmask 392512   ;;  %vm1007_vm6 = vcmask 458112   ;;  %vm7870_vm7 = vcmask 523712  }
  0x38   : > { %s315_s23 = scalar_select %p314_p5, %s5319_s9, 1  ;;  %vm1289_vm8 = vcmask 1041409   ;;  %vm5248_vm9 = vmmov 0   ;;  %vm1291_vm10 = vcmask 1042434   ;;  %vm1293_vm11 = vcmask 1043459  }
  0x39   : > { %vm7976_vm12 = vcmask 1044484   ;;  %vm7975_vm13 = vcmask 1045509   ;;  %vm7974_vm14 = vcmask 1046534   ;;  %vm7973_vm15 = vcmask 1047559   ;;  %s311_s10 = sand.u32 1, %s5234_s28   ;;  %s4738_s21 = sshll.u32 %s5319_s9, 7 }
  0x3a   : > { %s4741_s24 = sshll.u32 %s315_s23, 8  ;;  %s4667_s12 = sshll.u32 %s311_s10, 3 }
  0x3b   : > { %s5386_s26 = scalar_lea.vmem %s7787_s0, %s4741_s24  ;;  %s313_s22 = scalar_lea.vmem [#allocation5], %s4667_s12 }
  0x3c   : > { %v4873_v0 = vld [vmem:[%s5386_s26 + $0x20] sm:$0xff]   ;;  %v4874_v6 = vld [vmem:[%s5386_s26 + $0x28] sm:$0xff]   ;;  %v4871_v32 = vld [vmem:[%s5386_s26 + $0x10] sm:$0xff]   ;;  %s4590_s23 = sshll.u32 %s313_s22, 4  ;;  %s7743_s20 = scalar_lea.hbm %s7795_s8, %s4738_s21  ;;  %s7745_s23 = int_to_ptr.vmem [resolvable:$true] %s4590_s23 }
  0x3d   : > { %v4743_v1 = vld [vmem:[%s5386_s26] sm:$0xff]   ;;  %v5390_v2 = vunpack.c.l.bf16 %v4873_v0  ;;  %v5394_v4 = vunpack.c.h.bf16 %v4873_v0  ;;  %v4870_v7 = vld [vmem:[%s5386_s26 + $0x8] sm:$0xff]   ;;  %v5404_v10 = vunpack.c.l.bf16 %v4874_v6  ;;  %v5425_v21 = vunpack.c.h.bf16 %v4874_v6  ;;  %v4875_v35 = vld [vmem:[%s5386_s26 + $0x30] sm:$0xff]   ;;  %s5176_s9 = scalar_lea.vmem %s7745_s23, 128  ;;  %p8291_p9 = scmp.ne.s32.totalorder %s7977_s15, 0 }
  0x3e   : > { %v5392_v3 = vunpack.c.l.bf16 %v4743_v1  ;;  %v5396_v5 = vunpack.c.h.bf16 %v4743_v1  ;;  %v5410_v13 = vunpack.c.l.bf16 %v4870_v7  ;;  %v4877_v14 = vld [vmem:[%s5386_s26 + $0x40] sm:$0xff]   ;;  %v5428_v23 = vunpack.c.h.bf16 %v4870_v7  ;;  %v4878_v24 = vld [vmem:[%s5386_s26 + $0x48] sm:$0xff]   ;;  %v4879_v57 = vld [vmem:[%s5386_s26 + $0x50] sm:$0xff]   ;;  %p5177_p6 = scmp.ne.s32.totalorder %s7745_s23, %s5176_s9 }
  0x3f   : > { %7984 = vst [vmem:[#allocation8_spill] sm:$0xff] %v5390_v2  ;;  %7986 = vst [vmem:[#allocation10_spill] sm:$0xff] %v5394_v4  ;;  %v473_v8 = vsel %vm7972_vm0, %v5390_v2, 0.0  ;;  %v476_v11 = vsel %vm7972_vm0, %v5394_v4, 0.0  ;;  %v479_v15 = vsel %vm7972_vm0, %v5404_v10, 0.0  ;;  %v5415_v16 = vunpack.c.h.bf16 %v4877_v14  ;;  %v4881_v22 = vld [vmem:[%s5386_s26 + $0x60] sm:$0xff]  }
  0x40   : > { %7985 = vst [vmem:[#allocation9_spill] sm:$0xff] %v5392_v3  ;;  %7987 = vst [vmem:[#allocation11_spill] sm:$0xff] %v5396_v5  ;;  %v449_v9 = vsel %vm7972_vm0, %v5392_v3, 0.0  ;;  %474 = vadd.xlane.f32.xlu1 %v473_v8  ;;  %v452_v12 = vsel %vm7972_vm0, %v5396_v5, 0.0  ;;  %v5417_v17 = vunpack.c.l.bf16 %v4877_v14  ;;  %v455_v18 = vsel %vm7972_vm0, %v5410_v13, 0.0  ;;  %v4885_v43 = vld [vmem:[%s5386_s26 + $0x80] sm:$0xff]   ;;  %p5178_p10 = pnand %p5177_p6, %p8291_p9 }
  0x41   : > { %450 = vadd.xlane.f32.xlu0 %v449_v9  ;;  %7988 = vst [vmem:[#allocation12_spill] sm:$0xff] %v5404_v10  ;;  %7989 = vst [vmem:[#allocation13_spill] sm:$0xff] %v5410_v13  ;;  %v500_v19 = vsel %vm7972_vm0, %v5415_v16, 0.0  ;;  %v482_v25 = vsel %vm7972_vm0, %v5425_v21, 0.0  ;;  %v458_v26 = vsel %vm7972_vm0, %v5428_v23, 0.0  ;;  %v5435_v27 = vunpack.c.l.bf16 %v4881_v22  ;;  %v4882_v44 = vld [vmem:[%s5386_s26 + $0x68] sm:$0xff]  }
  0x42   : > { %7990 = vst [vmem:[#allocation14_spill] sm:$0xff] %v5415_v16  ;;  %7991 = vst [vmem:[#allocation15_spill] sm:$0xff] %v5417_v17  ;;  %v497_v20 = vsel %vm7972_vm0, %v5417_v17, 0.0  ;;  %v5437_v28 = vunpack.c.l.bf16 %v4878_v24  ;;  %v5443_v31 = vunpack.c.h.bf16 %v4881_v22  ;;  %v705_v33 = vsel %vm7972_vm0, %v5392_v3, -inf  ;;  %v4886_v60 = vld [vmem:[%s5386_s26 + $0x88] sm:$0xff]   ;;  %v4889_v7 = vld [vmem:[%s5386_s26 + $0xa0] sm:$0xff]   ;;  %p5179_p12 = pneg %p5178_p10 }
  0x43   : > { %7992 = vst [vmem:[#allocation16_spill] sm:$0xff] %v5425_v21  ;;  %7993 = vst [vmem:[#allocation17_spill] sm:$0xff] %v5428_v23  ;;  %v521_v29 = vsel %vm7972_vm0, %v5435_v27, 0.0  ;;  %v729_v36 = vsel %vm7972_vm0, %v5390_v2, -inf  ;;  %v708_v37 = vsel %vm7972_vm0, %v5396_v5, -inf  ;;  %v5455_v38 = vunpack.c.l.bf16 %v4871_v32 }
  0x44   : > { %477 = vadd.xlane.f32.xlu1 %v476_v11  ;;  %7994 = vst [vmem:[#allocation18_spill] sm:$0xff] %v5435_v27  ;;  %7995 = vst [vmem:[#allocation19_spill] sm:$0xff] %v5437_v28  ;;  %v503_v30 = vsel %vm7972_vm0, %v5437_v28, 0.0  ;;  %v524_v34 = vsel %vm7972_vm0, %v5443_v31, 0.0  ;;  %v5457_v39 = vunpack.c.h.bf16 %v4878_v24  ;;  %v5459_v40 = vunpack.c.l.bf16 %v4875_v35 }
  0x45   : > { %453 = vadd.xlane.f32.xlu0 %v452_v12  ;;  %7996 = vst [vmem:[#allocation20_spill] sm:$0xff] %v5443_v31  ;;  %7997 = vst [vmem:[#allocation21_spill] sm:$0xff] %v5455_v38  ;;  %v461_v41 = vsel %vm7972_vm0, %v5455_v38, 0.0  ;;  %v732_v42 = vsel %vm7972_vm0, %v5394_v4, -inf  ;;  %v5471_v47 = vunpack.c.l.bf16 %v4885_v43  ;;  %v5473_v48 = vunpack.c.l.bf16 %v4882_v44 }
  0x46   : > { %7998 = vst [vmem:[#allocation22_spill] sm:$0xff] %v5457_v39  ;;  %7999 = vst [vmem:[#allocation23_spill] sm:$0xff] %v5459_v40  ;;  %v506_v45 = vsel %vm7972_vm0, %v5457_v39, 0.0  ;;  %v485_v46 = vsel %vm7972_vm0, %v5459_v40, 0.0  ;;  %v5479_v51 = vunpack.c.h.bf16 %v4885_v43  ;;  %v711_v52 = vsel %vm7972_vm0, %v5410_v13, -inf  ;;  %v4890_v43 = vld [vmem:[%s5386_s26 + $0xa8] sm:$0xff]  }
  0x47   : > { %8000 = vst [vmem:[#allocation24_spill] sm:$0xff] %v5471_v47  ;;  %8001 = vst [vmem:[#allocation25_spill] sm:$0xff] %v5473_v48  ;;  %v545_v49 = vsel %vm7972_vm0, %v5471_v47, 0.0  ;;  %v527_v50 = vsel %vm7972_vm0, %v5473_v48, 0.0  ;;  %v5485_v54 = vunpack.c.h.bf16 %v4871_v32  ;;  %v753_v55 = vsel %vm7972_vm0, %v5417_v17, -inf }
  0x48   : > { %480 = vadd.xlane.f32.xlu1 %v479_v15  ;;  %8002 = vst [vmem:[#allocation26_spill] sm:$0xff] %v5479_v51  ;;  %v548_v53 = vsel %vm7972_vm0, %v5479_v51, 0.0  ;;  %v735_v56 = vsel %vm7972_vm0, %v5404_v10, -inf  ;;  %v756_v59 = vsel %vm7972_vm0, %v5415_v16, -inf  ;;  %v5497_v61 = vunpack.c.l.bf16 %v4879_v57 }
  0x49   : > { %456 = vadd.xlane.f32.xlu0 %v455_v18  ;;  %8003 = vst [vmem:[#allocation27_spill] sm:$0xff] %v5485_v54  ;;  %v464_v58 = vsel %vm7972_vm0, %v5485_v54, 0.0  ;;  %v5499_v62 = vunpack.c.h.bf16 %v4875_v35  ;;  %v5505_v1 = vunpack.c.l.bf16 %v4886_v60  ;;  %v5507_v6 = vunpack.c.h.bf16 %v4882_v44 }
  0x4a   : > { %8004 = vst [vmem:[#allocation28_spill] sm:$0xff] %v5497_v61  ;;  %v509_v63 = vsel %vm7972_vm0, %v5497_v61, 0.0  ;;  %v5514_v11 = vunpack.c.h.bf16 %v4889_v7  ;;  %v5516_v12 = vunpack.c.l.bf16 %v4889_v7  ;;  %v738_v18 = vsel %vm7972_vm0, %v5425_v21, -inf }
  0x4b   : > { %8005 = vst [vmem:[#allocation29_spill] sm:$0xff] %v5499_v62  ;;  %v488_v0 = vsel %vm7972_vm0, %v5499_v62, 0.0  ;;  %8006 = vst [vmem:[#allocation30_spill] sm:$0xff] %v5505_v1  ;;  %v551_v8 = vsel %vm7972_vm0, %v5505_v1, 0.0  ;;  %v530_v9 = vsel %vm7972_vm0, %v5507_v6, 0.0  ;;  %v777_v22 = vsel %vm7972_vm0, %v5435_v27, -inf }
  0x4c   : > { %501 = vadd.xlane.f32.xlu1 %v500_v19  ;;  %8007 = vst [vmem:[#allocation31_spill] sm:$0xff] %v5507_v6  ;;  %8008 = vst [vmem:[#allocation32_spill] sm:$0xff] %v5514_v11  ;;  %v572_v14 = vsel %vm7972_vm0, %v5514_v11, 0.0  ;;  %v569_v15 = vsel %vm7972_vm0, %v5516_v12, 0.0  ;;  %v714_v19 = vsel %vm7972_vm0, %v5428_v23, -inf  ;;  %v759_v24 = vsel %vm7972_vm0, %v5437_v28, -inf }
  0x4d   : > { %498 = vadd.xlane.f32.xlu0 %v497_v20  ;;  %8009 = vst [vmem:[#allocation33_spill] sm:$0xff] %v5516_v12  ;;  %v4872_v20 = vld [vmem:[%s5386_s26 + $0x18] sm:$0xff]   ;;  %v5538_v32 = vunpack.c.h.bf16 %v4879_v57  ;;  %v762_v57 = vsel %vm7972_vm0, %v5457_v39, -inf }
  0x4f   : > { %8011 = vst [vmem:[#allocation35_spill] sm:$0xff] %v5538_v32  ;;  %v512_v35 = vsel %vm7972_vm0, %v5538_v32, 0.0 }
  0x50   : > { %483 = vadd.xlane.f32.xlu1 %v482_v25  ;;  %v5531_v25 = vunpack.c.l.bf16 %v4872_v20 }
  0x51   : > { %459 = vadd.xlane.f32.xlu0 %v458_v26  ;;  %v4876_v26 = vld [vmem:[%s5386_s26 + $0x38] sm:$0xff]  }
  0x52   : > { %8010 = vst [vmem:[#allocation34_spill] sm:$0xff] %v5531_v25 }
  0x54   : > { %522 = vadd.xlane.f32.xlu1 %v521_v29  ;;  %v467_v29 = vsel %vm7972_vm0, %v5531_v25, 0.0 }
  0x55   : > { %504 = vadd.xlane.f32.xlu0 %v503_v30  ;;  %v780_v30 = vsel %vm7972_vm0, %v5443_v31, -inf }
  0x58   : > { %706 = vmax.xlane.f32.xlu1 %v705_v33  ;;  %v5540_v33 = vunpack.c.l.bf16 %v4876_v26 }
  0x59   : > { %525 = vadd.xlane.f32.xlu0 %v524_v34  ;;  %v4883_v34 = vld [vmem:[%s5386_s26 + $0x70] sm:$0xff]  }
  0x5a   : > { %8012 = vst [vmem:[#allocation36_spill] sm:$0xff] %v5540_v33 }
  0x5c   : > { %730 = vmax.xlane.f32.xlu1 %v729_v36  ;;  %v491_v36 = vsel %vm7972_vm0, %v5540_v33, 0.0 }
  0x5d   : > { %709 = vmax.xlane.f32.xlu0 %v708_v37  ;;  %v5547_v37 = vunpack.c.h.bf16 %v4886_v60  ;;  %v783_v60 = vsel %vm7972_vm0, %v5473_v48, -inf }
  0x5f   : > { %8013 = vst [vmem:[#allocation37_spill] sm:$0xff] %v5547_v37  ;;  %v554_v44 = vsel %vm7972_vm0, %v5547_v37, 0.0 }
  0x60   : > { %462 = vadd.xlane.f32.xlu1 %v461_v41  ;;  %v5549_v41 = vunpack.c.l.bf16 %v4883_v34 }
  0x61   : > { %733 = vmax.xlane.f32.xlu0 %v732_v42  ;;  %v4893_v42 = vld [vmem:[%s5386_s26 + $0xc0] sm:$0xff]  }
  0x62   : > { %8014 = vst [vmem:[#allocation38_spill] sm:$0xff] %v5549_v41 }
  0x64   : > { %507 = vadd.xlane.f32.xlu1 %v506_v45  ;;  %v533_v45 = vsel %vm7972_vm0, %v5549_v41, 0.0 }
  0x65   : > { %486 = vadd.xlane.f32.xlu0 %v485_v46  ;;  %v5557_v46 = vunpack.c.l.bf16 %v4893_v42 }
  0x67   : > { %8015 = vst [vmem:[#allocation39_spill] sm:$0xff] %v5557_v46 }
  0x68   : > { %546 = vadd.xlane.f32.xlu1 %v545_v49  ;;  %v5559_v49 = vunpack.c.l.bf16 %v4890_v43 }
  0x69   : > { %528 = vadd.xlane.f32.xlu0 %v527_v50  ;;  %v593_v50 = vsel %vm7972_vm0, %v5557_v46, 0.0 }
  0x6a   : > { %8016 = vst [vmem:[#allocation40_spill] sm:$0xff] %v5559_v49 }
  0x6c   : > { %712 = vmax.xlane.f32.xlu1 %v711_v52  ;;  %v575_v52 = vsel %vm7972_vm0, %v5559_v49, 0.0 }
  0x6d   : > { %549 = vadd.xlane.f32.xlu0 %v548_v53  ;;  %v5565_v53 = vunpack.c.h.bf16 %v4893_v42 }
  0x6f   : > { %8017 = vst [vmem:[#allocation41_spill] sm:$0xff] %v5565_v53 }
  0x70   : > { %754 = vmax.xlane.f32.xlu1 %v753_v55  ;;  %v717_v55 = vsel %vm7972_vm0, %v5455_v38, -inf }
  0x71   : > { %736 = vmax.xlane.f32.xlu0 %v735_v56  ;;  %v596_v56 = vsel %vm7972_vm0, %v5565_v53, 0.0 }
  0x74   : > { %465 = vadd.xlane.f32.xlu1 %v464_v58  ;;  %v741_v58 = vsel %vm7972_vm0, %v5459_v40, -inf }
  0x75   : > { %757 = vmax.xlane.f32.xlu0 %v756_v59  ;;  %v801_v59 = vsel %vm7972_vm0, %v5471_v47, -inf }
  0x78   : > { %510 = vadd.xlane.f32.xlu1 %v509_v63  ;;  %v5579_v63 = vunpack.c.h.bf16 %v4872_v20 }
  0x79   : > { %489 = vadd.xlane.f32.xlu0 %v488_v0  ;;  %v4880_v0 = vld [vmem:[%s5386_s26 + $0x58] sm:$0xff]  }
  0x7a   : > { %8018 = vst [vmem:[#allocation42_spill] sm:$0xff] %v5579_v63  ;;  %v470_v7 = vsel %vm7972_vm0, %v5579_v63, 0.0  ;;  %v726_v39 = vsel %vm7972_vm0, %v5579_v63, -inf }
  0x7c   : > { %552 = vadd.xlane.f32.xlu1 %v551_v8  ;;  %v804_v8 = vsel %vm7972_vm0, %v5479_v51, -inf }
  0x7d   : > { %531 = vadd.xlane.f32.xlu0 %v530_v9  ;;  %v5586_v9 = vunpack.c.l.bf16 %v4880_v0 }
  0x7f   : > { %8019 = vst [vmem:[#allocation43_spill] sm:$0xff] %v5586_v9 }
  0x80   : > { %573 = vadd.xlane.f32.xlu1 %v572_v14  ;;  %v5588_v14 = vunpack.c.h.bf16 %v4876_v26 }
  0x81   : > { %570 = vadd.xlane.f32.xlu0 %v569_v15  ;;  %v4887_v15 = vld [vmem:[%s5386_s26 + $0x90] sm:$0xff]  }
  0x82   : > { %8020 = vst [vmem:[#allocation44_spill] sm:$0xff] %v5588_v14  ;;  %v5595_v20 = vunpack.c.l.bf16 %v4887_v15 }
  0x84   : > { %739 = vmax.xlane.f32.xlu1 %v738_v18  ;;  %v515_v18 = vsel %vm7972_vm0, %v5586_v9, 0.0  ;;  %8021 = vst [vmem:[#allocation45_spill] sm:$0xff] %v5595_v20  ;;  %v557_v26 = vsel %vm7972_vm0, %v5595_v20, 0.0 }
  0x85   : > { %715 = vmax.xlane.f32.xlu0 %v714_v19  ;;  %v494_v19 = vsel %vm7972_vm0, %v5588_v14, 0.0 }
  0x88   : > { %778 = vmax.xlane.f32.xlu1 %v777_v22  ;;  %v5597_v22 = vunpack.c.h.bf16 %v4883_v34 }
  0x89   : > { %760 = vmax.xlane.f32.xlu0 %v759_v24  ;;  %v4894_v24 = vld [vmem:[%s5386_s26 + $0xc8] sm:$0xff]  }
  0x8a   : > { %8022 = vst [vmem:[#allocation46_spill] sm:$0xff] %v5597_v22 }
  0x8c   : > { %468 = vadd.xlane.f32.xlu1 %v467_v29  ;;  %v536_v29 = vsel %vm7972_vm0, %v5597_v22, 0.0 }
  0x8d   : > { %781 = vmax.xlane.f32.xlu0 %v780_v30  ;;  %v5604_v30 = vunpack.c.l.bf16 %v4894_v24 }
  0x8f   : > { %8023 = vst [vmem:[#allocation47_spill] sm:$0xff] %v5604_v30  ;;  %v599_v34 = vsel %vm7972_vm0, %v5604_v30, 0.0  ;;  %v855_v63 = vsel %vm7972_vm0, %v5604_v30, -inf }
  0x90   : > { %513 = vadd.xlane.f32.xlu1 %v512_v35  ;;  %v5606_v35 = vunpack.c.h.bf16 %v4890_v43 }
  0x91   : > { %492 = vadd.xlane.f32.xlu0 %v491_v36  ;;  %v4897_v36 = vld [vmem:[%s5386_s26 + $0xe0] sm:$0xff]  }
  0x92   : > { %8024 = vst [vmem:[#allocation48_spill] sm:$0xff] %v5606_v35  ;;  %v578_v42 = vsel %vm7972_vm0, %v5606_v35, 0.0 }
  0x94   : > { %555 = vadd.xlane.f32.xlu1 %v554_v44  ;;  %v5613_v44 = vunpack.c.h.bf16 %v4897_v36 }
  0x95   : > { %534 = vadd.xlane.f32.xlu0 %v533_v45  ;;  %v5615_v45 = vunpack.c.l.bf16 %v4897_v36  ;;  %v5648_v36 = vld [vmem:[%s5386_s26 + $0xb0] sm:$0xff]  }
  0x96   : > { %8025 = vst [vmem:[#allocation49_spill] sm:$0xff] %v5613_v44  ;;  %v620_v43 = vsel %vm7972_vm0, %v5613_v44, 0.0 }
  0x97   : > { %8026 = vst [vmem:[#allocation50_spill] sm:$0xff] %v5615_v45 }
  0x98   : > { %594 = vadd.xlane.f32.xlu1 %v593_v50  ;;  %v617_v50 = vsel %vm7972_vm0, %v5615_v45, 0.0 }
  0x99   : > { %576 = vadd.xlane.f32.xlu0 %v575_v52  ;;  %v744_v52 = vsel %vm7972_vm0, %v5499_v62, -inf }
  0x9c   : > { %718 = vmax.xlane.f32.xlu1 %v717_v55  ;;  %v720_v55 = vsel %vm7972_vm0, %v5485_v54, -inf }
  0x9d   : > { %597 = vadd.xlane.f32.xlu0 %v596_v56  ;;  %v786_v56 = vsel %vm7972_vm0, %v5507_v6, -inf }
  0xa0   : > { %763 = vmax.xlane.f32.xlu1 %v762_v57  ;;  %v765_v57 = vsel %vm7972_vm0, %v5497_v61, -inf  ;;  %v723_v61 = vsel %vm7972_vm0, %v5531_v25, -inf }
  0xa1   : > { %742 = vmax.xlane.f32.xlu0 %v741_v58  ;;  %v825_v58 = vsel %vm7972_vm0, %v5516_v12, -inf }
  0xa4   : > { %802 = vmax.xlane.f32.xlu1 %v801_v59  ;;  %v807_v59 = vsel %vm7972_vm0, %v5505_v1, -inf }
  0xa5   : > { %784 = vmax.xlane.f32.xlu0 %v783_v60  ;;  %v5633_v60 = vunpack.c.h.bf16 %v4880_v0 }
  0xa7   : > { %8027 = vst [vmem:[#allocation51_spill] sm:$0xff] %v5633_v60 }
  0xa8   : > { %471 = vadd.xlane.f32.xlu1 %v470_v7  ;;  %v5636_v7 = vld [vmem:[%s5386_s26 + $0x78] sm:$0xff]  }
  0xa9   : > { %805 = vmax.xlane.f32.xlu0 %v804_v8  ;;  %v518_v8 = vsel %vm7972_vm0, %v5633_v60, 0.0 }
  0xac   : > { %516 = vadd.xlane.f32.xlu1 %v515_v18  ;;  %v828_v18 = vsel %vm7972_vm0, %v5514_v11, -inf }
  0xad   : > { %495 = vadd.xlane.f32.xlu0 %v494_v19  ;;  %v5642_v19 = vunpack.c.h.bf16 %v4887_v15 }
  0xaf   : > { %8028 = vst [vmem:[#allocation52_spill] sm:$0xff] %v5642_v19  ;;  %v560_v0 = vsel %vm7972_vm0, %v5642_v19, 0.0 }
  0xb0   : > { %558 = vadd.xlane.f32.xlu1 %v557_v26  ;;  %v5645_v26 = vunpack.c.l.bf16 %v5636_v7 }
  0xb1   : > { %537 = vadd.xlane.f32.xlu0 %v536_v29  ;;  %v961_v29 = vlaneseq }
  0xb2   : > { %8029 = vst [vmem:[#allocation53_spill] sm:$0xff] %v5645_v26 }
  0xb3   : > { %v5659_v15 = vand.u32 127, %v961_v29 }
  0xb4   : > { %600 = vadd.xlane.f32.xlu1 %v599_v34  ;;  %v539_v34 = vsel %vm7972_vm0, %v5645_v26, 0.0 }
  0xb5   : > { %579 = vadd.xlane.f32.xlu0 %v578_v42  ;;  %v5654_v42 = vunpack.c.h.bf16 %v4894_v24  ;;  %8032 = vst [vmem:[#allocation56_spill] sm:$0xff] %v5659_v15  ;;  %v1002_v21 = vadd.s32 4294967248, %v5659_v15 }
  0xb7   : > { %8030 = vst [vmem:[#allocation54_spill] sm:$0xff] %v5654_v42 }
  0xb8   : > { %621 = vadd.xlane.f32.xlu1 %v620_v43  ;;  %v5657_v43 = vunpack.c.l.bf16 %v5648_v36 }
  0xb9   : > { %618 = vadd.xlane.f32.xlu0 %v617_v50  ;;  %v5662_v50 = vld [vmem:[%s5386_s26 + $0xe8] sm:$0xff]  }
  0xba   : > { %8031 = vst [vmem:[#allocation55_spill] sm:$0xff] %v5657_v43  ;;  %v581_v24 = vsel %vm7972_vm0, %v5657_v43, 0.0 }
  0xbc   : > { %745 = vmax.xlane.f32.xlu1 %v744_v52  ;;  %v5664_v52 = vshrl.u32 %v961_v29, 7  ;;  %v974_v29 = vadd.s32 4294967280, %v5659_v15 }
  0xbd   : > { %721 = vmax.xlane.f32.xlu0 %v720_v55  ;;  %v967_v55 = vadd.s32 4294967288, %v5659_v15 }
  0xbe   : > { %8033 = vst [vmem:[#allocation57_spill] sm:$0xff] %v5664_v52  ;;  %v5964_v47 = vsub.s32 %v1002_v21, %v5664_v52 }
  0xc0   : > { %787 = vmax.xlane.f32.xlu1 %v786_v56  ;;  %8056 = vst [vmem:[#allocation80_spill] sm:$0xff] %v5964_v47 }
  0xc1   : > { %766 = vmax.xlane.f32.xlu0 %v765_v57 }
  0xc4   : > { %826 = vmax.xlane.f32.xlu1 %v825_v58  ;;  %v602_v58 = vsel %vm7972_vm0, %v5654_v42, 0.0 }
  0xc5   : > { %808 = vmax.xlane.f32.xlu0 %v807_v59  ;;  %v5672_v59 = vunpack.c.l.bf16 %v5662_v50 }
  0xc7   : > { %8034 = vst [vmem:[#allocation58_spill] sm:$0xff] %v5672_v59  ;;  %v623_v40 = vsel %vm7972_vm0, %v5672_v59, 0.0 }
  0xc8   : > { %519 = vadd.xlane.f32.xlu1 %v518_v8  ;;  %v5676_v8 = vsub.s32 %v5659_v15, %v5664_v52 }
  0xc9   : > { %829 = vmax.xlane.f32.xlu0 %v828_v18 }
  0xca   : > { %8035 = vst [vmem:[#allocation59_spill] sm:$0xff] %v5676_v8 }
  0xcc   : > { %561 = vadd.xlane.f32.xlu1 %v560_v0 }
  0xcd   : > { %540 = vadd.xlane.f32.xlu0 %v539_v34  ;;  %v475_v56 = vpop.xlane.xlu1 %474  ;;  %v5680_v34 = vsub.s32 %v967_v55, %v5664_v52 }
  0xce   : > { %v451_v57 = vpop.xlane.xlu0 %450  ;;  %v649_v18 = vmul.f32 0.015625, %v475_v56 }
  0xcf   : > { %v641_v0 = vmul.f32 0.015625, %v451_v57  ;;  %8036 = vst [vmem:[#allocation60_spill] sm:$0xff] %v5680_v34  ;;  %v5688_v57 = vsub.s32 %v974_v29, %v5664_v52 }
  0xd0   : > { %603 = vadd.xlane.f32.xlu1 %v602_v58  ;;  %v1019_v56 = vrot.slane %v649_v18, %v5676_v8 }
  0xd1   : > { %582 = vadd.xlane.f32.xlu0 %v581_v24  ;;  %v478_v54 = vpop.xlane.xlu1 %477  ;;  %8037 = vst [vmem:[#allocation61_spill] sm:$0xff] %v5688_v57  ;;  %v966_v58 = vrot.slane %v641_v0, %v5676_v8 }
  0xd2   : > { %v454_v62 = vpop.xlane.xlu0 %453  ;;  %v650_v6 = vmul.f32 0.015625, %v478_v54  ;;  %v768_v54 = vsel %vm7972_vm0, %v5538_v32, -inf }
  0xd3   : > { %v642_v38 = vmul.f32 0.015625, %v454_v62  ;;  %v747_v62 = vsel %vm7972_vm0, %v5540_v33, -inf  ;;  %v810_v33 = vsel %vm7972_vm0, %v5547_v37, -inf }
  0xd4   : > { %v1023_v55 = vrot.slane %v650_v6, %v5680_v34  ;;  %724 = vmax.xlane.f32.xlu1 %v723_v61 }
  0xd5   : > { %v971_v24 = vrot.slane %v642_v38, %v5680_v34  ;;  %624 = vadd.xlane.f32.xlu0 %v623_v40  ;;  %v481_v25 = vpop.xlane.xlu1 %480  ;;  %v981_v40 = vadd.s32 4294967272, %v5659_v15 }
  0xd6   : > { %v457_v12 = vpop.xlane.xlu0 %456  ;;  %v1024_v18 = vsel %vm972_vm1, %v1023_v55, %v1019_v56  ;;  %v651_v1 = vmul.f32 0.015625, %v481_v25  ;;  %v789_v56 = vsel %vm7972_vm0, %v5549_v41, -inf  ;;  %v849_v41 = vsel %vm7972_vm0, %v5557_v46, -inf }
  0xd7   : > { %v973_v29 = vsel %vm972_vm1, %v971_v24, %v966_v58  ;;  %v643_v0 = vmul.f32 0.015625, %v457_v12 }
  0xd8   : > { %v1028_v6 = vrot.slane %v651_v1, %v5688_v57  ;;  %769 = vmax.xlane.f32.xlu1 %v768_v54  ;;  %v5711_v54 = vsub.s32 %v981_v40, %v5664_v52 }
  0xd9   : > { %v978_v38 = vrot.slane %v643_v0, %v5688_v57  ;;  %748 = vmax.xlane.f32.xlu0 %v747_v62  ;;  %v502_v61 = vpop.xlane.xlu1 %501 }
  0xda   : > { %v499_v32 = vpop.xlane.xlu0 %498  ;;  %v1029_v25 = vsel %vm979_vm2, %v1028_v6, %v1024_v18  ;;  %v658_v1 = vmul.f32 0.015625, %v502_v61  ;;  %8038 = vst [vmem:[#allocation62_spill] sm:$0xff] %v5711_v54  ;;  %v831_v18 = vsel %vm7972_vm0, %v5559_v49, -inf }
  0xdb   : > { %v980_v12 = vsel %vm979_vm2, %v978_v38, %v973_v29  ;;  %v657_v58 = vmul.f32 0.015625, %v499_v32  ;;  %v5718_v29 = vunpack.c.h.bf16 %v5636_v7 }
  0xdc   : > { %v1062_v55 = vrot.slane %v658_v1, %v5680_v34  ;;  %811 = vmax.xlane.f32.xlu1 %v810_v33  ;;  %v5722_v33 = vld [vmem:[%s5386_s26 + $0x98] sm:$0xff]  }
  0xdd   : > { %v1058_v24 = vrot.slane %v657_v58, %v5676_v8  ;;  %790 = vmax.xlane.f32.xlu0 %v789_v56  ;;  %v484_v62 = vpop.xlane.xlu1 %483  ;;  %8039 = vst [vmem:[#allocation63_spill] sm:$0xff] %v5718_v29  ;;  %v542_v7 = vsel %vm7972_vm0, %v5718_v29, 0.0  ;;  %v852_v58 = vsel %vm7972_vm0, %v5565_v53, -inf }
  0xde   : > { %v460_v0 = vpop.xlane.xlu0 %459  ;;  %v652_v6 = vmul.f32 0.015625, %v484_v62 }
  0xdf   : > { %v1063_v32 = vsel %vm972_vm1, %v1062_v55, %v1058_v24  ;;  %v644_v38 = vmul.f32 0.015625, %v460_v0  ;;  %v5731_v55 = vunpack.c.h.bf16 %v5648_v36  ;;  %v5734_v24 = vunpack.c.l.bf16 %v5722_v33 }
  0xe0   : > { %v1033_v40 = vrot.slane %v652_v6, %v5711_v54  ;;  %850 = vmax.xlane.f32.xlu1 %v849_v41 }
  0xe1   : > { %v985_v61 = vrot.slane %v644_v38, %v5711_v54  ;;  %832 = vmax.xlane.f32.xlu0 %v831_v18  ;;  %v523_v56 = vpop.xlane.xlu1 %522  ;;  %8040 = vst [vmem:[#allocation64_spill] sm:$0xff] %v5731_v55  ;;  %8041 = vst [vmem:[#allocation65_spill] sm:$0xff] %v5734_v24  ;;  %v5739_v18 = vld [vmem:[%s5386_s26 + $0xd0] sm:$0xff]   ;;  %v584_v36 = vsel %vm7972_vm0, %v5731_v55, 0.0  ;;  %v563_v53 = vsel %vm7972_vm0, %v5734_v24, 0.0 }
  0xe2   : > { %v505_v1 = vpop.xlane.xlu0 %504  ;;  %v1034_v62 = vsel %vm986_vm3, %v1033_v40, %v1029_v25  ;;  %v665_v6 = vmul.f32 0.015625, %v523_v56  ;;  %v5747_v25 = vunpack.c.h.bf16 %v5662_v50 }
  0xe3   : > { %v987_v0 = vsel %vm986_vm3, %v985_v61, %v980_v12  ;;  %v659_v41 = vmul.f32 0.015625, %v505_v1  ;;  %v5750_v12 = vunpack.c.l.bf16 %v5739_v18 }
  0xe4   : > { %543 = vadd.xlane.f32.xlu1 %v542_v7  ;;  %8042 = vst [vmem:[#allocation66_spill] sm:$0xff] %v5747_v25  ;;  %v1097_v56 = vrot.slane %v665_v6, %v5676_v8  ;;  %v988_v7 = vadd.s32 4294967264, %v5659_v15  ;;  %v626_v50 = vsel %vm7972_vm0, %v5747_v25, 0.0 }
  0xe5   : > { %v1067_v38 = vrot.slane %v659_v41, %v5688_v57  ;;  %853 = vmax.xlane.f32.xlu0 %v852_v58  ;;  %v707_v37 = vpop.xlane.xlu1 %706  ;;  %8043 = vst [vmem:[#allocation67_spill] sm:$0xff] %v5750_v12  ;;  %v605_v46 = vsel %vm7972_vm0, %v5750_v12, 0.0 }
  0xe6   : > { %v526_v49 = vpop.xlane.xlu0 %525  ;;  %v1371_v11 = vrot.slane %v707_v37, %v5676_v8 }
  0xe7   : > { %v1068_v40 = vsel %vm979_vm2, %v1067_v38, %v1063_v32  ;;  %v666_v61 = vmul.f32 0.015625, %v526_v49 }
  0xe8   : > { %585 = vadd.xlane.f32.xlu1 %v584_v36 }
  0xe9   : > { %v1101_v1 = vrot.slane %v666_v61, %v5680_v34  ;;  %564 = vadd.xlane.f32.xlu0 %v563_v53  ;;  %v731_v58 = vpop.xlane.xlu1 %730  ;;  %v5765_v53 = vsub.s32 %v988_v7, %v5664_v52  ;;  %v750_v61 = vsel %vm7972_vm0, %v5588_v14, -inf }
  0xea   : > { %v710_v41 = vpop.xlane.xlu0 %709  ;;  %v1410_v37 = vrot.slane %v731_v58, %v5676_v8 }
  0xeb   : > { %v1102_v49 = vsel %vm972_vm1, %v1101_v1, %v1097_v56  ;;  %v1375_v32 = vrot.slane %v710_v41, %v5680_v34  ;;  %8044 = vst [vmem:[#allocation68_spill] sm:$0xff] %v5765_v53 }
  0xec   : > { %627 = vadd.xlane.f32.xlu1 %v626_v50  ;;  %v792_v50 = vsel %vm7972_vm0, %v5597_v22, -inf }
  0xed   : > { %v1376_v6 = vsel %vm972_vm1, %v1375_v32, %v1371_v11  ;;  %606 = vadd.xlane.f32.xlu0 %v605_v46  ;;  %v463_v38 = vpop.xlane.xlu1 %462  ;;  %v771_v32 = vsel %vm7972_vm0, %v5586_v9, -inf }
  0xee   : > { %v734_v36 = vpop.xlane.xlu0 %733  ;;  %v645_v56 = vmul.f32 0.015625, %v463_v38 }
  0xef   : > { %v1414_v1 = vrot.slane %v734_v36, %v5680_v34 }
  0xf0   : > { %v992_v11 = vrot.slane %v645_v56, %v5765_v53  ;;  %751 = vmax.xlane.f32.xlu1 %v750_v61 }
  0xf1   : > { %v1415_v46 = vsel %vm972_vm1, %v1414_v1, %v1410_v37  ;;  %727 = vmax.xlane.f32.xlu0 %v726_v39  ;;  %v508_v7 = vpop.xlane.xlu1 %507  ;;  %v834_v37 = vsel %vm7972_vm0, %v5606_v35, -inf  ;;  %v813_v1 = vsel %vm7972_vm0, %v5595_v20, -inf }
  0xf2   : > { %v487_v41 = vpop.xlane.xlu0 %486  ;;  %v5780_v58 = vsel %vm993_vm4, %v992_v11, %v987_v0  ;;  %v660_v38 = vmul.f32 0.015625, %v508_v7 }
  0xf3   : > { %v653_v36 = vmul.f32 0.015625, %v487_v41 }
  0xf4   : > { %v1072_v14 = vrot.slane %v660_v38, %v5711_v54  ;;  %793 = vmax.xlane.f32.xlu1 %v792_v50 }
  0xf5   : > { %v1038_v56 = vrot.slane %v653_v36, %v5765_v53  ;;  %772 = vmax.xlane.f32.xlu0 %v771_v32  ;;  %v547_v39 = vpop.xlane.xlu1 %546  ;;  %v873_v36 = vsel %vm7972_vm0, %v5615_v45, -inf  ;;  %v774_v45 = vsel %vm7972_vm0, %v5633_v60, -inf }
  0xf6   : > { %v529_v61 = vpop.xlane.xlu0 %528  ;;  %v5789_v0 = vsel %vm986_vm3, %v1072_v14, %v1068_v40  ;;  %v673_v41 = vmul.f32 0.015625, %v547_v39  ;;  %v5800_v14 = vunpack.c.h.bf16 %v5722_v33  ;;  %v4892_v39 = vld [vmem:[%s5386_s26 + $0xb8] sm:$0xff]   ;;  %v995_v33 = vadd.s32 4294967256, %v5659_v15 }
  0xf7   : > { %v5792_v11 = vsel %vm993_vm4, %v1038_v56, %v1034_v62  ;;  %v667_v7 = vmul.f32 0.015625, %v529_v61 }
  0xf8   : > { %835 = vmax.xlane.f32.xlu1 %v834_v37  ;;  %8045 = vst [vmem:[#allocation69_spill] sm:$0xff] %v5800_v14  ;;  %v1136_v61 = vrot.slane %v673_v41, %v5676_v8  ;;  %v5820_v41 = vunpack.c.l.bf16 %v4892_v39 }
  0xf9   : > { %v1106_v50 = vrot.slane %v667_v7, %v5688_v57  ;;  %814 = vmax.xlane.f32.xlu0 %v813_v1  ;;  %v713_v32 = vpop.xlane.xlu1 %712 }
  0xfa   : > { %v550_v38 = vpop.xlane.xlu0 %549  ;;  %v1380_v40 = vrot.slane %v713_v32, %v5688_v57  ;;  %v5818_v32 = vunpack.c.h.bf16 %v5739_v18  ;;  %8047 = vst [vmem:[#allocation71_spill] sm:$0xff] %v5820_v41 }
  0xfb   : > { %v5803_v62 = vsel %vm979_vm2, %v1106_v50, %v1102_v49  ;;  %v674_v56 = vmul.f32 0.015625, %v550_v38  ;;  %v566_v49 = vsel %vm7972_vm0, %v5800_v14, 0.0  ;;  %v876_v50 = vsel %vm7972_vm0, %v5613_v44, -inf  ;;  %v4899_v38 = vld [vmem:[%s5386_s26 + $0xf0] sm:$0xff]   ;;  %v4900_v44 = vld [vmem:[%s5386_s26 + $0xf8] sm:$0xff]  }
  0xfc   : > { %v5809_v37 = vsel %vm979_vm2, %v1380_v40, %v1376_v6  ;;  %874 = vmax.xlane.f32.xlu1 %v873_v36  ;;  %8046 = vst [vmem:[#allocation70_spill] sm:$0xff] %v5818_v32  ;;  %v5831_v40 = vsub.s32 %v995_v33, %v5664_v52  ;;  %v608_v18 = vsel %vm7972_vm0, %v5818_v32, 0.0 }
  0xfd   : > { %v1140_v1 = vrot.slane %v674_v56, %v5680_v34  ;;  %856 = vmax.xlane.f32.xlu0 %v855_v63  ;;  %v755_v7 = vpop.xlane.xlu1 %754 }
  0xfe   : > { %v737_v9 = vpop.xlane.xlu0 %736  ;;  %8048 = vst [vmem:[#allocation72_spill] sm:$0xff] %v5831_v40 }
  0xff   : > { %v5823_v6 = vsel %vm972_vm1, %v1140_v1, %v1136_v61  ;;  %v1419_v63 = vrot.slane %v737_v9, %v5688_v57  ;;  %v587_v61 = vsel %vm7972_vm0, %v5820_v41, 0.0  ;;  %v5837_v1 = vunpack.c.l.bf16 %v4899_v38 }
 0x100   : > { %567 = vadd.xlane.f32.xlu1 %v566_v49  ;;  %v1449_v9 = vrot.slane %v755_v7, %v5676_v8 }
 0x101   : > { %v5828_v36 = vsel %vm979_vm2, %v1419_v63, %v1415_v46  ;;  %877 = vmax.xlane.f32.xlu0 %v876_v50  ;;  %v466_v56 = vpop.xlane.xlu1 %465  ;;  %8049 = vst [vmem:[#allocation73_spill] sm:$0xff] %v5837_v1  ;;  %v629_v30 = vsel %vm7972_vm0, %v5837_v1, 0.0 }
 0x102   : > { %v758_v22 = vpop.xlane.xlu0 %757  ;;  %v646_v20 = vmul.f32 0.015625, %v466_v56 }
 0x103   : > { %v1453_v46 = vrot.slane %v758_v22, %v5680_v34 }
 0x104   : > { %v999_v49 = vrot.slane %v646_v20, %v5831_v40  ;;  %609 = vadd.xlane.f32.xlu1 %v608_v18 }
 0x105   : > { %v5843_v33 = vsel %vm972_vm1, %v1453_v46, %v1449_v9  ;;  %588 = vadd.xlane.f32.xlu0 %v587_v61  ;;  %v511_v50 = vpop.xlane.xlu1 %510  ;;  %v816_v46 = vsel %vm7972_vm0, %v5642_v19, -inf }
 0x106   : > { %v490_v63 = vpop.xlane.xlu0 %489  ;;  %v5851_v7 = vsel %vm7869_vm5, %v999_v49, %v5780_v58  ;;  %v661_v22 = vmul.f32 0.015625, %v511_v50  ;;  %v795_v58 = vsel %vm7972_vm0, %v5645_v26, -inf }
 0x107   : > { %v654_v56 = vmul.f32 0.015625, %v490_v63  ;;  %v858_v63 = vsel %vm7972_vm0, %v5654_v42, -inf }
 0x108   : > { %v1077_v20 = vrot.slane %v661_v22, %v5765_v53  ;;  %775 = vmax.xlane.f32.xlu1 %v774_v45  ;;  %v837_v22 = vsel %vm7972_vm0, %v5657_v43, -inf  ;;  %v861_v43 = vsel %vm7972_vm0, %v5750_v12, -inf }
 0x109   : > { %v1043_v9 = vrot.slane %v654_v56, %v5831_v40  ;;  %630 = vadd.xlane.f32.xlu0 %v629_v30  ;;  %v5855_v18 = vpop.xlane.xlu1 %552  ;;  %v5879_v56 = vunpack.c.h.bf16 %v4892_v39 }
 0x10a   : > { %v5857_v61 = vpop.xlane.xlu0 %531  ;;  %v5865_v49 = vsel %vm993_vm4, %v1077_v20, %v5789_v0  ;;  %v4896_v0 = vld [vmem:[%s5386_s26 + $0xd8] sm:$0xff]   ;;  %s4577_s26 = scalar_lea.sflag [#allocation4], %s311_s10 }
 0x10b   : > { %v5869_v50 = vsel %vm7869_vm5, %v1043_v9, %v5792_v11  ;;  %8050 = vst [vmem:[#allocation74_spill] sm:$0xff] %v5879_v56  ;;  %v590_v9 = vsel %vm7972_vm0, %v5879_v56, 0.0  ;;  %v5892_v60 = vunpack.c.l.bf16 %v4896_v0 }
 0x10c   : > { %817 = vmax.xlane.f32.xlu1 %v816_v46  ;;  %v879_v46 = vsel %vm7972_vm0, %v5672_v59, -inf }
 0x10d   : > { %796 = vmax.xlane.f32.xlu0 %v795_v58  ;;  %v5871_v30 = vpop.xlane.xlu1 %573  ;;  %v5890_v58 = vunpack.c.h.bf16 %v4899_v38  ;;  %8052 = vst [vmem:[#allocation76_spill] sm:$0xff] %v5892_v60  ;;  %v611_v19 = vsel %vm7972_vm0, %v5892_v60, 0.0 }
 0x10e   : > { %v5873_v45 = vpop.xlane.xlu0 %570 }
 0x10f   : > { %8051 = vst [vmem:[#allocation75_spill] sm:$0xff] %v5890_v58 }
 0x110   : > { %859 = vmax.xlane.f32.xlu1 %v858_v63 }
 0x111   : > { %838 = vmax.xlane.f32.xlu0 %v837_v22  ;;  %v5882_v20 = vpop.xlane.xlu1 %739  ;;  %v632_v22 = vsel %vm7972_vm0, %v5890_v58, 0.0 }
 0x112   : > { %v5884_v11 = vpop.xlane.xlu0 %715 }
 0x114   : > { %591 = vadd.xlane.f32.xlu1 %v590_v9  ;;  %v819_v9 = vsel %vm7972_vm0, %v5734_v24, -inf }
 0x115   : > { %880 = vmax.xlane.f32.xlu0 %v879_v46  ;;  %v5894_v39 = vpop.xlane.xlu1 %778  ;;  %v798_v46 = vsel %vm7972_vm0, %v5718_v29, -inf  ;;  %v5925_v29 = vunpack.c.l.bf16 %v4900_v44 }
 0x116   : > { %v5896_v63 = vpop.xlane.xlu0 %760 }
 0x117   : > { %8054 = vst [vmem:[#allocation78_spill] sm:$0xff] %v5925_v29 }
 0x118   : > { %633 = vadd.xlane.f32.xlu1 %v632_v22  ;;  %v5914_v22 = vunpack.c.h.bf16 %v4896_v0 }
 0x119   : > { %612 = vadd.xlane.f32.xlu0 %v611_v19  ;;  %v469_v59 = vpop.xlane.xlu1 %468  ;;  %v840_v19 = vsel %vm7972_vm0, %v5731_v55, -inf }
 0x11a   : > { %v5902_v38 = vpop.xlane.xlu0 %781  ;;  %8053 = vst [vmem:[#allocation77_spill] sm:$0xff] %v5914_v22  ;;  %v870_v27 = vsel %vm7972_vm0, %v5914_v22, -inf }
 0x11c   : > { %820 = vmax.xlane.f32.xlu1 %v819_v9  ;;  %v614_v9 = vsel %vm7972_vm0, %v5914_v22, 0.0 }
 0x11d   : > { %799 = vmax.xlane.f32.xlu0 %v798_v46  ;;  %v5908_v26 = vpop.xlane.xlu1 %513  ;;  %v882_v46 = vsel %vm7972_vm0, %v5747_v25, -inf  ;;  %v5943_v25 = vunpack.c.h.bf16 %v4900_v44 }
 0x11e   : > { %v493_v42 = vpop.xlane.xlu0 %492 }
 0x11f   : > { %8055 = vst [vmem:[#allocation79_spill] sm:$0xff] %v5943_v25  ;;  %v894_v22 = vsel %vm7972_vm0, %v5943_v25, -inf }
 0x120   : > { %862 = vmax.xlane.f32.xlu1 %v861_v43  ;;  %v822_v43 = vsel %vm7972_vm0, %v5800_v14, -inf }
 0x121   : > { %841 = vmax.xlane.f32.xlu0 %v840_v19  ;;  %v5917_v24 = vpop.xlane.xlu1 %555  ;;  %v635_v19 = vsel %vm7972_vm0, %v5925_v29, 0.0 }
 0x122   : > { %v5919_v35 = vpop.xlane.xlu0 %534 }
 0x124   : > { %615 = vadd.xlane.f32.xlu1 %v614_v9  ;;  %v864_v9 = vsel %vm7972_vm0, %v5818_v32, -inf }
 0x125   : > { %883 = vmax.xlane.f32.xlu0 %v882_v46  ;;  %v5927_v12 = vpop.xlane.xlu1 %594  ;;  %v843_v46 = vsel %vm7972_vm0, %v5820_v41, -inf  ;;  %v1009_v41 = vadd.s32 4294967240, %v5659_v15 }
 0x126   : > { %v5929_v0 = vpop.xlane.xlu0 %576 }
 0x128   : > { %823 = vmax.xlane.f32.xlu1 %v822_v43  ;;  %v638_v43 = vsel %vm7972_vm0, %v5943_v25, 0.0 }
 0x129   : > { %636 = vadd.xlane.f32.xlu0 %v635_v19  ;;  %v5935_v55 = vpop.xlane.xlu1 %718  ;;  %v885_v19 = vsel %vm7972_vm0, %v5837_v1, -inf  ;;  %v647_v1 = vmul.f32 0.015625, %v469_v59 }
 0x12a   : > { %v5937_v48 = vpop.xlane.xlu0 %597 }
 0x12b   : > { %v1006_v21 = vrot.slane %v647_v1, %v5964_v47 }
 0x12c   : > { %865 = vmax.xlane.f32.xlu1 %v864_v9  ;;  %v867_v9 = vsel %vm7972_vm0, %v5892_v60, -inf  ;;  %v888_v60 = vsel %vm7972_vm0, %v5890_v58, -inf }
 0x12d   : > { %844 = vmax.xlane.f32.xlu0 %v843_v46  ;;  %v5945_v14 = vpop.xlane.xlu1 %763  ;;  %v846_v46 = vsel %vm7972_vm0, %v5879_v56, -inf  ;;  %v5973_v56 = vsub.s32 %v1009_v41, %v5664_v52 }
 0x12e   : > { %v5947_v23 = vpop.xlane.xlu0 %742 }
 0x12f   : > { %8057 = vst [vmem:[#allocation81_spill] sm:$0xff] %v5973_v56 }
 0x130   : > { %639 = vadd.xlane.f32.xlu1 %v638_v43  ;;  %v655_v43 = vmul.f32 0.015625, %v493_v42 }
 0x131   : > { %886 = vmax.xlane.f32.xlu0 %v885_v19  ;;  %v5954_v32 = vpop.xlane.xlu1 %802 }
 0x132   : > { %v5956_v44 = vpop.xlane.xlu0 %784  ;;  %v1048_v59 = vrot.slane %v655_v43, %v5964_v47 }
 0x134   : > { %868 = vmax.xlane.f32.xlu1 %v867_v9  ;;  %v1049_v1 = vsel %vm1007_vm6, %v1048_v59, %v5869_v50 }
 0x135   : > { %847 = vmax.xlane.f32.xlu0 %v846_v46  ;;  %v472_v19 = vpop.xlane.xlu1 %471  ;;  %v891_v46 = vsel %vm7972_vm0, %v5925_v29, -inf }
 0x136   : > { %v5966_v51 = vpop.xlane.xlu0 %805  ;;  %v648_v15 = vmul.f32 0.015625, %v472_v19 }
 0x138   : > { %871 = vmax.xlane.f32.xlu1 %v870_v27  ;;  %v1013_v58 = vrot.slane %v648_v15, %v5973_v56 }
 0x139   : > { %889 = vmax.xlane.f32.xlu0 %v888_v60  ;;  %v517_v42 = vpop.xlane.xlu1 %516  ;;  %v1008_v60 = vsel %vm1007_vm6, %v1006_v21, %v5851_v7  ;;  %v7860_v7 = vmov 0.0   ;;  %v5058_v21 = vld [vmem:[%s7788_s1 + $0x10] sm:$0xff]  }
 0x13a   : > { %v496_v9 = vpop.xlane.xlu0 %495  ;;  %v1015_v25 = vsel %vm7870_vm7, %v1013_v58, %v1008_v60  ;;  %4961 = vmatprep.subr.bf16.mxu0 %v7860_v7  ;;  %4973 = vmatprep.subr.bf16.mxu1 %v7860_v7  ;;  %v5059_v60 = vld [vmem:[%s7788_s1 + $0x18] sm:$0xff]  }
 0x13b   : > { %v656_v41 = vmul.f32 0.015625, %v496_v9  ;;  %4969 = vmatprep.mubr.msk.bf16.mxu0 %vm5248_vm9, %v7860_v7  ;;  %4975 = vmatprep.mubr.msk.bf16.mxu1 %vm5248_vm9, %v7860_v7 }
 0x13c   : > { %895 = vmax.xlane.f32.xlu1 %v894_v22 }
 0x13d   : > { %v1053_v27 = vrot.slane %v656_v41, %v5973_v56  ;;  %892 = vmax.xlane.f32.xlu0 %v891_v46  ;;  %v5987_v43 = vpop.xlane.xlu1 %558  ;;  %v5056_v46 = vld [vmem:[%s7788_s1] sm:$0xff]  }
 0x13e   : > { %v538_v19 = vpop.xlane.xlu0 %537  ;;  %4962 = vmatpush3.bf16.msra.mxu0 %v5056_v46  ;;  %v662_v46 = vmul.f32 0.015625, %v5908_v26 }
 0x13f   : > { %v1054_v15 = vsel %vm7870_vm7, %v1053_v27, %v1049_v1  ;;  %4963 = vmatprep.subr.bf16.mxu0 %v7860_v7 }
 0x140   : > { %v1290_v9 = vsel %vm1289_vm8, %v1054_v15, %v1015_v25  ;;  %v5057_v25 = vld [vmem:[%s7788_s1 + $0x8] sm:$0xff]   ;;  %v1082_v31 = vrot.slane %v662_v46, %v5831_v40 }
 0x141   : > { %v5995_v22 = vpop.xlane.xlu1 %600 }
 0x142   : > { %v5997_v41 = vpop.xlane.xlu0 %579  ;;  %4964 = vmatpush3.bf16.msra.mxu0 %v5057_v25  ;;  %v663_v25 = vmul.f32 0.015625, %v517_v42  ;;  %v1083_v17 = vsel %vm7869_vm5, %v1082_v31, %v5865_v49 }
 0x143   : > { %4965 = vmatprep.subr.bf16.mxu0 %v7860_v7 }
 0x144   : > { %v1087_v28 = vrot.slane %v663_v25, %v5964_v47 }
 0x145   : > { %v6005_v50 = vpop.xlane.xlu1 %621 }
 0x146   : > { %v6007_v58 = vpop.xlane.xlu0 %618  ;;  %4966 = vmatpush3.bf16.msra.mxu0 %v5058_v21  ;;  %v1088_v26 = vsel %vm1007_vm6, %v1087_v28, %v1083_v17  ;;  %v668_v28 = vmul.f32 0.015625, %v5857_v61 }
 0x147   : > { %4967 = vmatprep.subr.bf16.mxu0 %v7860_v7 }
 0x148   : > { %v1111_v52 = vrot.slane %v668_v28, %v5711_v54 }
 0x149   : > { %v6013_v59 = vpop.xlane.xlu1 %745 }
 0x14a   : > { %v6015_v27 = vpop.xlane.xlu0 %721  ;;  %4968 = vmatpush3.bf16.msra.mxu0 %v5059_v60 }
 0x14d   : > { %v6021_v1 = vpop.xlane.xlu1 %787 }
 0x14e   : > { %v6023_v15 = vpop.xlane.xlu0 %766 }
 0x151   : > { %v6030_v21 = vpop.xlane.xlu1 %826 }
 0x152   : > { %8058 = vst [vmem:[#allocation82_spill] sm:$0xff] %v6030_v21  ;;  %v6032_v29 = vpop.xlane.xlu0 %808 }
 0x153   : > { %8059 = vst [vmem:[#allocation83_spill] sm:$0xff] %v6032_v29 }
 0x155   : > { %v520_v10 = vpop.xlane.xlu1 %519 }
 0x156   : > { %v6036_v60 = vpop.xlane.xlu0 %829  ;;  %v664_v13 = vmul.f32 0.015625, %v520_v10 }
 0x157   : > { %8060 = vst [vmem:[#allocation84_spill] sm:$0xff] %v6036_v60 }
 0x158   : > { %v1092_v7 = vrot.slane %v664_v13, %v5973_v56 }
 0x159   : > { %v6042_v42 = vpop.xlane.xlu1 %561 }
 0x15a   : > { %v541_v16 = vpop.xlane.xlu0 %540  ;;  %v1093_v2 = vsel %vm7870_vm7, %v1092_v7, %v1088_v26  ;;  %v669_v7 = vmul.f32 0.015625, %v5919_v35  ;;  %v670_v26 = vmul.f32 0.015625, %v538_v19  ;;  %v1112_v35 = vsel %vm986_vm3, %v1111_v52, %v5803_v62 }
 0x15b   : > { %v1292_v46 = vsel %vm1291_vm10, %v1093_v2, %v1290_v9  ;;  %v671_v2 = vmul.f32 0.015625, %v541_v16  ;;  %v1424_v52 = vrot.slane %v5882_v20, %v5711_v54  ;;  %v1390_v62 = vrot.slane %v5935_v55, %v5765_v53 }
 0x15c   : > { %v1116_v21 = vrot.slane %v669_v7, %v5765_v53  ;;  %v1121_v60 = vrot.slane %v670_v26, %v5831_v40 }
 0x15d   : > { %v6046_v25 = vpop.xlane.xlu1 %603  ;;  %v1425_v55 = vsel %vm986_vm3, %v1424_v52, %v5828_v36 }
 0x15e   : > { %v6048_v4 = vpop.xlane.xlu0 %582  ;;  %v1117_v16 = vsel %vm993_vm4, %v1116_v21, %v1112_v35  ;;  %v1429_v21 = vrot.slane %v5947_v23, %v5765_v53  ;;  %v1434_v35 = vrot.slane %v6013_v59, %v5831_v40 }
 0x15f   : > { %v1122_v19 = vsel %vm7869_vm5, %v1121_v60, %v1117_v16 }
 0x160   : > { %v1430_v16 = vsel %vm993_vm4, %v1429_v21, %v1425_v55  ;;  %v675_v21 = vmul.f32 0.015625, %v5855_v18  ;;  %v676_v55 = vmul.f32 0.015625, %v5917_v24 }
 0x161   : > { %v725_v10 = vpop.xlane.xlu1 %724  ;;  %v1435_v59 = vsel %vm7869_vm5, %v1434_v35, %v1430_v16 }
 0x162   : > { %v6050_v3 = vpop.xlane.xlu0 %624  ;;  %v1400_v20 = vrot.slane %v725_v10, %v5964_v47 }
 0x165   : > { %v6052_v31 = vpop.xlane.xlu1 %769 }
 0x166   : > { %v749_v49 = vpop.xlane.xlu0 %748 }
 0x169   : > { %v6054_v13 = vpop.xlane.xlu1 %811 }
 0x16a   : > { %8061 = vst [vmem:[#allocation85_spill] sm:$0xff] %v6054_v13  ;;  %v6056_v17 = vpop.xlane.xlu0 %790  ;;  %v1126_v13 = vrot.slane %v671_v2, %v5964_v47 }
 0x16b   : > { %8062 = vst [vmem:[#allocation86_spill] sm:$0xff] %v6056_v17 }
 0x16c   : > { %v1127_v7 = vsel %vm1007_vm6, %v1126_v13, %v1122_v19 }
 0x16d   : > { %v6060_v9 = vpop.xlane.xlu1 %850 }
 0x16e   : > { %8063 = vst [vmem:[#allocation87_spill] sm:$0xff] %v6060_v9  ;;  %v6062_v5 = vpop.xlane.xlu0 %832 }
 0x171   : > { %v544_v29 = vpop.xlane.xlu1 %543 }
 0x172   : > { %v6068_v17 = vpop.xlane.xlu0 %853  ;;  %v672_v61 = vmul.f32 0.015625, %v544_v29  ;;  %v1385_v29 = vrot.slane %v5884_v11, %v5711_v54  ;;  %v1439_v11 = vrot.slane %v749_v49, %v5964_v47 }
 0x173   : > { %8064 = vst [vmem:[#allocation88_spill] sm:$0xff] %v6068_v17 }
 0x174   : > { %v1131_v28 = vrot.slane %v672_v61, %v5973_v56  ;;  %v1386_v23 = vsel %vm986_vm3, %v1385_v29, %v5809_v37  ;;  %v1440_v36 = vsel %vm1007_vm6, %v1439_v11, %v1435_v59  ;;  %v678_v11 = vmul.f32 0.015625, %v6042_v42 }
 0x175   : > { %v6076_v9 = vpop.xlane.xlu1 %585  ;;  %v1391_v61 = vsel %vm993_vm4, %v1390_v62, %v1386_v23  ;;  %v1145_v23 = vrot.slane %v675_v21, %v5688_v57 }
 0x176   : > { %v565_v26 = vpop.xlane.xlu0 %564  ;;  %v1132_v2 = vsel %vm7870_vm7, %v1131_v28, %v1127_v7  ;;  %v1160_v59 = vrot.slane %v678_v11, %v5831_v40 }
 0x177   : > { %v1294_v17 = vsel %vm1293_vm11, %v1132_v2, %v1292_v46  ;;  %v1395_v46 = vrot.slane %v6015_v27, %v5831_v40  ;;  %v1146_v24 = vsel %vm979_vm2, %v1145_v23, %v5823_v6 }
 0x179   : > { %v6088_v60 = vpop.xlane.xlu1 %627  ;;  %v1396_v27 = vsel %vm7869_vm5, %v1395_v46, %v1391_v61  ;;  %v679_v61 = vmul.f32 0.015625, %v565_v26 }
 0x17a   : > { %v6090_v13 = vpop.xlane.xlu0 %606  ;;  %v1401_v7 = vsel %vm1007_vm6, %v1400_v20, %v1396_v27  ;;  %v677_v20 = vmul.f32 0.015625, %v5987_v43 }
 0x17b   : > { %v1165_v43 = vrot.slane %v679_v61, %v5964_v47 }
 0x17c   : > { %v1155_v18 = vrot.slane %v677_v20, %v5765_v53 }
 0x17d   : > { %v752_v19 = vpop.xlane.xlu1 %751 }
 0x17e   : > { %v728_v28 = vpop.xlane.xlu0 %727  ;;  %v1444_v10 = vrot.slane %v752_v19, %v5973_v56 }
 0x17f   : > { %v1405_v49 = vrot.slane %v728_v28, %v5973_v56  ;;  %v1150_v28 = vrot.slane %v676_v55, %v5711_v54 }
 0x180   : > { %v1445_v37 = vsel %vm7870_vm7, %v1444_v10, %v1440_v36  ;;  %v1463_v36 = vrot.slane %v5945_v14, %v5711_v54 }
 0x181   : > { %v1406_v2 = vsel %vm7870_vm7, %v1405_v49, %v1401_v7  ;;  %v6113_v29 = vpop.xlane.xlu1 %793  ;;  %v1151_v26 = vsel %vm986_vm3, %v1150_v28, %v1146_v24  ;;  %v1458_v49 = vrot.slane %v5896_v63, %v5688_v57  ;;  %v1473_v63 = vrot.slane %v6052_v31, %v5831_v40 }
 0x182   : > { %v1680_v52 = vsel %vm1289_vm8, %v1445_v37, %v1406_v2  ;;  %v773_v62 = vpop.xlane.xlu0 %772  ;;  %v1156_v7 = vsel %vm993_vm4, %v1155_v18, %v1151_v26  ;;  %v1468_v2 = vrot.slane %v6023_v15, %v5765_v53 }
 0x183   : > { %v1161_v37 = vsel %vm7869_vm5, %v1160_v59, %v1156_v7  ;;  %v1459_v14 = vsel %vm979_vm2, %v1458_v49, %v5843_v33  ;;  %v1478_v23 = vrot.slane %v773_v62, %v5964_v47 }
 0x184   : > { %v1166_v21 = vsel %vm1007_vm6, %v1165_v43, %v1161_v37  ;;  %v1464_v15 = vsel %vm986_vm3, %v1463_v36, %v1459_v14  ;;  %v682_v36 = vmul.f32 0.015625, %v5871_v30  ;;  %v681_v37 = vmul.f32 0.015625, %v5873_v45 }
 0x185   : > { %v6116_v35 = vpop.xlane.xlu1 %835  ;;  %v1469_v28 = vsel %vm993_vm4, %v1468_v2, %v1464_v15  ;;  %v691_v30 = vmul.f32 0.015625, %v5995_v22  ;;  %v698_v22 = vmul.f32 0.015625, %v6005_v50 }
 0x186   : > { %v6118_v46 = vpop.xlane.xlu0 %814  ;;  %v1474_v24 = vsel %vm7869_vm5, %v1473_v63, %v1469_v28  ;;  %v689_v63 = vmul.f32 0.015625, %v5927_v12  ;;  %v1175_v14 = vrot.slane %v681_v37, %v5676_v8  ;;  %v1488_v12 = vrot.slane %v5894_v39, %v5676_v8 }
 0x187   : > { %v1479_v43 = vsel %vm1007_vm6, %v1478_v23, %v1474_v24  ;;  %v1492_v23 = vrot.slane %v5902_v38, %v5680_v34  ;;  %v697_v24 = vmul.f32 0.015625, %v6007_v58  ;;  %v692_v37 = vmul.f32 0.015625, %v6046_v25 }
 0x188   : > { %v1214_v38 = vrot.slane %v689_v63, %v5676_v8  ;;  %v699_v63 = vmul.f32 0.015625, %v6050_v3  ;;  %v1502_v25 = vrot.slane %v6021_v1, %v5711_v54  ;;  %v693_v1 = vmul.f32 0.015625, %v6090_v13 }
 0x189   : > { %v6124_v16 = vpop.xlane.xlu1 %874 }
 0x18a   : > { %v6126_v19 = vpop.xlane.xlu0 %856 }
 0x18d   : > { %v568_v27 = vpop.xlane.xlu1 %567 }
 0x18e   : > { %v6134_v42 = vpop.xlane.xlu0 %877  ;;  %v680_v10 = vmul.f32 0.015625, %v568_v27 }
 0x190   : > { %v1170_v6 = vrot.slane %v680_v10, %v5973_v56 }
 0x191   : > { %v6147_v55 = vpop.xlane.xlu1 %609 }
 0x192   : > { %v6149_v20 = vpop.xlane.xlu0 %588  ;;  %v1171_v11 = vsel %vm7870_vm7, %v1170_v6, %v1166_v21  ;;  %v683_v6 = vmul.f32 0.015625, %v5929_v0 }
 0x193   : > { %v6158_v61 = vsel %vm7976_vm12, %v1171_v11, %v1294_v17  ;;  %v1179_v11 = vrot.slane %v682_v36, %v5680_v34 }
 0x194   : > { %v1184_v45 = vrot.slane %v683_v6, %v5688_v57  ;;  %v1527_v6 = vrot.slane %v5954_v32, %v5676_v8 }
 0x195   : > { %v776_v18 = vpop.xlane.xlu1 %775 }
 0x196   : > { %v6162_v59 = vpop.xlane.xlu0 %630  ;;  %v1483_v31 = vrot.slane %v776_v18, %v5973_v56  ;;  %v1497_v18 = vrot.slane %v5956_v44, %v5688_v57 }
 0x198   : > { %v1484_v33 = vsel %vm7870_vm7, %v1483_v31, %v1479_v43  ;;  %v1180_v31 = vsel %vm972_vm1, %v1179_v11, %v1175_v14  ;;  %v1531_v43 = vrot.slane %v5966_v51, %v5680_v34  ;;  %v685_v51 = vmul.f32 0.015625, %v6048_v4 }
 0x199   : > { %v6169_v62 = vsel %vm1291_vm10, %v1484_v33, %v1680_v52  ;;  %v6171_v17 = vpop.xlane.xlu1 %817  ;;  %v690_v52 = vmul.f32 0.015625, %v5937_v48  ;;  %v684_v48 = vmul.f32 0.015625, %v5997_v41  ;;  %v1493_v41 = vsel %vm972_vm1, %v1492_v23, %v1488_v12  ;;  %v8065_v23 = vld [vmem:[#allocation83_spill] sm:$0xff] }
 0x19a   : > { %v6173_v27 = vpop.xlane.xlu0 %796  ;;  %v1223_v33 = vrot.slane %v691_v30, %v5688_v57  ;;  %v1185_v39 = vsel %vm979_vm2, %v1184_v45, %v1180_v31  ;;  %v1257_v11 = vrot.slane %v698_v22, %v5680_v34  ;;  %v1253_v14 = vrot.slane %v697_v24, %v5676_v8  ;;  %v8067_v24 = vld [vmem:[#allocation82_spill] sm:$0xff] }
 0x19b   : > { %v1218_v0 = vrot.slane %v690_v52, %v5680_v34  ;;  %v1189_v44 = vrot.slane %v684_v48, %v5711_v54  ;;  %v1498_v52 = vsel %vm979_vm2, %v1497_v18, %v1493_v41  ;;  %v1536_v30 = vrot.slane %v8065_v23, %v5688_v57 }
 0x19c   : > { %v1532_v45 = vsel %vm972_vm1, %v1531_v43, %v1527_v6  ;;  %v686_v4 = vmul.f32 0.015625, %v6076_v9  ;;  %v1228_v12 = vrot.slane %v692_v37, %v5711_v54  ;;  %v700_v18 = vmul.f32 0.015625, %v6088_v60  ;;  %v8068_v9 = vld [vmem:[#allocation85_spill] sm:$0xff] }
 0x19d   : > { %v6175_v26 = vpop.xlane.xlu1 %859  ;;  %v1219_v36 = vsel %vm972_vm1, %v1218_v0, %v1214_v38  ;;  %v8066_v0 = vld [vmem:[#allocation84_spill] sm:$0xff]  ;;  %v1190_v3 = vsel %vm986_vm3, %v1189_v44, %v1185_v39  ;;  %v1566_v31 = vrot.slane %v8067_v24, %v5676_v8  ;;  %v1194_v41 = vrot.slane %v685_v51, %v5765_v53 }
 0x19e   : > { %v6177_v10 = vpop.xlane.xlu0 %838  ;;  %v1224_v32 = vsel %vm979_vm2, %v1223_v33, %v1219_v36  ;;  %v1570_v48 = vrot.slane %v8066_v0, %v5680_v34  ;;  %v1262_v43 = vrot.slane %v699_v63, %v5688_v57  ;;  %v1541_v33 = vrot.slane %v8068_v9, %v5711_v54  ;;  %v8069_v36 = vld [vmem:[#allocation86_spill] sm:$0xff]  ;;  %v8070_v51 = vld [vmem:[#allocation88_spill] sm:$0xff] }
 0x19f   : > { %v1258_v39 = vsel %vm972_vm1, %v1257_v11, %v1253_v14  ;;  %v1503_v60 = vsel %vm986_vm3, %v1502_v25, %v1498_v52  ;;  %v1537_v13 = vsel %vm979_vm2, %v1536_v30, %v1532_v45  ;;  %v1507_v44 = vrot.slane %v8069_v36, %v5765_v53 }
 0x1a0   : > { %v1571_v37 = vsel %vm972_vm1, %v1570_v48, %v1566_v31  ;;  %v1575_v6 = vrot.slane %v6062_v5, %v5688_v57  ;;  %v1609_v63 = vrot.slane %v8070_v51, %v5680_v34  ;;  %v1199_v23 = vrot.slane %v686_v4, %v5831_v40  ;;  %v8071_v4 = vld [vmem:[#allocation87_spill] sm:$0xff] }
 0x1a1   : > { %v6179_v49 = vpop.xlane.xlu1 %591  ;;  %v1229_v0 = vsel %vm986_vm3, %v1228_v12, %v1224_v32  ;;  %v1267_v11 = vrot.slane %v700_v18, %v5711_v54  ;;  %v1233_v52 = vrot.slane %v693_v1, %v5765_v53  ;;  %v1512_v14 = vrot.slane %v6113_v29, %v5831_v40 }
 0x1a2   : > { %v6181_v7 = vpop.xlane.xlu0 %880  ;;  %v1195_v45 = vsel %vm993_vm4, %v1194_v41, %v1190_v3  ;;  %v1263_v5 = vsel %vm979_vm2, %v1262_v43, %v1258_v39  ;;  %v1542_v48 = vsel %vm986_vm3, %v1541_v33, %v1537_v13  ;;  %v1605_v24 = vrot.slane %v8071_v4, %v5676_v8 }
 0x1a3   : > { %v1508_v32 = vsel %vm993_vm4, %v1507_v44, %v1503_v60  ;;  %v1580_v12 = vrot.slane %v6116_v35, %v5711_v54  ;;  %v694_v18 = vmul.f32 0.015625, %v6147_v55  ;;  %v687_v29 = vmul.f32 0.015625, %v6149_v20 }
 0x1a4   : > { %v1576_v1 = vsel %vm979_vm2, %v1575_v6, %v1571_v37  ;;  %v1610_v3 = vsel %vm972_vm1, %v1609_v63, %v1605_v24  ;;  %v1200_v31 = vsel %vm7869_vm5, %v1199_v23, %v1195_v45  ;;  %v701_v41 = vmul.f32 0.015625, %v6162_v59 }
 0x1a5   : > { %v6187_v2 = vpop.xlane.xlu1 %633  ;;  %v1268_v43 = vsel %vm986_vm3, %v1267_v11, %v1263_v5  ;;  %v1234_v9 = vsel %vm993_vm4, %v1233_v52, %v1229_v0  ;;  %v1513_v33 = vsel %vm7869_vm5, %v1512_v14, %v1508_v32  ;;  %v1546_v35 = vrot.slane %v6118_v46, %v5765_v53 }
 0x1a6   : > { %v6189_v21 = vpop.xlane.xlu0 %612  ;;  %v1614_v39 = vrot.slane %v6126_v19, %v5688_v57  ;;  %v688_v60 = vmul.f32 0.015625, %v6179_v49  ;;  %v702_v59 = vmul.f32 0.015625, %v6187_v2  ;;  %v1581_v36 = vsel %vm986_vm3, %v1580_v12, %v1576_v1 }
 0x1a7   : > { %v695_v13 = vmul.f32 0.015625, %v6189_v21  ;;  %v1648_v44 = vrot.slane %v6134_v42, %v5680_v34  ;;  %v1238_v46 = vrot.slane %v694_v18, %v5831_v40  ;;  %v1204_v37 = vrot.slane %v687_v29, %v5964_v47 }
 0x1a8   : > { %v1272_v6 = vrot.slane %v701_v41, %v5765_v53  ;;  %v1551_v19 = vrot.slane %v6171_v17, %v5831_v40  ;;  %v1517_v49 = vrot.slane %v6173_v27, %v5964_v47  ;;  %v1619_v2 = vrot.slane %v6175_v26, %v5711_v54 }
 0x1a9   : > { %v6200_v15 = vpop.xlane.xlu1 %820  ;;  %v1547_v21 = vsel %vm993_vm4, %v1546_v35, %v1542_v48  ;;  %v1644_v42 = vrot.slane %v6124_v16, %v5676_v8  ;;  %v1585_v51 = vrot.slane %v6177_v10, %v5765_v53  ;;  %v1653_v63 = vrot.slane %v6181_v7, %v5688_v57  ;;  %v8092_v57 = vld [vmem:[#allocation16_spill] sm:$0xff]  ;;  %v8096_v8 = vld [vmem:[#allocation25_spill] sm:$0xff] }
 0x1aa   : > { %v6202_v28 = vpop.xlane.xlu0 %799  ;;  %v1615_v17 = vsel %vm979_vm2, %v1614_v39, %v1610_v3  ;;  %v1209_v27 = vrot.slane %v688_v60, %v5973_v56  ;;  %v1277_v11 = vrot.slane %v702_v59, %v5831_v40  ;;  %v1243_v26 = vrot.slane %v695_v13, %v5964_v47 }
 0x1ab   : > { %v1649_v52 = vsel %vm972_vm1, %v1648_v44, %v1644_v42  ;;  %v1239_v16 = vsel %vm7869_vm5, %v1238_v46, %v1234_v9  ;;  %v1205_v14 = vsel %vm1007_vm6, %v1204_v37, %v1200_v31  ;;  %v1522_v10 = vrot.slane %v6202_v28, %v5973_v56 }
 0x1ac   : > { %v1273_v7 = vsel %vm993_vm4, %v1272_v6, %v1268_v43  ;;  %v1552_v45 = vsel %vm7869_vm5, %v1551_v19, %v1547_v21  ;;  %v1518_v5 = vsel %vm1007_vm6, %v1517_v49, %v1513_v33  ;;  %v1620_v48 = vsel %vm986_vm3, %v1619_v2, %v1615_v17 }
 0x1ad   : > { %v6220_v50 = vpop.xlane.xlu1 %862  ;;  %v1586_v4 = vsel %vm993_vm4, %v1585_v51, %v1581_v36  ;;  %v1654_v24 = vsel %vm979_vm2, %v1653_v63, %v1649_v52  ;;  %v1210_v28 = vsel %vm7870_vm7, %v1209_v27, %v1205_v14  ;;  %v1278_v1 = vsel %vm7869_vm5, %v1277_v11, %v1273_v7 }
 0x1ae   : > { %v6222_v58 = vpop.xlane.xlu0 %841  ;;  %v1244_v3 = vsel %vm1007_vm6, %v1243_v26, %v1239_v16  ;;  %v1556_v31 = vrot.slane %v6200_v15, %v5964_v47  ;;  %v1523_v41 = vsel %vm7870_vm7, %v1522_v10, %v1518_v5  ;;  %v1624_v43 = vrot.slane %v6220_v50, %v5765_v53 }
 0x1af   : > { %v1298_v14 = vsel %vm7975_vm13, %v1210_v28, %v6158_v61  ;;  %v1768_v61 = vld [vmem:[%s7789_s2] sm:$0x3] }
 0x1b1   : > { %v6244_v38 = vpop.xlane.xlu1 %615 }
 0x1b2   : > { %v6246_v22 = vpop.xlane.xlu0 %883  ;;  %v696_v32 = vmul.f32 0.015625, %v6244_v38  ;;  %v1590_v38 = vrot.slane %v6222_v58, %v5831_v40 }
 0x1b3   : > { %v1658_v9 = vrot.slane %v6246_v22, %v5711_v54  ;;  %v1557_v22 = vsel %vm1007_vm6, %v1556_v31, %v1552_v45 }
 0x1b4   : > { %v1248_v39 = vrot.slane %v696_v32, %v5973_v56  ;;  %v1591_v44 = vsel %vm7869_vm5, %v1590_v38, %v1586_v4 }
 0x1b5   : > { %v6270_v25 = vpop.xlane.xlu1 %823  ;;  %v1659_v6 = vsel %vm986_vm3, %v1658_v9, %v1654_v24 }
 0x1b6   : > { %v637_v30 = vpop.xlane.xlu0 %636  ;;  %v1561_v33 = vrot.slane %v6270_v25, %v5973_v56  ;;  %v1682_v25 = vsel %vm1293_vm11, %v1523_v41, %v6169_v62  ;;  %v1249_v2 = vsel %vm7870_vm7, %v1248_v39, %v1244_v3 }
 0x1b7   : > { %v703_v12 = vmul.f32 0.015625, %v637_v30  ;;  %v1300_v45 = vsel %vm7974_vm14, %v1249_v2, %v1298_v14 }
 0x1b8   : > { %v1562_v19 = vsel %vm7870_vm7, %v1561_v33, %v1557_v22 }
 0x1b9   : > { %v6291_v55 = vpop.xlane.xlu1 %865  ;;  %v1282_v50 = vrot.slane %v703_v12, %v5964_v47  ;;  %v1683_v26 = vsel %vm7976_vm12, %v1562_v19, %v1682_v25 }
 0x1ba   : > { %v6293_v20 = vpop.xlane.xlu0 %844  ;;  %v1629_v35 = vrot.slane %v6291_v55, %v5831_v40 }
 0x1bb   : > { %v1595_v15 = vrot.slane %v6293_v20, %v5964_v47  ;;  %v1625_v20 = vsel %vm993_vm4, %v1624_v43, %v1620_v48  ;;  %v1283_v21 = vsel %vm1007_vm6, %v1282_v50, %v1278_v1 }
 0x1bc   : > { %v1630_v49 = vsel %vm7869_vm5, %v1629_v35, %v1625_v20 }
 0x1bd   : > { %v640_v23 = vpop.xlane.xlu1 %639  ;;  %v1596_v62 = vsel %vm1007_vm6, %v1595_v15, %v1591_v44 }
 0x1be   : > { %v887_v0 = vpop.xlane.xlu0 %886  ;;  %v704_v30 = vmul.f32 0.015625, %v640_v23 }
 0x1bf   : > { %v1663_v55 = vrot.slane %v887_v0, %v5765_v53 }
 0x1c0   : > { %v1287_v46 = vrot.slane %v704_v30, %v5973_v56 }
 0x1c1   : > { %v869_v18 = vpop.xlane.xlu1 %868  ;;  %v1664_v0 = vsel %vm993_vm4, %v1663_v55, %v1659_v6 }
 0x1c2   : > { %v848_v29 = vpop.xlane.xlu0 %847  ;;  %v1634_v60 = vrot.slane %v869_v18, %v5964_v47  ;;  %v1288_v52 = vsel %vm7870_vm7, %v1287_v46, %v1283_v21  ;;  %v8072_v18 = vmov 0.0  }
 0x1c3   : > { %v1600_v58 = vrot.slane %v848_v29, %v5973_v56  ;;  %v1302_v4 = vsel %vm7973_vm15, %v1288_v52, %v1300_v45  ;;  %v5060_v45 = vld [vmem:[%s7790_s3] sm:$0xff]  }
 0x1c4   : > { %v1635_v42 = vsel %vm1007_vm6, %v1634_v60, %v1630_v49  ;;  %v8073_v60 = vld [vmem:[#allocation57_spill] sm:$0xff] }
 0x1c5   : > { %v872_v59 = vpop.xlane.xlu1 %871  ;;  %v1601_v51 = vsel %vm7870_vm7, %v1600_v58, %v1596_v62  ;;  %v6398_v58 = vsub.s32 0, %v8073_v60  ;;  %v7873_v22 = vsub.s32 1, %v8073_v60  ;;  %v7872_v25 = vsub.s32 2, %v8073_v60 }
 0x1c6   : > { %v890_v13 = vpop.xlane.xlu0 %889  ;;  %v1639_v36 = vrot.slane %v872_v59, %v5973_v56  ;;  %v1684_v10 = vsel %vm7975_vm13, %v1601_v51, %v1683_v26  ;;  %v7871_v20 = vsub.s32 3, %v8073_v60  ;;  %v1967_v46 = vsub.s32 4, %v8073_v60 }
 0x1c7   : > { %v1668_v37 = vrot.slane %v890_v13, %v5831_v40  ;;  %8074 = vst [vmem:[#allocation83_spill] sm:$0xff] %v6398_v58  ;;  %v2002_v6 = vsub.s32 5, %v8073_v60  ;;  %v2037_v49 = vsub.s32 6, %v8073_v60  ;;  %v2072_v2 = vsub.s32 7, %v8073_v60 }
 0x1c8   : > { %v1640_v17 = vsel %vm7870_vm7, %v1639_v36, %v1635_v42 }
 0x1c9   : > { %v896_v23 = vpop.xlane.xlu1 %895  ;;  %v1669_v16 = vsel %vm7869_vm5, %v1668_v37, %v1664_v0  ;;  %v1685_v5 = vsel %vm7974_vm14, %v1640_v17, %v1684_v10  ;;  %vm1773_vm5 = vcmask 1041408  }
 0x1ca   : > { %v893_v63 = vpop.xlane.xlu0 %892  ;;  %v1678_v11 = vrot.slane %v896_v23, %v5973_v56  ;;  %v1775_v12 = vsel %vm1773_vm5, %v1768_v61, 0  ;;  %v5062_v61 = vld [vmem:[%s7790_s3 + $0x10] sm:$0xff]   ;;  %vm4249_vm5 = vcmask 654912  }
 0x1cb   : > { %v1673_v27 = vrot.slane %v893_v63, %v5964_v47  ;;  %4974 = vmatpush3.bf16.msra.mxu1 %v1775_v12  ;;  %v8084_v47 = vld [vmem:[#allocation20_spill] sm:$0xff] }
 0x1cc   : > { %4979 = vmatprep.subr.bf16.mxu1 %v8072_v18 }
 0x1cd   : > { %v1674_v7 = vsel %vm1007_vm6, %v1673_v27, %v1669_v16 }
 0x1ce   : > { %v1679_v48 = vsel %vm7870_vm7, %v1678_v11, %v1674_v7  ;;  %vm1769_vm7 = vcmask 31744  }
 0x1cf   : > { %v1686_v24 = vsel %vm7973_vm15, %v1679_v48, %v1685_v5 }
 0x1d0   : > { %v1688_v32 = vpack.c.bf16 %v1686_v24, %v1302_v4  ;;  %v5061_v4 = vld [vmem:[%s7790_s3 + $0x8] sm:$0xff]  }
 0x1d2   : > { %4970 = vmatmul.mubr.msk.bf16.vlgmr.msra.gmra.mrb[0].mxu0 %vm7972_vm0, %v1688_v32 }
 0x2a5   : > { %v1758_v29 = vpop.f32.mrb[0].mxu0 }
 0x2a6   : > { %v4971_v28 = vpop.f32.mrb[1].mxu0  ;;  %v1765_v3 = vmax.f32 %v1758_v29, 0.0 }
 0x2a7   : > { %v1761_v1 = vpop.f32.mrb[2].mxu0  ;;  %v5063_v28 = vld [vmem:[%s7790_s3 + $0x18] sm:$0xff]  }
 0x2a8   : > { %v1766_v31 = vmax.f32 %v1761_v1, 0.0  ;;  %v4972_v41 = vpop.f32.mrb[3].mxu0 }
 0x2aa   : > { %v1767_v43 = vpack.c.bf16 %v1766_v31, %v1765_v3  ;;  %v5064_v31 = vld [vmem:[%s7790_s3 + $0x20] sm:$0xff]  }
 0x2ac   : > { %4976 = vmatmul.mubr.msk.bf16.vlgmr.msra.gmra.mrb[0].mxu1 %vm1769_vm7, %v1767_v43  ;;  %vm4256_vm7 = vcmask 720512  }
 0x2ad   : > { %4995 = vmatprep.mubr.msk.bf16.mxu1 %vm5248_vm9, %v8072_v18  ;;  %4980 = vmatpush3.bf16.msra.mxu1 %v5060_v45  ;;  %v8076_v45 = vld [vmem:[#allocation9_spill] sm:$0xff]  ;;  %vm4263_vm9 = vcmask 786112  }
 0x2ae   : > { %4981 = vmatprep.subr.bf16.mxu1 %v8072_v18 }
 0x2b1   : > { %4982 = vmatpush3.bf16.msra.mxu1 %v5061_v4 }
 0x2b2   : > { %4983 = vmatprep.subr.bf16.mxu1 %v8072_v18 }
 0x2b5   : > { %4984 = vmatpush3.bf16.msra.mxu1 %v5062_v61  ;;  %v8077_v61 = vld [vmem:[#allocation10_spill] sm:$0xff] }
 0x2b6   : > { %4985 = vmatprep.subr.bf16.mxu1 %v8072_v18 }
 0x2b9   : > { %4986 = vmatpush3.bf16.msra.mxu1 %v5063_v28 }
 0x2ba   : > { %4987 = vmatprep.subr.bf16.mxu1 %v8072_v18 }
 0x2bd   : > { %4988 = vmatpush3.bf16.msra.mxu1 %v5064_v31  ;;  %v8078_v31 = vld [vmem:[#allocation8_spill] sm:$0xff] }
 0x2be   : > { %4989 = vmatprep.subr.bf16.mxu1 %v8072_v18 }
 0x37f   : > { %v1811_v38 = vpop.f32.mrb[0].mxu1 }
 0x380   : > { %v4977_v30 = vpop.f32.mrb[1].mxu1 }
 0x381   : > { %v1814_v9 = vpop.f32.mrb[2].mxu1 }
 0x382   : > { %v1818_v33 = vadd.f32 %v1814_v9, %v1811_v38  ;;  %v4978_v35 = vpop.f32.mrb[3].mxu1  ;;  %v5065_v38 = vld [vmem:[%s7790_s3 + $0x28] sm:$0xff]  }
 0x383   : > { %4990 = vmatpush3.bf16.msra.mxu1 %v5065_v38 }
 0x384   : > { %v4676_v15 = vmul.f32 -1.442695, %v1818_v33  ;;  %v5066_v33 = vld [vmem:[%s7790_s3 + $0x30] sm:$0xff]   ;;  %4991 = vmatprep.subr.bf16.mxu1 %v8072_v18 }
 0x386   : > { %5124 = vpow2.f32 %v4676_v15 }
 0x387   : > { %4992 = vmatpush3.bf16.msra.mxu1 %v5066_v33  ;;  %v8079_v33 = vld [vmem:[#allocation14_spill] sm:$0xff] }
 0x388   : > { %4993 = vmatprep.subr.bf16.mxu1 %v8072_v18 }
 0x390   : > { %v5125_v39 = vpop.eup %5124 }
 0x391   : > { %v1822_v50 = vadd.f32 1.0, %v5125_v39 }
 0x393   : > { %5126 = vrcp.f32 %v1822_v50 }
 0x39d   : > { %v5127_v59 = vpop.eup %5126 }
 0x39e   : > { %v1828_v13 = vrot.slane %v5127_v59, %v6398_v58  ;;  %v1863_v55 = vrot.slane %v5127_v59, %v7873_v22  ;;  %v1898_v36 = vrot.slane %v5127_v59, %v7872_v25  ;;  %v1933_v44 = vrot.slane %v5127_v59, %v7871_v20 }
 0x39f   : > { %v1968_v37 = vrot.slane %v5127_v59, %v1967_v46  ;;  %v2003_v19 = vrot.slane %v5127_v59, %v2002_v6  ;;  %v2038_v62 = vrot.slane %v5127_v59, %v2037_v49  ;;  %v2073_v21 = vrot.slane %v5127_v59, %v2072_v2  ;;  %v8075_v2 = vld [vmem:[#allocation11_spill] sm:$0xff] }
 0x3a0   : > { %1834 = vbcast.lane.b32.xlu1 %v1828_v13, 264  ;;  %1830 = vbcast.lane.b32.xlu0 %v1828_v13, 256 }
 0x3a4   : > { %1865 = vbcast.lane.b32.xlu1 %v1863_v55, 256  ;;  %1900 = vbcast.lane.b32.xlu0 %v1898_v36, 256 }
 0x3a8   : > { %1869 = vbcast.lane.b32.xlu1 %v1863_v55, 264  ;;  %1838 = vbcast.lane.b32.xlu0 %v1828_v13, 272 }
 0x3ac   : > { %1904 = vbcast.lane.b32.xlu1 %v1898_v36, 264  ;;  %1935 = vbcast.lane.b32.xlu0 %v1933_v44, 256 }
 0x3b0   : > { %1873 = vbcast.lane.b32.xlu1 %v1863_v55, 272  ;;  %1908 = vbcast.lane.b32.xlu0 %v1898_v36, 272 }
 0x3b4   : > { %1939 = vbcast.lane.b32.xlu1 %v1933_v44, 264  ;;  %1974 = vbcast.lane.b32.xlu0 %v1968_v37, 264 }
 0x3b8   : > { %1970 = vbcast.lane.b32.xlu1 %v1968_v37, 256  ;;  %1877 = vbcast.lane.b32.xlu0 %v1863_v55, 280 }
 0x3bc   : > { %1842 = vbcast.lane.b32.xlu1 %v1828_v13, 280  ;;  %2005 = vbcast.lane.b32.xlu0 %v2003_v19, 256 }
 0x3c0   : > { %1943 = vbcast.lane.b32.xlu1 %v1933_v44, 272  ;;  %1912 = vbcast.lane.b32.xlu0 %v1898_v36, 280 }
 0x3c4   : > { %2009 = vbcast.lane.b32.xlu1 %v2003_v19, 264  ;;  %2040 = vbcast.lane.b32.xlu0 %v2038_v62, 256 }
 0x3c8   : > { %1978 = vbcast.lane.b32.xlu1 %v1968_v37, 272  ;;  %1846 = vbcast.lane.b32.xlu0 %v1828_v13, 288 }
 0x3cc   : > { %2044 = vbcast.lane.b32.xlu1 %v2038_v62, 264  ;;  %1947 = vbcast.lane.b32.xlu0 %v1933_v44, 280 }
 0x3d0   : > { %1881 = vbcast.lane.b32.xlu1 %v1863_v55, 288  ;;  %2075 = vbcast.lane.b32.xlu0 %v2073_v21, 256 }
 0x3d4   : > { %2013 = vbcast.lane.b32.xlu1 %v2003_v19, 272  ;;  %1916 = vbcast.lane.b32.xlu0 %v1898_v36, 288 }
 0x3d8   : > { %2079 = vbcast.lane.b32.xlu1 %v2073_v21, 264  ;;  %2048 = vbcast.lane.b32.xlu0 %v2038_v62, 272 }
 0x3dc   : > { %1982 = vbcast.lane.b32.xlu1 %v1968_v37, 280  ;;  %1885 = vbcast.lane.b32.xlu0 %v1863_v55, 296 }
 0x3e0   : > { %1850 = vbcast.lane.b32.xlu1 %v1828_v13, 296  ;;  %2017 = vbcast.lane.b32.xlu0 %v2003_v19, 280 }
 0x3e4   : > { %1951 = vbcast.lane.b32.xlu1 %v1933_v44, 288  ;;  %1920 = vbcast.lane.b32.xlu0 %v1898_v36, 296 }
 0x3e8   : > { %2083 = vbcast.lane.b32.xlu1 %v2073_v21, 272  ;;  %2052 = vbcast.lane.b32.xlu0 %v2038_v62, 280 }
 0x3ec   : > { %1986 = vbcast.lane.b32.xlu1 %v1968_v37, 288  ;;  %1889 = vbcast.lane.b32.xlu0 %v1863_v55, 304 }
 0x3f0   : > { %1854 = vbcast.lane.b32.xlu1 %v1828_v13, 304  ;;  %2021 = vbcast.lane.b32.xlu0 %v2003_v19, 288 }
 0x3f4   : > { %1955 = vbcast.lane.b32.xlu1 %v1933_v44, 296  ;;  %1924 = vbcast.lane.b32.xlu0 %v1898_v36, 304 }
 0x3f8   : > { %2087 = vbcast.lane.b32.xlu1 %v2073_v21, 280  ;;  %2056 = vbcast.lane.b32.xlu0 %v2038_v62, 288 }
 0x3fc   : > { %1990 = vbcast.lane.b32.xlu1 %v1968_v37, 296  ;;  %1893 = vbcast.lane.b32.xlu0 %v1863_v55, 312 }
 0x400   : > { %1858 = vbcast.lane.b32.xlu1 %v1828_v13, 312  ;;  %2025 = vbcast.lane.b32.xlu0 %v2003_v19, 296 }
 0x404   : > { %1959 = vbcast.lane.b32.xlu1 %v1933_v44, 304  ;;  %1928 = vbcast.lane.b32.xlu0 %v1898_v36, 312 }
 0x408   : > { %2091 = vbcast.lane.b32.xlu1 %v2073_v21, 288  ;;  %2060 = vbcast.lane.b32.xlu0 %v2038_v62, 296 }
 0x40c   : > { %1994 = vbcast.lane.b32.xlu1 %v1968_v37, 304  ;;  %2029 = vbcast.lane.b32.xlu0 %v2003_v19, 304 }
 0x410   : > { %1963 = vbcast.lane.b32.xlu1 %v1933_v44, 312  ;;  %1998 = vbcast.lane.b32.xlu0 %v1968_v37, 312 }
 0x412   : > { %v6414_v42 = vpop.permute.xlu1 %1834  ;;  %v6416_v51 = vpop.permute.xlu0 %1830 }
 0x413   : > { %v6530_v4 = vmul.f32 %v8076_v45, %v6416_v51 }
 0x414   : > { %2095 = vbcast.lane.b32.xlu1 %v2073_v21, 296  ;;  %2033 = vbcast.lane.b32.xlu0 %v2003_v19, 312 }
 0x415   : > { %v2345_v51 = vsel %vm7972_vm0, %v6530_v4, -inf }
 0x416   : > { %v6418_v63 = vpop.permute.xlu1 %1865  ;;  %v6420_v23 = vpop.permute.xlu0 %1900 }
 0x417   : > { %v6538_v38 = vmul.f32 %v8078_v31, %v6418_v63  ;;  %v8081_v63 = vld [vmem:[#allocation13_spill] sm:$0xff] }
 0x418   : > { %2064 = vbcast.lane.b32.xlu1 %v2038_v62, 304  ;;  %2068 = vbcast.lane.b32.xlu0 %v2038_v62, 312 }
 0x41a   : > { %v6422_v0 = vpop.permute.xlu1 %1869  ;;  %v6424_v17 = vpop.permute.xlu0 %1838 }
 0x41b   : > { %v6534_v28 = vmul.f32 %v8077_v61, %v6422_v0  ;;  %v8080_v0 = vld [vmem:[#allocation15_spill] sm:$0xff]  ;;  %v6557_v45 = vmul.f32 %v8081_v63, %v6424_v17  ;;  %v8082_v61 = vld [vmem:[#allocation12_spill] sm:$0xff]  ;;  %v2366_v17 = vsel %vm7972_vm0, %v6538_v38, -inf  ;;  %v8086_v63 = vld [vmem:[#allocation18_spill] sm:$0xff] }
 0x41c   : > { %2099 = vbcast.lane.b32.xlu1 %v2073_v21, 304 }
 0x41e   : > { %v1905_v27 = vpop.permute.xlu1 %1904  ;;  %v6426_v11 = vpop.permute.xlu0 %1935 }
 0x41f   : > { %v6541_v20 = vmul.f32 %v8079_v33, %v1905_v27  ;;  %v2367_v27 = vsel %vm7972_vm0, %v6534_v28, -inf  ;;  %v8083_v33 = vld [vmem:[#allocation19_spill] sm:$0xff]  ;;  %v6579_v53 = vmul.f32 %v8086_v63, %v6426_v11  ;;  %v8090_v63 = vld [vmem:[#allocation24_spill] sm:$0xff] }
 0x420   : > { %2103 = vbcast.lane.b32.xlu1 %v2073_v21, 312  ;;  %v6526_v21 = vmul.f32 %v8075_v2, %v6414_v42  ;;  %v6553_v2 = vmul.f32 %v8080_v0, %v6420_v23 }
 0x421   : > { %v2388_v0 = vsel %vm7972_vm0, %v6541_v20, -inf  ;;  %8087 = vst [vmem:[#allocation82_spill] sm:$0xff] %v6579_v53 }
 0x422   : > { %v6428_v26 = vpop.permute.xlu1 %1873  ;;  %v6430_v52 = vpop.permute.xlu0 %1908  ;;  %v2346_v42 = vsel %vm7972_vm0, %v6526_v21, -inf }
 0x423   : > { %v6563_v31 = vmul.f32 %v8082_v61, %v6428_v26  ;;  %v6567_v56 = vmul.f32 %v8083_v33, %v6430_v52  ;;  %v2347_v23 = vmax.f32 %v2345_v51, %v2346_v42  ;;  %v2387_v52 = vsel %vm7972_vm0, %v6553_v2, -inf  ;;  %v8088_v42 = vld [vmem:[#allocation26_spill] sm:$0xff] }
 0x425   : > { %v2369_v33 = vsel %vm7972_vm0, %v6563_v31, -inf  ;;  %v2390_v11 = vsel %vm7972_vm0, %v6567_v56, -inf }
 0x426   : > { %v6432_v16 = vpop.permute.xlu1 %1939  ;;  %v6434_v14 = vpop.permute.xlu0 %1974 }
 0x427   : > { %v6571_v40 = vmul.f32 %v8084_v47, %v6432_v16  ;;  %v2368_v47 = vmax.f32 %v2366_v17, %v2367_v27  ;;  %v2348_v16 = vsel %vm7972_vm0, %v6557_v45, -inf  ;;  %v6591_v51 = vmul.f32 %v8088_v42, %v6434_v14  ;;  %v8094_v14 = vld [vmem:[#allocation17_spill] sm:$0xff] }
 0x428   : > { %v2389_v17 = vmax.f32 %v2387_v52, %v2388_v0  ;;  %v2349_v60 = vmax.f32 %v2347_v23, %v2348_v16 }
 0x429   : > { %8085 = vst [vmem:[#allocation84_spill] sm:$0xff] %v6571_v40  ;;  %8089 = vst [vmem:[#allocation85_spill] sm:$0xff] %v6591_v51  ;;  %v2409_v34 = vsel %vm7972_vm0, %v6571_v40, -inf }
 0x42a   : > { %v6436_v10 = vpop.permute.xlu1 %1970  ;;  %v6438_v7 = vpop.permute.xlu0 %1877  ;;  %v2391_v40 = vmax.f32 %v2389_v17, %v2390_v11 }
 0x42b   : > { %v6599_v54 = vmul.f32 %v8090_v63, %v6436_v10  ;;  %v6603_v27 = vmul.f32 %v8092_v57, %v6438_v7  ;;  %v2408_v10 = vsel %vm7972_vm0, %v6579_v53, -inf  ;;  %v8098_v63 = vld [vmem:[#allocation22_spill] sm:$0xff]  ;;  %v8100_v7 = vld [vmem:[#allocation32_spill] sm:$0xff] }
 0x42c   : > { %v2410_v16 = vmax.f32 %v2408_v10, %v2409_v34  ;;  %v8108_v34 = vld [vmem:[#allocation21_spill] sm:$0xff] }
 0x42d   : > { %8091 = vst [vmem:[#allocation86_spill] sm:$0xff] %v6599_v54  ;;  %8093 = vst [vmem:[#allocation88_spill] sm:$0xff] %v6603_v27 }
 0x42e   : > { %v6443_v5 = vpop.permute.xlu1 %1842  ;;  %v6445_v48 = vpop.permute.xlu0 %2005 }
 0x42f   : > { %v6609_v42 = vmul.f32 %v8094_v14, %v6443_v5  ;;  %v2370_v14 = vmax.f32 %v2368_v47, %v2369_v33 }
 0x431   : > { %8095 = vst [vmem:[#allocation87_spill] sm:$0xff] %v6609_v42  ;;  %v2350_v47 = vsel %vm7972_vm0, %v6609_v42, -inf }
 0x432   : > { %v6451_v24 = vpop.permute.xlu1 %1943  ;;  %v6453_v32 = vpop.permute.xlu0 %1912 }
 0x433   : > { %v6613_v58 = vmul.f32 %v8096_v8, %v6451_v24  ;;  %v6619_v57 = vmul.f32 %v8098_v63, %v6453_v32  ;;  %v2430_v8 = vsel %vm7972_vm0, %v6591_v51, -inf  ;;  %v8102_v24 = vld [vmem:[#allocation30_spill] sm:$0xff]  ;;  %v2429_v32 = vsel %vm7972_vm0, %v6599_v54, -inf  ;;  %v8104_v63 = vld [vmem:[#allocation33_spill] sm:$0xff]  ;;  %v8113_v51 = vld [vmem:[#allocation23_spill] sm:$0xff] }
 0x435   : > { %8097 = vst [vmem:[#allocation11_spill] sm:$0xff] %v6613_v58  ;;  %8099 = vst [vmem:[#allocation9_spill] sm:$0xff] %v6619_v57  ;;  %v2411_v33 = vsel %vm7972_vm0, %v6613_v58, -inf  ;;  %v2392_v10 = vsel %vm7972_vm0, %v6619_v57, -inf  ;;  %v8111_v58 = vld [vmem:[#allocation31_spill] sm:$0xff] }
 0x436   : > { %v6459_v12 = vpop.permute.xlu1 %2009  ;;  %v6461_v29 = vpop.permute.xlu0 %2040  ;;  %v2393_v53 = vmax.f32 %v2391_v40, %v2392_v10 }
 0x437   : > { %v6623_v0 = vmul.f32 %v8100_v7, %v6459_v12  ;;  %v2371_v12 = vsel %vm7972_vm0, %v6603_v27, -inf  ;;  %v6641_v7 = vmul.f32 %v8104_v63, %v6445_v48  ;;  %v2351_v27 = vmax.f32 %v2349_v60, %v2350_v47  ;;  %v8119_v47 = vld [vmem:[#allocation37_spill] sm:$0xff] }
 0x439   : > { %8101 = vst [vmem:[#allocation10_spill] sm:$0xff] %v6623_v0  ;;  %8105 = vst [vmem:[#allocation14_spill] sm:$0xff] %v6641_v7  ;;  %v2451_v48 = vsel %vm7972_vm0, %v6623_v0, -inf }
 0x43a   : > { %v6467_v1 = vpop.permute.xlu1 %1978  ;;  %v6469_v3 = vpop.permute.xlu0 %1846 }
 0x43b   : > { %v6633_v23 = vmul.f32 %v8102_v24, %v6467_v1  ;;  %v8106_v1 = vld [vmem:[#allocation39_spill] sm:$0xff]  ;;  %v6653_v17 = vmul.f32 %v8108_v34, %v6469_v3  ;;  %v8109_v24 = vld [vmem:[#allocation41_spill] sm:$0xff]  ;;  %v2431_v3 = vmax.f32 %v2429_v32, %v2430_v8  ;;  %v2372_v34 = vmax.f32 %v2370_v14, %v2371_v12 }
 0x43c   : > { %v6649_v11 = vmul.f32 %v8106_v1, %v6461_v29 }
 0x43d   : > { %8103 = vst [vmem:[#allocation8_spill] sm:$0xff] %v6633_v23  ;;  %v2432_v57 = vsel %vm7972_vm0, %v6633_v23, -inf  ;;  %v2352_v8 = vsel %vm7972_vm0, %v6653_v17, -inf }
 0x43e   : > { %v6475_v41 = vpop.permute.xlu1 %2044  ;;  %v6477_v43 = vpop.permute.xlu0 %1947  ;;  %8107 = vst [vmem:[#allocation15_spill] sm:$0xff] %v6649_v11  ;;  %v6685_v14 = vsel %vm7972_vm0, %v6649_v11, -inf }
 0x43f   : > { %v6661_v63 = vmul.f32 %v8109_v24, %v6475_v41  ;;  %v6665_v42 = vmul.f32 %v8111_v58, %v6477_v43  ;;  %v2450_v41 = vsel %vm7972_vm0, %v6641_v7, -inf  ;;  %v2412_v24 = vmax.f32 %v2410_v16, %v2411_v33  ;;  %v8115_v58 = vld [vmem:[#allocation40_spill] sm:$0xff] }
 0x440   : > { %v2452_v54 = vmax.f32 %v2450_v41, %v2451_v48  ;;  %v8123_v48 = vld [vmem:[#allocation27_spill] sm:$0xff]  ;;  %v2353_v41 = vmax.f32 %v2351_v27, %v2352_v8 }
 0x441   : > { %8110 = vst [vmem:[#allocation13_spill] sm:$0xff] %v6661_v63  ;;  %8112 = vst [vmem:[#allocation12_spill] sm:$0xff] %v6665_v42  ;;  %v6691_v60 = vsel %vm7972_vm0, %v6661_v63, -inf  ;;  %v8131_v27 = vld [vmem:[#allocation47_spill] sm:$0xff] }
 0x442   : > { %v6483_v30 = vpop.permute.xlu1 %1881  ;;  %v6485_v9 = vpop.permute.xlu0 %2075 }
 0x443   : > { %v6675_v0 = vmul.f32 %v8113_v51, %v6483_v30  ;;  %v2433_v30 = vmax.f32 %v2431_v3, %v2432_v57  ;;  %v2413_v51 = vsel %vm7972_vm0, %v6665_v42, -inf  ;;  %v8121_v57 = vld [vmem:[#allocation29_spill] sm:$0xff] }
 0x445   : > { %8114 = vst [vmem:[#allocation19_spill] sm:$0xff] %v6675_v0  ;;  %v2373_v12 = vsel %vm7972_vm0, %v6675_v0, -inf  ;;  %v8127_v0 = vld [vmem:[#allocation38_spill] sm:$0xff] }
 0x446   : > { %v6491_v35 = vpop.permute.xlu1 %2013  ;;  %v6493_v15 = vpop.permute.xlu0 %1916 }
 0x447   : > { %v6681_v43 = vmul.f32 %v8115_v58, %v6491_v35  ;;  %v8117_v35 = vld [vmem:[#allocation28_spill] sm:$0xff] }
 0x448   : > { %v6697_v16 = vmul.f32 %v8117_v35, %v6493_v15  ;;  %v8125_v58 = vld [vmem:[#allocation48_spill] sm:$0xff] }
 0x449   : > { %8116 = vst [vmem:[#allocation20_spill] sm:$0xff] %v6681_v43  ;;  %v2453_v15 = vsel %vm7972_vm0, %v6681_v43, -inf }
 0x44a   : > { %v6496_v39 = vpop.permute.xlu1 %2079  ;;  %v6498_v50 = vpop.permute.xlu0 %2048  ;;  %8118 = vst [vmem:[#allocation18_spill] sm:$0xff] %v6697_v16 }
 0x44b   : > { %v6731_v8 = vmul.f32 %v8131_v27, %v6498_v50 }
 0x44d   : > { %8132 = vst [vmem:[#allocation32_spill] sm:$0xff] %v6731_v8 }
 0x44e   : > { %v6500_v59 = vpop.permute.xlu1 %1982  ;;  %v6502_v13 = vpop.permute.xlu0 %1885 }
 0x44f   : > { %v6703_v33 = vmul.f32 %v8119_v47, %v6500_v59  ;;  %v6707_v10 = vmul.f32 %v8121_v57, %v6502_v13  ;;  %v2414_v47 = vmax.f32 %v2412_v24, %v2413_v51  ;;  %v8129_v57 = vld [vmem:[#allocation49_spill] sm:$0xff]  ;;  %v2454_v51 = vmax.f32 %v2452_v54, %v2453_v15  ;;  %v8137_v54 = vld [vmem:[#allocation36_spill] sm:$0xff] }
 0x451   : > { %8120 = vst [vmem:[#allocation26_spill] sm:$0xff] %v6703_v33  ;;  %8122 = vst [vmem:[#allocation24_spill] sm:$0xff] %v6707_v10  ;;  %v2434_v50 = vsel %vm7972_vm0, %v6703_v33, -inf }
 0x452   : > { %v6504_v55 = vpop.permute.xlu1 %1850  ;;  %v6506_v36 = vpop.permute.xlu0 %2017 }
 0x453   : > { %v6711_v3 = vmul.f32 %v8123_v48, %v6504_v55  ;;  %v6717_v35 = vmul.f32 %v8125_v58, %v6506_v36  ;;  %v6727_v55 = vmul.f32 %v8129_v57, %v6496_v39  ;;  %v2374_v48 = vmax.f32 %v2372_v34, %v2373_v12  ;;  %v8133_v36 = vld [vmem:[#allocation50_spill] sm:$0xff]  ;;  %v8136_v57 = vld [vmem:[#allocation45_spill] sm:$0xff] }
 0x454   : > { %v6735_v58 = vmul.f32 %v8133_v36, %v6485_v9  ;;  %v2375_v34 = vsel %vm7972_vm0, %v6707_v10, -inf }
 0x455   : > { %8124 = vst [vmem:[#allocation16_spill] sm:$0xff] %v6711_v3  ;;  %8126 = vst [vmem:[#allocation17_spill] sm:$0xff] %v6717_v35  ;;  %v2354_v9 = vsel %vm7972_vm0, %v6711_v3, -inf  ;;  %v2455_v12 = vsel %vm7972_vm0, %v6717_v35, -inf  ;;  %v2474_v3 = vsel %vm7972_vm0, %v6731_v8, -inf  ;;  %v8138_v35 = vld [vmem:[#allocation34_spill] sm:$0xff]  ;;  %v2376_v33 = vmax.f32 %v2374_v48, %v2375_v34 }
 0x456   : > { %v6508_v44 = vpop.permute.xlu1 %1951  ;;  %v6510_v46 = vpop.permute.xlu0 %1920  ;;  %8130 = vst [vmem:[#allocation22_spill] sm:$0xff] %v6727_v55  ;;  %8134 = vst [vmem:[#allocation30_spill] sm:$0xff] %v6735_v58  ;;  %v8141_v8 = vld [vmem:[#allocation46_spill] sm:$0xff] }
 0x457   : > { %v6721_v59 = vmul.f32 %v8127_v0, %v6508_v44  ;;  %v2394_v44 = vsel %vm7972_vm0, %v6697_v16, -inf  ;;  %v8135_v0 = vld [vmem:[#allocation35_spill] sm:$0xff] }
 0x458   : > { %v6741_v13 = vmul.f32 %v8135_v0, %v6510_v46  ;;  %v2395_v36 = vmax.f32 %v2393_v53, %v2394_v44  ;;  %v6767_v0 = vsel %vm7972_vm0, %v6727_v55, -inf  ;;  %v2456_v55 = vmax.f32 %v2454_v51, %v2455_v12 }
 0x459   : > { %8128 = vst [vmem:[#allocation25_spill] sm:$0xff] %v6721_v59  ;;  %v2415_v46 = vsel %vm7972_vm0, %v6721_v59, -inf  ;;  %v2435_v59 = vmax.f32 %v2433_v30, %v2434_v50 }
 0x45a   : > { %v6512_v37 = vpop.permute.xlu1 %2083  ;;  %v6514_v6 = vpop.permute.xlu0 %2052  ;;  %v2416_v16 = vmax.f32 %v2414_v47, %v2415_v46  ;;  %v8147_v47 = vld [vmem:[#allocation54_spill] sm:$0xff] }
 0x45b   : > { %v6799_v51 = vmul.f32 %v8147_v47, %v6514_v6  ;;  %v8155_v47 = vld [vmem:[#allocation64_spill] sm:$0xff] }
 0x45d   : > { %8148 = vst [vmem:[#allocation31_spill] sm:$0xff] %v6799_v51 }
 0x45e   : > { %v6516_v18 = vpop.permute.xlu1 %1986  ;;  %v6518_v19 = vpop.permute.xlu0 %1889 }
 0x45f   : > { %v6759_v27 = vmul.f32 %v8136_v57, %v6516_v18  ;;  %v6763_v15 = vmul.f32 %v8137_v54, %v6518_v19  ;;  %v2396_v18 = vsel %vm7972_vm0, %v6741_v13, -inf  ;;  %v8139_v19 = vld [vmem:[#allocation55_spill] sm:$0xff]  ;;  %v2355_v54 = vmax.f32 %v2353_v41, %v2354_v9 }
 0x460   : > { %v2397_v41 = vmax.f32 %v2395_v36, %v2396_v18  ;;  %v8153_v36 = vld [vmem:[#allocation51_spill] sm:$0xff] }
 0x461   : > { %v2377_v30 = vsel %vm7972_vm0, %v6763_v15, -inf }
 0x462   : > { %v6520_v49 = vpop.permute.xlu1 %1854  ;;  %v6522_v62 = vpop.permute.xlu0 %2021 }
 0x463   : > { %v6773_v10 = vmul.f32 %v8138_v35, %v6520_v49  ;;  %v6779_v57 = vmul.f32 %v8139_v19, %v6522_v62  ;;  %v2436_v49 = vsel %vm7972_vm0, %v6759_v27, -inf  ;;  %v8143_v35 = vld [vmem:[#allocation43_spill] sm:$0xff]  ;;  %v8145_v62 = vld [vmem:[#allocation42_spill] sm:$0xff] }
 0x465   : > { %8140 = vst [vmem:[#allocation33_spill] sm:$0xff] %v6779_v57  ;;  %v2457_v9 = vsel %vm7972_vm0, %v6779_v57, -inf }
 0x466   : > { %v6543_v25 = vpop.permute.xlu1 %1955  ;;  %v6545_v22 = vpop.permute.xlu0 %1924 }
 0x467   : > { %v6783_v43 = vmul.f32 %v8141_v8, %v6543_v25  ;;  %v6791_v48 = vmul.f32 %v8143_v35, %v6545_v22  ;;  %v2356_v25 = vsel %vm7972_vm0, %v6773_v10, -inf  ;;  %v8149_v8 = vld [vmem:[#allocation53_spill] sm:$0xff]  ;;  %v8151_v22 = vld [vmem:[#allocation52_spill] sm:$0xff]  ;;  %v2437_v35 = vmax.f32 %v2435_v59, %v2436_v49 }
 0x468   : > { %v2458_v59 = vmax.f32 %v2456_v55, %v2457_v9  ;;  %v8163_v55 = vld [vmem:[#allocation67_spill] sm:$0xff] }
 0x469   : > { %8142 = vst [vmem:[#allocation39_spill] sm:$0xff] %v6783_v43  ;;  %8144 = vst [vmem:[#allocation21_spill] sm:$0xff] %v6791_v48 }
 0x46a   : > { %v6581_v26 = vpop.permute.xlu1 %2087  ;;  %v6583_v61 = vpop.permute.xlu0 %2056 }
 0x46e   : > { %v6625_v52 = vpop.permute.xlu1 %1990  ;;  %v6627_v5 = vpop.permute.xlu0 %1893 }
 0x46f   : > { %v6810_v12 = vmul.f32 %v8151_v22, %v6625_v52  ;;  %v2398_v52 = vsel %vm7972_vm0, %v6791_v48, -inf  ;;  %v8157_v22 = vld [vmem:[#allocation65_spill] sm:$0xff] }
 0x471   : > { %v2438_v48 = vsel %vm7972_vm0, %v6810_v12, -inf }
 0x472   : > { %v6667_v29 = vpop.permute.xlu1 %1858  ;;  %v6669_v1 = vpop.permute.xlu0 %2025 }
 0x473   : > { %v6795_v50 = vmul.f32 %v8145_v62, %v6667_v29  ;;  %v8152_v29 = vld [vmem:[#allocation44_spill] sm:$0xff]  ;;  %v2378_v62 = vmax.f32 %v2376_v33, %v2377_v30  ;;  %v2357_v33 = vmax.f32 %v2355_v54, %v2356_v25  ;;  %v8161_v30 = vld [vmem:[#allocation71_spill] sm:$0xff]  ;;  %v6848_v54 = vmul.f32 %v8163_v55, %v6583_v61 }
 0x474   : > { %v6814_v46 = vmul.f32 %v8152_v29, %v6627_v5  ;;  %v8159_v29 = vld [vmem:[#allocation63_spill] sm:$0xff] }
 0x475   : > { %8146 = vst [vmem:[#allocation41_spill] sm:$0xff] %v6795_v50  ;;  %v2358_v5 = vsel %vm7972_vm0, %v6795_v50, -inf  ;;  %8164 = vst [vmem:[#allocation48_spill] sm:$0xff] %v6848_v54 }
 0x476   : > { %v1960_v40 = vpop.permute.xlu1 %1959  ;;  %v1929_v32 = vpop.permute.xlu0 %1928  ;;  %v2379_v50 = vsel %vm7972_vm0, %v6814_v46, -inf  ;;  %v2359_v25 = vmax.f32 %v2357_v33, %v2358_v5 }
 0x477   : > { %v6804_v34 = vmul.f32 %v8149_v8, %v1960_v40  ;;  %v6817_v6 = vmul.f32 %v8153_v36, %v1929_v32  ;;  %v2417_v40 = vsel %vm7972_vm0, %v6783_v43, -inf  ;;  %v6823_v8 = vmul.f32 %v8155_v47, %v6669_v1 }
 0x478   : > { %v2418_v47 = vmax.f32 %v2416_v16, %v2417_v40 }
 0x479   : > { %8150 = vst [vmem:[#allocation23_spill] sm:$0xff] %v6804_v34  ;;  %8154 = vst [vmem:[#allocation40_spill] sm:$0xff] %v6817_v6  ;;  %v2419_v49 = vsel %vm7972_vm0, %v6804_v34, -inf }
 0x47a   : > { %v6743_v24 = vpop.permute.xlu1 %2091  ;;  %v6745_v39 = vpop.permute.xlu0 %2060  ;;  %8156 = vst [vmem:[#allocation28_spill] sm:$0xff] %v6823_v8  ;;  %v2420_v9 = vmax.f32 %v2418_v47, %v2419_v49  ;;  %v8167_v47 = vld [vmem:[#allocation74_spill] sm:$0xff] }
 0x47e   : > { %v1995_v53 = vpop.permute.xlu1 %1994  ;;  %v2030_v44 = vpop.permute.xlu0 %2029 }
 0x47f   : > { %v6830_v32 = vmul.f32 %v8157_v22, %v1995_v53  ;;  %v6838_v1 = vmul.f32 %v8161_v30, %v2030_v44  ;;  %v2400_v53 = vsel %vm7972_vm0, %v6817_v6, -inf  ;;  %v2399_v22 = vmax.f32 %v2397_v41, %v2398_v52  ;;  %v8165_v30 = vld [vmem:[#allocation69_spill] sm:$0xff] }
 0x480   : > { %v2459_v44 = vsel %vm7972_vm0, %v6823_v8, -inf  ;;  %v2439_v41 = vmax.f32 %v2437_v35, %v2438_v48  ;;  %v2380_v52 = vmax.f32 %v2378_v62, %v2379_v50  ;;  %v2476_v48 = vsel %vm7972_vm0, %v6799_v51, -inf  ;;  %v8170_v50 = vld [vmem:[#allocation70_spill] sm:$0xff] }
 0x481   : > { %8158 = vst [vmem:[#allocation37_spill] sm:$0xff] %v6830_v32  ;;  %8162 = vst [vmem:[#allocation27_spill] sm:$0xff] %v6838_v1  ;;  %v2440_v40 = vsel %vm7972_vm0, %v6830_v32, -inf  ;;  %v2401_v34 = vmax.f32 %v2399_v22, %v2400_v53  ;;  %v2461_v61 = vsel %vm7972_vm0, %v6838_v1, -inf  ;;  %v2460_v5 = vmax.f32 %v2458_v59, %v2459_v44  ;;  %v8172_v59 = vld [vmem:[#allocation58_spill] sm:$0xff] }
 0x482   : > { %v1964_v18 = vpop.permute.xlu1 %1963  ;;  %v1999_v19 = vpop.permute.xlu0 %1998  ;;  %v6873_v35 = vmul.f32 %v8170_v50, %v6745_v39  ;;  %v2441_v62 = vmax.f32 %v2439_v41, %v2440_v40  ;;  %v6877_v53 = vmul.f32 %v8172_v59, %v6512_v37  ;;  %v2360_v22 = vrot.slane %v2359_v25, 4  ;;  %v8176_v50 = vld [vmem:[#allocation76_spill] sm:$0xff] }
 0x483   : > { %v6833_v36 = vmul.f32 %v8159_v29, %v1964_v18  ;;  %v6857_v6 = vmul.f32 %v8165_v30, %v1999_v19  ;;  %v2462_v44 = vmax.f32 %v2460_v5, %v2461_v61  ;;  %v2492_v39 = vsel %vm7972_vm0, %v6735_v58, -inf  ;;  %v8174_v30 = vld [vmem:[#allocation66_spill] sm:$0xff] }
 0x484   : > { %8171 = vst [vmem:[#allocation47_spill] sm:$0xff] %v6873_v35  ;;  %8173 = vst [vmem:[#allocation50_spill] sm:$0xff] %v6877_v53  ;;  %v2494_v37 = vmax.f32 %v2492_v39, %v6767_v0  ;;  %v6888_v41 = vmul.f32 %v8174_v30, %v6581_v26  ;;  %v2480_v61 = vsel %vm7972_vm0, %v6873_v35, -inf  ;;  %v2495_v5 = vsel %vm7972_vm0, %v6877_v53, -inf  ;;  %v8178_v0 = vld [vmem:[#allocation73_spill] sm:$0xff] }
 0x485   : > { %8160 = vst [vmem:[#allocation29_spill] sm:$0xff] %v6833_v36  ;;  %v2421_v29 = vsel %vm7972_vm0, %v6833_v36, -inf  ;;  %8166 = vst [vmem:[#allocation38_spill] sm:$0xff] %v6857_v6  ;;  %v2442_v49 = vsel %vm7972_vm0, %v6857_v6, -inf  ;;  %v8169_v36 = vmax.f32 %v6685_v14, %v6691_v60  ;;  %v2478_v14 = vsel %vm7972_vm0, %v6848_v54, -inf }
 0x486   : > { %v2096_v18 = vpop.permute.xlu1 %2095  ;;  %v2034_v16 = vpop.permute.xlu0 %2033  ;;  %v2422_v33 = vmax.f32 %v2420_v9, %v2421_v29  ;;  %v2381_v60 = vrot.slane %v2380_v52, 4  ;;  %8175 = vst [vmem:[#allocation35_spill] sm:$0xff] %v6888_v41 }
 0x487   : > { %v6864_v55 = vmul.f32 %v8167_v47, %v2034_v16  ;;  %v2475_v19 = vmax.f32 %v8169_v36, %v2474_v3  ;;  %v2402_v3 = vrot.slane %v2401_v34, 4  ;;  %v2443_v36 = vmax.f32 %v2441_v62, %v2442_v49 }
 0x488   : > { %v2423_v40 = vrot.slane %v2422_v33, 4  ;;  %v2361_v49 = vmax.f32 %v2359_v25, %v2360_v22  ;;  %v2382_v59 = vmax.f32 %v2380_v52, %v2381_v60  ;;  %v2497_v25 = vsel %vm7972_vm0, %v6888_v41, -inf }
 0x489   : > { %8168 = vst [vmem:[#allocation49_spill] sm:$0xff] %v6864_v55  ;;  %v2463_v16 = vsel %vm7972_vm0, %v6864_v55, -inf  ;;  %v2477_v9 = vmax.f32 %v2475_v19, %v2476_v48  ;;  %v2444_v26 = vrot.slane %v2443_v36, 4 }
 0x48a   : > { %v2065_v32 = vpop.permute.xlu1 %2064  ;;  %v2464_v29 = vmax.f32 %v2462_v44, %v2463_v16  ;;  %v2069_v19 = vpop.permute.xlu0 %2068  ;;  %v2403_v44 = vmax.f32 %v2401_v34, %v2402_v3  ;;  %v6899_v16 = vmul.f32 %v8178_v0, %v6743_v24  ;;  %v2424_v30 = vmax.f32 %v2422_v33, %v2423_v40 }
 0x48b   : > { %v2479_v47 = vmax.f32 %v2477_v9, %v2478_v14  ;;  %v6895_v62 = vmul.f32 %v8176_v50, %v2065_v32  ;;  %v8180_v32 = vld [vmem:[#allocation75_spill] sm:$0xff]  ;;  %v8182_v14 = vld [vmem:[#allocation77_spill] sm:$0xff]  ;;  %v2496_v34 = vmax.f32 %v2494_v37, %v2495_v5  ;;  %v2362_v60 = vrot.slane %v2361_v49, 2 }
 0x48c   : > { %8179 = vst [vmem:[#allocation36_spill] sm:$0xff] %v6899_v16  ;;  %v2465_v55 = vrot.slane %v2464_v29, 4  ;;  %v6906_v22 = vmul.f32 %v8180_v32, %v2096_v18  ;;  %v6909_v52 = vmul.f32 %v8182_v14, %v2069_v19  ;;  %v2383_v3 = vrot.slane %v2382_v59, 2 }
 0x48d   : > { %8177 = vst [vmem:[#allocation45_spill] sm:$0xff] %v6895_v62  ;;  %v2481_v39 = vmax.f32 %v2479_v47, %v2480_v61  ;;  %v2482_v6 = vsel %vm7972_vm0, %v6895_v62, -inf  ;;  %v2404_v9 = vrot.slane %v2403_v44, 2  ;;  %v2499_v33 = vsel %vm7972_vm0, %v6899_v16, -inf }
 0x48e   : > { %v2100_v48 = vpop.permute.xlu1 %2099  ;;  %8181 = vst [vmem:[#allocation34_spill] sm:$0xff] %v6906_v22  ;;  %8183 = vst [vmem:[#allocation55_spill] sm:$0xff] %v6909_v52  ;;  %v2445_v40 = vmax.f32 %v2443_v36, %v2444_v26  ;;  %v2498_v61 = vmax.f32 %v2496_v34, %v2497_v25  ;;  %v2425_v47 = vrot.slane %v2424_v30, 2  ;;  %v2466_v50 = vmax.f32 %v2464_v29, %v2465_v55  ;;  %v8186_v36 = vld [vmem:[#allocation79_spill] sm:$0xff] }
 0x48f   : > { %v2483_v24 = vmax.f32 %v2481_v39, %v2482_v6  ;;  %v2501_v18 = vsel %vm7972_vm0, %v6906_v22, -inf  ;;  %v2484_v19 = vsel %vm7972_vm0, %v6909_v52, -inf  ;;  %v2363_v32 = vmax.f32 %v2361_v49, %v2362_v60  ;;  %v8184_v6 = vld [vmem:[#allocation78_spill] sm:$0xff] }
 0x490   : > { %v2500_v37 = vmax.f32 %v2498_v61, %v2499_v33  ;;  %v6918_v39 = vmul.f32 %v8184_v6, %v2100_v48  ;;  %v2384_v14 = vmax.f32 %v2382_v59, %v2383_v3  ;;  %v2405_v1 = vmax.f32 %v2403_v44, %v2404_v9 }
 0x491   : > { %v2485_v5 = vmax.f32 %v2483_v24, %v2484_v19  ;;  %v2446_v62 = vrot.slane %v2445_v40, 2  ;;  %v2426_v55 = vmax.f32 %v2424_v30, %v2425_v47  ;;  %v2467_v25 = vrot.slane %v2466_v50, 2 }
 0x492   : > { %v2104_v0 = vpop.permute.xlu1 %2103  ;;  %8185 = vst [vmem:[#allocation46_spill] sm:$0xff] %v6918_v39  ;;  %v2502_v29 = vmax.f32 %v2500_v37, %v2501_v18  ;;  %v2503_v22 = vsel %vm7972_vm0, %v6918_v39, -inf  ;;  %v2364_v52 = vrot.slane %v2363_v32, 1  ;;  %v2385_v24 = vrot.slane %v2384_v14, 1  ;;  %v5067_v37 = vld [vmem:[%s7790_s3 + $0x38] sm:$0xff]  }
 0x493   : > { %v6921_v26 = vmul.f32 %v8186_v36, %v2104_v0  ;;  %v2486_v34 = vrot.slane %v2485_v5, 4  ;;  %v2406_v59 = vrot.slane %v2405_v1, 1  ;;  %v2447_v44 = vmax.f32 %v2445_v40, %v2446_v62  ;;  %4994 = vmatpush3.bf16.msra.mxu1 %v5067_v37 }
 0x494   : > { %v2504_v60 = vmax.f32 %v2502_v29, %v2503_v22  ;;  %v2427_v3 = vrot.slane %v2426_v55, 1  ;;  %v2468_v9 = vmax.f32 %v2466_v50, %v2467_v25  ;;  %v2365_v30 = vmax.f32 %v2363_v32, %v2364_v52 }
 0x495   : > { %8187 = vst [vmem:[#allocation43_spill] sm:$0xff] %v6921_v26  ;;  %v2487_v49 = vmax.f32 %v2485_v5, %v2486_v34  ;;  %v2505_v48 = vsel %vm7972_vm0, %v6921_v26, -inf  ;;  %v2407_v18 = vmax.f32 %v2405_v1, %v2406_v59  ;;  %v2448_v19 = vrot.slane %v2447_v44, 1 }
 0x496   : > { %v2506_v61 = vmax.f32 %v2504_v60, %v2505_v48  ;;  %v2386_v22 = vmax.f32 %v2384_v14, %v2385_v24  ;;  %v2428_v5 = vmax.f32 %v2426_v55, %v2427_v3  ;;  %v2469_v6 = vrot.slane %v2468_v9, 1 }
 0x497   : > { %v2488_v33 = vrot.slane %v2487_v49, 2  ;;  %v2449_v50 = vmax.f32 %v2447_v44, %v2448_v19  ;;  %v2170_v59 = vsel %vm7972_vm0, %v6526_v21, 0.0  ;;  %v2169_v44 = vsel %vm7972_vm0, %v6530_v4, 0.0 }
 0x498   : > { %v2507_v0 = vrot.slane %v2506_v61, 4  ;;  %v2537_v62 = vsel %vm1289_vm8, %v2386_v22, %v2365_v30  ;;  %v2470_v32 = vmax.f32 %v2468_v9, %v2469_v6  ;;  %v2191_v3 = vsel %vm7972_vm0, %v6534_v28, 0.0 }
 0x499   : > { %v2489_v47 = vmax.f32 %v2487_v49, %v2488_v33  ;;  %v2538_v52 = vsel %vm1291_vm10, %v2407_v18, %v2537_v62  ;;  %v2212_v9 = vsel %vm7972_vm0, %v6541_v20, 0.0  ;;  %v2171_v33 = vadd.f32 %v2170_v59, %v2169_v44  ;;  %v8190_v62 = vld [vmem:[#allocation82_spill] sm:$0xff] }
 0x49a   : > { %v2508_v36 = vmax.f32 %v2506_v61, %v2507_v0  ;;  %v2539_v1 = vsel %vm1293_vm11, %v2428_v5, %v2538_v52  ;;  %v2172_v61 = vsel %vm7972_vm0, %v6557_v45, 0.0  ;;  %v2190_v30 = vsel %vm7972_vm0, %v6538_v38, 0.0  ;;  %v8188_v5 = vld [vmem:[#allocation84_spill] sm:$0xff] }
 0x49b   : > { %v2490_v29 = vrot.slane %v2489_v47, 1  ;;  %v2540_v60 = vsel %vm7976_vm12, %v2449_v50, %v2539_v1  ;;  %v2193_v0 = vsel %vm7972_vm0, %v6563_v31, 0.0  ;;  %v2214_v18 = vsel %vm7972_vm0, %v6567_v56, 0.0  ;;  %v8192_v1 = vld [vmem:[#allocation85_spill] sm:$0xff] }
 0x49c   : > { %v2509_v40 = vrot.slane %v2508_v36, 2  ;;  %v2541_v55 = vsel %vm7975_vm13, %v2470_v32, %v2540_v60  ;;  %v2192_v19 = vadd.f32 %v2191_v3, %v2190_v30  ;;  %v2173_v22 = vadd.f32 %v2172_v61, %v2171_v33  ;;  %v8191_v32 = vld [vmem:[#allocation88_spill] sm:$0xff]  ;;  %v8196_v3 = vld [vmem:[#allocation10_spill] sm:$0xff] }
 0x49d   : > { %v2491_v34 = vmax.f32 %v2489_v47, %v2490_v29  ;;  %v2211_v47 = vsel %vm7972_vm0, %v6553_v2, 0.0  ;;  %v2233_v6 = vsel %vm7972_vm0, %v8188_v5, 0.0  ;;  %v2256_v33 = vsel %vm7972_vm0, %v6633_v23, 0.0  ;;  %v8198_v5 = vld [vmem:[#allocation20_spill] sm:$0xff] }
 0x49e   : > { %v2510_v25 = vmax.f32 %v2508_v36, %v2509_v40  ;;  %v2213_v37 = vadd.f32 %v2212_v9, %v2211_v47  ;;  %v8189_v36 = vld [vmem:[#allocation86_spill] sm:$0xff]  ;;  %v2232_v40 = vsel %vm7972_vm0, %v8190_v62, 0.0  ;;  %v2194_v50 = vadd.f32 %v2193_v0, %v2192_v19 }
 0x49f   : > { %v2542_v48 = vsel %vm7974_vm14, %v2491_v34, %v2541_v55  ;;  %v2253_v29 = vsel %vm7972_vm0, %v8189_v36, 0.0  ;;  %v2254_v34 = vsel %vm7972_vm0, %v8192_v1, 0.0  ;;  %v2234_v59 = vadd.f32 %v2233_v6, %v2232_v40 }
 0x4a0   : > { %v2511_v49 = vrot.slane %v2510_v25, 1  ;;  %v2215_v52 = vadd.f32 %v2214_v18, %v2213_v37  ;;  %v2255_v44 = vadd.f32 %v2254_v34, %v2253_v29  ;;  %v2275_v9 = vsel %vm7972_vm0, %v8196_v3, 0.0 }
 0x4a1   : > { %v2274_v30 = vsel %vm7972_vm0, %v6641_v7, 0.0  ;;  %v2176_v47 = vsel %vm7972_vm0, %v6653_v17, 0.0  ;;  %v2296_v0 = vsel %vm7972_vm0, %v6661_v63, 0.0  ;;  %v2237_v6 = vsel %vm7972_vm0, %v6665_v42, 0.0  ;;  %v8199_v63 = vld [vmem:[#allocation18_spill] sm:$0xff] }
 0x4a2   : > { %v2512_v14 = vmax.f32 %v2510_v25, %v2511_v49  ;;  %v2195_v25 = vsel %vm7972_vm0, %v8191_v32, 0.0  ;;  %v8193_v49 = vld [vmem:[#allocation87_spill] sm:$0xff]  ;;  %v2276_v29 = vadd.f32 %v2275_v9, %v2274_v30  ;;  %v2295_v40 = vsel %vm7972_vm0, %v6649_v11, 0.0  ;;  %v8202_v9 = vld [vmem:[#allocation26_spill] sm:$0xff]  ;;  %v8205_v11 = vld [vmem:[#allocation17_spill] sm:$0xff] }
 0x4a3   : > { %v2174_v60 = vsel %vm7972_vm0, %v8193_v49, 0.0  ;;  %v2196_v61 = vadd.f32 %v2195_v25, %v2194_v50  ;;  %v2257_v50 = vadd.f32 %v2256_v33, %v2255_v44  ;;  %v8197_v25 = vld [vmem:[#allocation19_spill] sm:$0xff]  ;;  %v2297_v7 = vadd.f32 %v2296_v0, %v2295_v40 }
 0x4a4   : > { %v2543_v24 = vsel %vm7973_vm15, %v2512_v14, %v2542_v48  ;;  %v8194_v14 = vld [vmem:[#allocation11_spill] sm:$0xff]  ;;  %v8195_v48 = vld [vmem:[#allocation9_spill] sm:$0xff]  ;;  %v2175_v18 = vadd.f32 %v2174_v60, %v2173_v22  ;;  %v2197_v34 = vsel %vm7972_vm0, %v8197_v25, 0.0  ;;  %v2218_v22 = vsel %vm7972_vm0, %v8199_v63, 0.0  ;;  %v8200_v60 = vld [vmem:[#allocation22_spill] sm:$0xff] }
 0x4a5   : > { %2544 = vrot.lane.b32.xlu0 %v2543_v24, %s5249_s17  ;;  %v2235_v55 = vsel %vm7972_vm0, %v8194_v14, 0.0  ;;  %v2216_v24 = vsel %vm7972_vm0, %v8195_v48, 0.0  ;;  %v2277_v14 = vsel %vm7972_vm0, %v8198_v5, 0.0  ;;  %v2258_v44 = vsel %vm7972_vm0, %v8202_v9, 0.0  ;;  %v8206_v5 = vld [vmem:[#allocation25_spill] sm:$0xff]  ;;  %s5252_s17 = smov [#allocation5]  }
 0x4a6   : > { %v2236_v19 = vadd.f32 %v2235_v55, %v2234_v59  ;;  %v2217_v37 = vadd.f32 %v2216_v24, %v2215_v52  ;;  %v2177_v3 = vadd.f32 %v2176_v47, %v2175_v18  ;;  %v2317_v55 = vsel %vm7972_vm0, %v8200_v60, 0.0  ;;  %v8201_v24 = vld [vmem:[#allocation32_spill] sm:$0xff]  ;;  %s5180_s19 = sshll.u32 %s5252_s17, 4  ;;  %s5181_s19 = int_to_ptr.vmem [resolvable:$false] %s5180_s19 }
 0x4a7   : > { %v2298_v59 = vsel %vm7972_vm0, %v8201_v24, 0.0  ;;  %v2198_v33 = vadd.f32 %v2197_v34, %v2196_v61  ;;  %v2316_v30 = vsel %vm7972_vm0, %v6735_v58, 0.0  ;;  %v8203_v47 = vld [vmem:[#allocation24_spill] sm:$0xff]  ;;  %v2279_v60 = vsel %vm7972_vm0, %v8205_v11, 0.0  ;;  %s5182_s12 = scalar_lea.vmem %s5181_s19, 256  ;;  %p5183_p2 = scmp.lt.s32.totalorder %s7745_s23, %s5181_s19 }
 0x4a8   : > { %v2238_v52 = vadd.f32 %v2237_v6, %v2236_v19  ;;  %v2199_v0 = vsel %vm7972_vm0, %v8203_v47, 0.0  ;;  %v8204_v18 = vld [vmem:[#allocation16_spill] sm:$0xff]  ;;  %v2278_v19 = vadd.f32 %v2277_v14, %v2276_v29  ;;  %v2219_v6 = vadd.f32 %v2218_v22, %v2217_v37  ;;  %p5184_p3 = scmp.lt.s32.totalorder %s5182_s12, %s5176_s9 }
 0x4a9   : > { %v2178_v40 = vsel %vm7972_vm0, %v8204_v18, 0.0  ;;  %v2239_v24 = vsel %vm7972_vm0, %v8206_v5, 0.0  ;;  %v2318_v42 = vadd.f32 %v2317_v55, %v2316_v30  ;;  %v2299_v62 = vadd.f32 %v2298_v59, %v2297_v7 }
 0x4aa   : > { %v2259_v61 = vadd.f32 %v2258_v44, %v2257_v50  ;;  %v2220_v34 = vsel %vm7972_vm0, %v6741_v13, 0.0  ;;  %v2200_v58 = vadd.f32 %v2199_v0, %v2198_v33  ;;  %v2179_v9 = vadd.f32 %v2178_v40, %v2177_v3  ;;  %p5185_p4 = por %p5184_p3, %p5183_p2 }
 0x4ab   : > { %v2319_v23 = vsel %vm7972_vm0, %v6877_v53, 0.0  ;;  %v2300_v14 = vsel %vm7972_vm0, %v6799_v51, 0.0  ;;  %v2280_v37 = vadd.f32 %v2279_v60, %v2278_v19  ;;  %v2240_v29 = vadd.f32 %v2239_v24, %v2238_v52  ;;  %v8207_v60 = vld [vmem:[#allocation21_spill] sm:$0xff] }
 0x4ac   : > { %v2260_v22 = vsel %vm7972_vm0, %v6759_v27, 0.0  ;;  %v2201_v7 = vsel %vm7972_vm0, %v6763_v15, 0.0  ;;  %v2221_v50 = vadd.f32 %v2220_v34, %v2219_v6  ;;  %v2180_v55 = vsel %vm7972_vm0, %v6773_v10, 0.0  ;;  %p5186_p7 = pnand %p5185_p4, %p5179_p12 }
 0x4ad   : > { %v2281_v3 = vsel %vm7972_vm0, %v6779_v57, 0.0  ;;  %v2241_v59 = vsel %vm7972_vm0, %v6783_v43, 0.0  ;;  %v2320_v44 = vadd.f32 %v2319_v23, %v2318_v42  ;;  %v2301_v33 = vadd.f32 %v2300_v14, %v2299_v62  ;;  %v8208_v14 = vld [vmem:[#allocation41_spill] sm:$0xff] }
 0x4ae   : > { %v2222_v52 = vsel %vm7972_vm0, %v8207_v60, 0.0  ;;  %v2321_v24 = vsel %vm7972_vm0, %v6888_v41, 0.0  ;;  %v2261_v30 = vadd.f32 %v2260_v22, %v2259_v61  ;;  %v2202_v0 = vadd.f32 %v2201_v7, %v2200_v58  ;;  %v8209_v41 = vld [vmem:[#allocation23_spill] sm:$0xff]  ;;  %v8210_v7 = vld [vmem:[#allocation40_spill] sm:$0xff] }
 0x4af   : > { %v2302_v40 = vsel %vm7972_vm0, %v6848_v54, 0.0  ;;  %v2262_v19 = vsel %vm7972_vm0, %v6810_v12, 0.0  ;;  %v2181_v6 = vadd.f32 %v2180_v55, %v2179_v9  ;;  %v2282_v34 = vadd.f32 %v2281_v3, %v2280_v37  ;;  %v8211_v55 = vld [vmem:[#allocation29_spill] sm:$0xff] }
 0x4b0   : > { %v2242_v53 = vadd.f32 %v2241_v59, %v2240_v29  ;;  %v2203_v42 = vsel %vm7972_vm0, %v6814_v46, 0.0  ;;  %v2223_v23 = vadd.f32 %v2222_v52, %v2221_v50  ;;  %v2322_v62 = vadd.f32 %v2321_v24, %v2320_v44  ;;  %v8213_v24 = vld [vmem:[#allocation45_spill] sm:$0xff] }
 0x4b1   : > { %v2182_v57 = vsel %vm7972_vm0, %v8208_v14, 0.0  ;;  %v2243_v58 = vsel %vm7972_vm0, %v8209_v41, 0.0  ;;  %v2303_v61 = vadd.f32 %v2302_v40, %v2301_v33  ;;  %v2263_v22 = vadd.f32 %v2262_v19, %v2261_v30  ;;  %v8212_v33 = vld [vmem:[#allocation37_spill] sm:$0xff] }
 0x4b2   : > { %v2224_v54 = vsel %vm7972_vm0, %v8210_v7, 0.0  ;;  %v2304_v9 = vsel %vm7972_vm0, %v6873_v35, 0.0  ;;  %v2204_v37 = vadd.f32 %v2203_v42, %v2202_v0  ;;  %v2283_v29 = vsel %vm7972_vm0, %v6823_v8, 0.0  ;;  %v8214_v0 = vld [vmem:[#allocation27_spill] sm:$0xff]  ;;  %v8215_v35 = vld [vmem:[#allocation34_spill] sm:$0xff] }
 0x4b3   : > { %v2323_v50 = vsel %vm7972_vm0, %v6899_v16, 0.0  ;;  %v2245_v3 = vsel %vm7972_vm0, %v8211_v55, 0.0  ;;  %v2183_v59 = vadd.f32 %v2182_v57, %v2181_v6  ;;  %v2244_v44 = vadd.f32 %v2243_v58, %v2242_v53  ;;  %v8216_v55 = vld [vmem:[#allocation38_spill] sm:$0xff]  ;;  %v8217_v6 = vld [vmem:[#allocation49_spill] sm:$0xff] }
 0x4b4   : > { %v2264_v52 = vsel %vm7972_vm0, %v8212_v33, 0.0  ;;  %v2306_v30 = vsel %vm7972_vm0, %v8213_v24, 0.0  ;;  %v2225_v40 = vadd.f32 %v2224_v54, %v2223_v23  ;;  %v2305_v19 = vadd.f32 %v2304_v9, %v2303_v61 }
 0x4b5   : > { %v2285_v42 = vsel %vm7972_vm0, %v8214_v0, 0.0  ;;  %v2325_v8 = vsel %vm7972_vm0, %v8215_v35, 0.0  ;;  %v2284_v16 = vadd.f32 %v2283_v29, %v2282_v34  ;;  %v2324_v51 = vadd.f32 %v2323_v50, %v2322_v62  ;;  %v8218_v50 = vld [vmem:[#allocation55_spill] sm:$0xff] }
 0x4b6   : > { %v2246_v41 = vadd.f32 %v2245_v3, %v2244_v44  ;;  %v2266_v57 = vsel %vm7972_vm0, %v8216_v55, 0.0  ;;  %v2265_v53 = vadd.f32 %v2264_v52, %v2263_v22  ;;  %v2287_v58 = vsel %vm7972_vm0, %v8217_v6, 0.0 }
 0x4b7   : > { %v2307_v11 = vadd.f32 %v2306_v30, %v2305_v19  ;;  %v2327_v54 = vsel %vm7972_vm0, %v6918_v39, 0.0  ;;  %v2184_v23 = vrot.slane %v2183_v59, 4  ;;  %v2286_v61 = vadd.f32 %v2285_v42, %v2284_v16 }
 0x4b8   : > { %v2326_v9 = vadd.f32 %v2325_v8, %v2324_v51  ;;  %v2205_v24 = vrot.slane %v2204_v37, 4  ;;  %v2226_v0 = vrot.slane %v2225_v40, 4  ;;  %v2267_v35 = vadd.f32 %v2266_v57, %v2265_v53 }
 0x4b9   : > { %v2329_v34 = vsel %vm7972_vm0, %v6921_v26, 0.0  ;;  %v2247_v62 = vrot.slane %v2246_v41, 4  ;;  %v2288_v29 = vadd.f32 %v2287_v58, %v2286_v61  ;;  %v2308_v22 = vsel %vm7972_vm0, %v8218_v50, 0.0 }
 0x4ba   : > { %v2328_v3 = vadd.f32 %v2327_v54, %v2326_v9  ;;  %v2309_v44 = vadd.f32 %v2308_v22, %v2307_v11  ;;  %v2185_v52 = vadd.f32 %v2184_v23, %v2183_v59  ;;  %v2227_v19 = vadd.f32 %v2226_v0, %v2225_v40 }
 0x4bb   : > { %v2268_v39 = vrot.slane %v2267_v35, 4  ;;  %v2206_v6 = vadd.f32 %v2205_v24, %v2204_v37  ;;  %v2248_v16 = vadd.f32 %v2247_v62, %v2246_v41  ;;  %v2289_v51 = vrot.slane %v2288_v29, 4 }
 0x4bc   : > { %v2330_v30 = vadd.f32 %v2329_v34, %v2328_v3  ;;  %v2310_v8 = vrot.slane %v2309_v44, 4  ;;  %v2186_v42 = vrot.slane %v2185_v52, 2  ;;  %v2228_v53 = vrot.slane %v2227_v19, 2 }
 0x4bd   : > { %v2269_v43 = vadd.f32 %v2268_v39, %v2267_v35  ;;  %v2207_v26 = vrot.slane %v2206_v6, 2  ;;  %v2249_v5 = vrot.slane %v2248_v16, 2  ;;  %v2290_v58 = vadd.f32 %v2289_v51, %v2288_v29 }
 0x4be   : > { %v2331_v57 = vrot.slane %v2330_v30, 4  ;;  %v2311_v61 = vadd.f32 %v2310_v8, %v2309_v44  ;;  %v2187_v55 = vadd.f32 %v2186_v42, %v2185_v52  ;;  %v2229_v54 = vadd.f32 %v2228_v53, %v2227_v19 }
 0x4bf   : > { %v2270_v11 = vrot.slane %v2269_v43, 2  ;;  %v2208_v59 = vadd.f32 %v2207_v26, %v2206_v6  ;;  %v2250_v23 = vadd.f32 %v2249_v5, %v2248_v16  ;;  %v2291_v40 = vrot.slane %v2290_v58, 2 }
 0x4c0   : > { %v2332_v50 = vadd.f32 %v2331_v57, %v2330_v30  ;;  %v2312_v0 = vrot.slane %v2311_v61, 2  ;;  %v2188_v37 = vrot.slane %v2187_v55, 1  ;;  %v2230_v24 = vrot.slane %v2229_v54, 1 }
 0x4c1   : > { %v2271_v9 = vadd.f32 %v2270_v11, %v2269_v43  ;;  %v2209_v34 = vrot.slane %v2208_v59, 1  ;;  %v2251_v62 = vrot.slane %v2250_v23, 1  ;;  %v2292_v22 = vadd.f32 %v2291_v40, %v2290_v58 }
 0x4c2   : > { %v2333_v41 = vrot.slane %v2332_v50, 2  ;;  %v2313_v35 = vadd.f32 %v2312_v0, %v2311_v61  ;;  %v2189_v39 = vadd.f32 %v2188_v37, %v2187_v55  ;;  %v2231_v29 = vadd.f32 %v2230_v24, %v2229_v54 }
 0x4c3   : > { %v2272_v44 = vrot.slane %v2271_v9, 1  ;;  %v2210_v52 = vadd.f32 %v2209_v34, %v2208_v59  ;;  %v2252_v30 = vadd.f32 %v2251_v62, %v2250_v23  ;;  %v2293_v19 = vrot.slane %v2292_v22, 1 }
 0x4c4   : > { %v2334_v3 = vadd.f32 %v2333_v41, %v2332_v50  ;;  %v2314_v51 = vrot.slane %v2313_v35, 1  ;;  %v2337_v26 = vmul.f32 0.015625, %v2189_v39  ;;  %v2339_v6 = vmul.f32 0.015625, %v2231_v29 }
 0x4c5   : > { %v2273_v16 = vadd.f32 %v2272_v44, %v2271_v9  ;;  %v2338_v8 = vmul.f32 0.015625, %v2210_v52  ;;  %v2340_v42 = vmul.f32 0.015625, %v2252_v30  ;;  %v2294_v57 = vadd.f32 %v2293_v19, %v2292_v22  ;;  %v8219_v19 = vld [vmem:[#allocation57_spill] sm:$0xff] }
 0x4c6   : > { %v2335_v5 = vrot.slane %v2334_v3, 1  ;;  %v2315_v43 = vadd.f32 %v2314_v51, %v2313_v35  ;;  %v5250_v44 = vmov 1966171168  }
 0x4c7   : > { %v2521_v53 = vsel %vm1289_vm8, %v2338_v8, %v2337_v26  ;;  %v2341_v61 = vmul.f32 0.015625, %v2273_v16  ;;  %v2342_v50 = vmul.f32 0.015625, %v2294_v57  ;;  %v2662_v52 = vunpack.c.l.s4 %v5250_v44  ;;  %v8220_v57 = vld [vmem:[#allocation83_spill] sm:$0xff] }
 0x4c8   : > { %v2336_v58 = vadd.f32 %v2335_v5, %v2334_v3  ;;  %v2522_v55 = vsel %vm1291_vm10, %v2339_v6, %v2521_v53  ;;  %v2343_v11 = vmul.f32 0.015625, %v2315_v43 }
 0x4c9   : > { %v2523_v54 = vsel %vm1293_vm11, %v2340_v42, %v2522_v55  ;;  %v2663_v30 = vunpack.c.0.s8 %v2662_v52 }
 0x4ca   : > { %v2344_v59 = vmul.f32 0.015625, %v2336_v58  ;;  %v2524_v23 = vsel %vm7976_vm12, %v2341_v61, %v2523_v54  ;;  %vm8263_vm12 = vcmask 392512  }
 0x4cb   : > { %v2525_v40 = vsel %vm7975_vm13, %v2342_v50, %v2524_v23  ;;  %v2666_v51 = vsub.s32 %v2663_v30, %v8219_v19  ;;  %vm4291_vm13 = vcmask 1048512  }
 0x4cc   : > { %v2526_v0 = vsel %vm7974_vm14, %v2343_v11, %v2525_v40  ;;  %vm4284_vm14 = vcmask 982912  }
 0x4cd   : > { %v2527_v41 = vsel %vm7973_vm15, %v2344_v59, %v2526_v0  ;;  %vm4277_vm15 = vcmask 917312  }
 0x517   : > { %v2545_v37 = vpop.permute.xlu0 %2544 }
 0x518   : > { %v2547_v24 = vsel %vm7972_vm0, %v2527_v41, %v2545_v37 }
 0x519   : > { %v2548_v9 = vpack.c.bf16 %v2547_v24, %v2547_v24 }
 0x51b   : > { %4996 = vmatmul.mubr.bf16.vlgmr.msra.gmra.mrb[4].mxu1 %v2548_v9 }
 0x5ee   : > { %v2647_v34 = vpop.f32.mrb[4].mxu1 }
 0x5ef   : > { %v4685_v62 = vmul.f32 -1.442695, %v2647_v34  ;;  %v4997_v22 = vpop.f32.mrb[5].mxu1 }
 0x5f0   : > { %v2650_v35 = vpop.f32.mrb[6].mxu1 }
 0x5f1   : > { %5128 = vpow2.f32 %v4685_v62  ;;  %v4998_v39 = vpop.f32.mrb[7].mxu1 }
 0x5fb   : > { %v5129_v3 = vpop.eup %5128 }
 0x5fc   : > { %v2656_v29 = vadd.f32 1.0, %v5129_v3 }
 0x5fe   : > { %5130 = vrcp.f32 %v2656_v29 }
 0x608   : > { %v5131_v26 = vpop.eup %5130 }
 0x609   : > { %v2660_v5 = vcombine.high %v5131_v26, %v5131_v26  ;;  %v2667_v6 = vrot.slane %v5131_v26, %v2666_v51 }
 0x60b   : > { %v2674_v16 = vrot.slane %v2660_v5, %v2666_v51  ;;  %v2683_v8 = vrot.slane %v2667_v6, %v2666_v51  ;;  %v2675_v55 = vcombine.high %v2667_v6, %v2667_v6 }
 0x60d   : > { %v2676_v42 = vcombine.high %v2674_v16, %v2674_v16  ;;  %v2712_v43 = vrot.slane %v2683_v8, %v8220_v57  ;;  %v7083_v23 = vrot.slane %v2675_v55, %v2666_v51  ;;  %v2705_v37 = vcombine.high %v2683_v8, %v2683_v8 }
 0x60e   : > { %v7112_v3 = vrot.slane %v2674_v16, %v2666_v51 }
 0x60f   : > { %v7075_v53 = vrot.slane %v2676_v42, %v2666_v51  ;;  %v2750_v58 = vmul.f32 %v2712_v43, %v6526_v21  ;;  %v2749_v61 = vmul.f32 %v2712_v43, %v6530_v4  ;;  %v2752_v11 = vmul.f32 %v2712_v43, %v8193_v49  ;;  %v8221_v42 = vld [vmem:[#allocation8_spill] sm:$0xff] }
 0x610   : > { %v2751_v59 = vmul.f32 %v2712_v43, %v6557_v45  ;;  %v2754_v21 = vmul.f32 %v2712_v43, %v8204_v18  ;;  %v2753_v4 = vmul.f32 %v2712_v43, %v6653_v17  ;;  %v7091_v49 = vrot.slane %v7083_v23, %v8220_v57 }
 0x611   : > { %v2816_v50 = vsel %vm7972_vm0, %v2750_v58, 0.0  ;;  %v2813_v54 = vsel %vm7972_vm0, %v2749_v61, 0.0  ;;  %v2822_v40 = vsel %vm7972_vm0, %v2752_v11, 0.0  ;;  %v2756_v24 = vmul.f32 %v2712_v43, %v8208_v14 }
 0x612   : > { %2817 = vadd.xlane.f32.xlu0 %v2816_v50  ;;  %2814 = vadd.xlane.f32.xlu1 %v2813_v54  ;;  %v2819_v0 = vsel %vm7972_vm0, %v2751_v59, 0.0  ;;  %v2828_v45 = vsel %vm7972_vm0, %v2754_v21, 0.0  ;;  %v2825_v41 = vsel %vm7972_vm0, %v2753_v4, 0.0  ;;  %v2755_v9 = vmul.f32 %v2712_v43, %v6773_v10  ;;  %v8222_v50 = vld [vmem:[#allocation26_spill] sm:$0xff] }
 0x613   : > { %v7098_v18 = vrot.slane %v2705_v37, %v8220_v57  ;;  %v2834_v17 = vsel %vm7972_vm0, %v2756_v24, 0.0  ;;  %v2759_v62 = vmul.f32 %v7091_v49, %v6563_v31  ;;  %v2757_v22 = vmul.f32 %v7091_v49, %v6538_v38 }
 0x614   : > { %v2831_v34 = vsel %vm7972_vm0, %v2755_v9, 0.0  ;;  %v2758_v39 = vmul.f32 %v7091_v49, %v6534_v28  ;;  %v2760_v44 = vmul.f32 %v7091_v49, %v8191_v32  ;;  %v2761_v30 = vmul.f32 %v7091_v49, %v8197_v25  ;;  %v8224_v9 = vld [vmem:[#allocation38_spill] sm:$0xff] }
 0x615   : > { %v2843_v14 = vsel %vm7972_vm0, %v2759_v62, 0.0  ;;  %v2837_v10 = vsel %vm7972_vm0, %v2757_v22, 0.0  ;;  %v2765_v35 = vmul.f32 %v7098_v18, %v6553_v2  ;;  %v2767_v29 = vmul.f32 %v7098_v18, %v6567_v56  ;;  %v8226_v22 = vld [vmem:[#allocation84_spill] sm:$0xff] }
 0x616   : > { %2823 = vadd.xlane.f32.xlu0 %v2822_v40  ;;  %2820 = vadd.xlane.f32.xlu1 %v2819_v0  ;;  %v2840_v38 = vsel %vm7972_vm0, %v2758_v39, 0.0  ;;  %v2728_v2 = vrot.slane %v7112_v3, %v8220_v57  ;;  %v2846_v52 = vsel %vm7972_vm0, %v2760_v44, 0.0  ;;  %v2766_v51 = vmul.f32 %v7098_v18, %v6541_v20 }
 0x617   : > { %v2861_v31 = vsel %vm7972_vm0, %v2765_v35, 0.0  ;;  %v2867_v28 = vsel %vm7972_vm0, %v2767_v29, 0.0  ;;  %v2849_v56 = vsel %vm7972_vm0, %v2761_v30, 0.0  ;;  %v2768_v26 = vmul.f32 %v7098_v18, %v8195_v48  ;;  %v8228_v29 = vld [vmem:[#allocation12_spill] sm:$0xff] }
 0x618   : > { %v2864_v32 = vsel %vm7972_vm0, %v2766_v51, 0.0  ;;  %v2781_v5 = vmul.f32 %v2728_v2, %v8189_v36  ;;  %v2762_v20 = vmul.f32 %v7091_v49, %v8203_v47  ;;  %v2769_v16 = vmul.f32 %v7098_v18, %v8199_v63 }
 0x619   : > { %v2870_v6 = vsel %vm7972_vm0, %v2768_v26, 0.0  ;;  %v2782_v36 = vmul.f32 %v2728_v2, %v8192_v1  ;;  %v2783_v43 = vmul.f32 %v2728_v2, %v8221_v42  ;;  %v2770_v47 = vmul.f32 %v7098_v18, %v6741_v13  ;;  %v8234_v42 = vld [vmem:[#allocation17_spill] sm:$0xff] }
 0x61a   : > { %2829 = vadd.xlane.f32.xlu0 %v2828_v45  ;;  %2826 = vadd.xlane.f32.xlu1 %v2825_v41  ;;  %v2909_v25 = vsel %vm7972_vm0, %v2781_v5, 0.0  ;;  %v2852_v8 = vsel %vm7972_vm0, %v2762_v20, 0.0  ;;  %v2873_v48 = vsel %vm7972_vm0, %v2769_v16, 0.0  ;;  %v2763_v63 = vmul.f32 %v7091_v49, %v6763_v15  ;;  %v8223_v45 = vld [vmem:[#allocation82_spill] sm:$0xff]  ;;  %v8233_v16 = vld [vmem:[#allocation15_spill] sm:$0xff] }
 0x61b   : > { %v2912_v58 = vsel %vm7972_vm0, %v2782_v36, 0.0  ;;  %v2915_v61 = vsel %vm7972_vm0, %v2783_v43, 0.0  ;;  %v2876_v55 = vsel %vm7972_vm0, %v2770_v47, 0.0  ;;  %v2784_v54 = vmul.f32 %v2728_v2, %v8222_v50  ;;  %v8237_v50 = vld [vmem:[#allocation23_spill] sm:$0xff] }
 0x61c   : > { %v2855_v1 = vsel %vm7972_vm0, %v2763_v63, 0.0  ;;  %v2771_v11 = vmul.f32 %v7098_v18, %v8207_v60  ;;  %v2707_v59 = vcombine.high %v7083_v23, %v7083_v23  ;;  %v2764_v40 = vmul.f32 %v7091_v49, %v6814_v46 }
 0x61d   : > { %v2918_v13 = vsel %vm7972_vm0, %v2784_v54, 0.0  ;;  %v2785_v0 = vmul.f32 %v2728_v2, %v6759_v27  ;;  %v2772_v23 = vmul.f32 %v7098_v18, %v8210_v7  ;;  %v2787_v37 = vmul.f32 %v2728_v2, %v8212_v33 }
 0x61e   : > { %2835 = vadd.xlane.f32.xlu0 %v2834_v17  ;;  %2832 = vadd.xlane.f32.xlu1 %v2831_v34  ;;  %v2879_v15 = vsel %vm7972_vm0, %v2771_v11, 0.0  ;;  %v7162_v21 = vrot.slane %v2707_v59, %v8220_v57  ;;  %v2858_v60 = vsel %vm7972_vm0, %v2764_v40, 0.0  ;;  %v2786_v49 = vmul.f32 %v2728_v2, %v6810_v12  ;;  %v8225_v17 = vld [vmem:[#allocation11_spill] sm:$0xff]  ;;  %v8239_v40 = vld [vmem:[#allocation33_spill] sm:$0xff] }
 0x61f   : > { %v2921_v4 = vsel %vm7972_vm0, %v2785_v0, 0.0  ;;  %v2882_v46 = vsel %vm7972_vm0, %v2772_v23, 0.0  ;;  %v2927_v27 = vsel %vm7972_vm0, %v2787_v37, 0.0  ;;  %v7176_v24 = vrot.slane %v7075_v53, %v8220_v57  ;;  %v8240_v23 = vld [vmem:[#allocation29_spill] sm:$0xff] }
 0x620   : > { %v2773_v41 = vmul.f32 %v7162_v21, %v8223_v45  ;;  %v2924_v7 = vsel %vm7972_vm0, %v2786_v49, 0.0  ;;  %v2788_v18 = vmul.f32 %v2728_v2, %v8224_v9  ;;  %v2775_v34 = vmul.f32 %v7162_v21, %v8225_v17  ;;  %v8229_v2 = vld [vmem:[#allocation25_spill] sm:$0xff]  ;;  %v8243_v9 = vld [vmem:[#allocation27_spill] sm:$0xff] }
 0x621   : > { %v2706_v39 = vcombine.high %v7112_v3, %v7112_v3  ;;  %v2776_v44 = vmul.f32 %v7162_v21, %v8228_v29  ;;  %v2792_v43 = vmul.f32 %v7176_v24, %v8234_v42  ;;  %v2779_v54 = vmul.f32 %v7162_v21, %v8237_v50  ;;  %v8254_v42 = vld [vmem:[#allocation34_spill] sm:$0xff] }
 0x622   : > { %2844 = vadd.xlane.f32.xlu1 %v2843_v14  ;;  %2838 = vadd.xlane.f32.xlu0 %v2837_v10  ;;  %v2885_v33 = vsel %vm7972_vm0, %v2773_v41, 0.0  ;;  %v2930_v12 = vsel %vm7972_vm0, %v2788_v18, 0.0  ;;  %v2891_v62 = vsel %vm7972_vm0, %v2775_v34, 0.0  ;;  %v2774_v14 = vmul.f32 %v7162_v21, %v8226_v22  ;;  %v8227_v10 = vld [vmem:[#allocation14_spill] sm:$0xff] }
 0x623   : > { %v2789_v35 = vmul.f32 %v7176_v24, %v8227_v10  ;;  %v2894_v30 = vsel %vm7972_vm0, %v2776_v44, 0.0  ;;  %v2942_v47 = vsel %vm7972_vm0, %v2792_v43, 0.0  ;;  %v2903_v59 = vsel %vm7972_vm0, %v2779_v54, 0.0 }
 0x624   : > { %v2793_v0 = vmul.f32 %v7176_v24, %v8239_v40  ;;  %v2780_v37 = vmul.f32 %v7162_v21, %v8240_v23  ;;  %v2708_v49 = vcombine.high %v7075_v53, %v7075_v53  ;;  %v2795_v18 = vmul.f32 %v7176_v24, %v8243_v9 }
 0x626   : > { %2862 = vadd.xlane.f32.xlu1 %v2861_v31  ;;  %2841 = vadd.xlane.f32.xlu0 %v2840_v38  ;;  %v2888_v31 = vsel %vm7972_vm0, %v2774_v14, 0.0  ;;  %v2933_v38 = vsel %vm7972_vm0, %v2789_v35, 0.0  ;;  %v2906_v45 = vsel %vm7972_vm0, %v2780_v37, 0.0  ;;  %v2951_v34 = vsel %vm7972_vm0, %v2795_v18, 0.0  ;;  %v8246_v35 = vld [vmem:[#allocation49_spill] sm:$0xff] }
 0x62a   : > { %2868 = vadd.xlane.f32.xlu1 %v2867_v28  ;;  %2847 = vadd.xlane.f32.xlu0 %v2846_v52  ;;  %v2777_v28 = vmul.f32 %v7162_v21, %v8229_v2  ;;  %v2736_v52 = vrot.slane %v2706_v39, %v8220_v57  ;;  %v2796_v39 = vmul.f32 %v7176_v24, %v8246_v35  ;;  %v8248_v2 = vld [vmem:[#allocation55_spill] sm:$0xff] }
 0x62b   : > { %v8257_v35 = vld [vmem:[#allocation59_spill] sm:$0xff] }
 0x62c   : > { %v2897_v51 = vsel %vm7972_vm0, %v2777_v28, 0.0  ;;  %v2954_v29 = vsel %vm7972_vm0, %v2796_v39, 0.0  ;;  %v2804_v28 = vmul.f32 %v2736_v52, %v8248_v2 }
 0x62e   : > { %2850 = vadd.xlane.f32.xlu1 %v2849_v56  ;;  %2865 = vadd.xlane.f32.xlu0 %v2864_v32  ;;  %v8230_v56 = vld [vmem:[#allocation10_spill] sm:$0xff]  ;;  %v8231_v32 = vld [vmem:[#allocation20_spill] sm:$0xff] }
 0x62f   : > { %v2790_v3 = vmul.f32 %v7176_v24, %v8230_v56  ;;  %v2791_v26 = vmul.f32 %v7176_v24, %v8231_v32  ;;  %v2978_v56 = vsel %vm7972_vm0, %v2804_v28, 0.0  ;;  %v8250_v32 = vld [vmem:[#allocation22_spill] sm:$0xff] }
 0x631   : > { %v2936_v5 = vsel %vm7972_vm0, %v2790_v3, 0.0 }
 0x632   : > { %2871 = vadd.xlane.f32.xlu0 %v2870_v6  ;;  %2910 = vadd.xlane.f32.xlu1 %v2909_v25  ;;  %v2939_v6 = vsel %vm7972_vm0, %v2791_v26, 0.0  ;;  %v8232_v25 = vld [vmem:[#allocation39_spill] sm:$0xff]  ;;  %v8251_v26 = vld [vmem:[#allocation36_spill] sm:$0xff] }
 0x633   : > { %v2778_v20 = vmul.f32 %v7162_v21, %v8232_v25  ;;  %v2740_v21 = vrot.slane %v2708_v49, %v8220_v57 }
 0x635   : > { %v2810_v43 = vmul.f32 %v2740_v21, %v8254_v42 }
 0x636   : > { %2853 = vadd.xlane.f32.xlu0 %v2852_v8  ;;  %2874 = vadd.xlane.f32.xlu1 %v2873_v48  ;;  %v2797_v8 = vmul.f32 %v2736_v52, %v8233_v16  ;;  %v2900_v48 = vsel %vm7972_vm0, %v2778_v20, 0.0  ;;  %v8252_v20 = vld [vmem:[#allocation35_spill] sm:$0xff]  ;;  %v8253_v16 = vld [vmem:[#allocation46_spill] sm:$0xff] }
 0x638   : > { %v2957_v36 = vsel %vm7972_vm0, %v2797_v8, 0.0  ;;  %v2811_v8 = vmul.f32 %v2740_v21, %v8253_v16 }
 0x63a   : > { %2913 = vadd.xlane.f32.xlu0 %v2912_v58  ;;  %2916 = vadd.xlane.f32.xlu1 %v2915_v61  ;;  %v8235_v58 = vld [vmem:[#allocation32_spill] sm:$0xff] }
 0x63b   : > { %v2799_v61 = vmul.f32 %v2736_v52, %v8235_v58  ;;  %v2996_v58 = vsel %vm7972_vm0, %v2810_v43, 0.0 }
 0x63d   : > { %v2963_v63 = vsel %vm7972_vm0, %v2799_v61, 0.0  ;;  %v8255_v61 = vld [vmem:[#allocation43_spill] sm:$0xff] }
 0x63e   : > { %2877 = vadd.xlane.f32.xlu0 %v2876_v55  ;;  %2856 = vadd.xlane.f32.xlu1 %v2855_v1  ;;  %v8236_v55 = vld [vmem:[#allocation13_spill] sm:$0xff] }
 0x63f   : > { %v2798_v1 = vmul.f32 %v2736_v52, %v8236_v55  ;;  %v8256_v55 = vld [vmem:[#allocation56_spill] sm:$0xff] }
 0x640   : > { %v4239_v50 = vadd.s32 4294967232, %v8256_v55  ;;  %v4258_v54 = vadd.s32 4294967208, %v8256_v55  ;;  %v4251_v40 = vadd.s32 4294967216, %v8256_v55  ;;  %v4272_v23 = vadd.s32 4294967192, %v8256_v55 }
 0x641   : > { %v2960_v11 = vsel %vm7972_vm0, %v2798_v1, 0.0  ;;  %v4244_v1 = vadd.s32 4294967224, %v8256_v55  ;;  %v4265_v49 = vadd.s32 4294967200, %v8256_v55 }
 0x642   : > { %2919 = vadd.xlane.f32.xlu0 %v2918_v13  ;;  %2880 = vadd.xlane.f32.xlu1 %v2879_v15  ;;  %v8238_v13 = vld [vmem:[#allocation31_spill] sm:$0xff] }
 0x643   : > { %v2800_v15 = vmul.f32 %v2736_v52, %v8238_v13 }
 0x646   : > { %2859 = vadd.xlane.f32.xlu0 %v2858_v60  ;;  %2922 = vadd.xlane.f32.xlu1 %v2921_v4  ;;  %v2966_v60 = vsel %vm7972_vm0, %v2800_v15, 0.0  ;;  %v2945_v4 = vsel %vm7972_vm0, %v2793_v0, 0.0 }
 0x64a   : > { %2883 = vadd.xlane.f32.xlu0 %v2882_v46  ;;  %2928 = vadd.xlane.f32.xlu1 %v2927_v27  ;;  %v8241_v46 = vld [vmem:[#allocation48_spill] sm:$0xff] }
 0x64b   : > { %v2801_v27 = vmul.f32 %v2736_v52, %v8241_v46 }
 0x64d   : > { %v2969_v41 = vsel %vm7972_vm0, %v2801_v27, 0.0 }
 0x64e   : > { %2925 = vadd.xlane.f32.xlu0 %v2924_v7  ;;  %2886 = vadd.xlane.f32.xlu1 %v2885_v33  ;;  %v8242_v7 = vld [vmem:[#allocation28_spill] sm:$0xff] }
 0x64f   : > { %v2794_v33 = vmul.f32 %v7176_v24, %v8242_v7  ;;  %v2806_v24 = vmul.f32 %v2740_v21, %v8250_v32 }
 0x651   : > { %v2948_v17 = vsel %vm7972_vm0, %v2794_v33, 0.0 }
 0x652   : > { %2931 = vadd.xlane.f32.xlu0 %v2930_v12  ;;  %2892 = vadd.xlane.f32.xlu1 %v2891_v62  ;;  %v8244_v12 = vld [vmem:[#allocation47_spill] sm:$0xff]  ;;  %v8245_v62 = vld [vmem:[#allocation45_spill] sm:$0xff] }
 0x653   : > { %v2802_v53 = vmul.f32 %v2736_v52, %v8244_v12  ;;  %v2803_v22 = vmul.f32 %v2736_v52, %v8245_v62  ;;  %v2808_v52 = vmul.f32 %v2740_v21, %v8252_v20  ;;  %v5068_v12 = vld [vmem:[#allocation2] ss:$16 sps:$4 sm:$0xff]  }
 0x654   : > { %v5071_v20 = vld [vmem:[#allocation2 + $0x20] ss:$16 sps:$4 sm:$0xff]  }
 0x655   : > { %v2972_v14 = vsel %vm7972_vm0, %v2802_v53, 0.0  ;;  %v2975_v10 = vsel %vm7972_vm0, %v2803_v22, 0.0  ;;  %v5070_v53 = vld [vmem:[#allocation2 + $0x4] ss:$16 sps:$4 sm:$0xff]   ;;  %v7289_v22 = vsub.s32 %v4272_v23, %v8219_v19 }
 0x656   : > { %2889 = vadd.xlane.f32.xlu0 %v2888_v31  ;;  %2934 = vadd.xlane.f32.xlu1 %v2933_v38  ;;  %v8247_v31 = vld [vmem:[#allocation30_spill] sm:$0xff] }
 0x657   : > { %v2805_v38 = vmul.f32 %v2740_v21, %v8247_v31  ;;  %v8258_v31 = vld [vmem:[#allocation60_spill] sm:$0xff]  ;;  %3638 = vmatprep.subr.bf16.mxu0 %v5070_v53 }
 0x658   : > { %3639 = vmatpush1.bf16.msra.mxu0 %v5068_v12 }
 0x659   : > { %v2981_v44 = vsel %vm7972_vm0, %v2805_v38, 0.0 }
 0x65a   : > { %2895 = vadd.xlane.f32.xlu0 %v2894_v30  ;;  %2898 = vadd.xlane.f32.xlu1 %v2897_v51  ;;  %v8249_v30 = vld [vmem:[#allocation50_spill] sm:$0xff] }
 0x65b   : > { %v2807_v51 = vmul.f32 %v2740_v21, %v8249_v30 }
 0x65d   : > { %v2987_v3 = vsel %vm7972_vm0, %v2807_v51, 0.0 }
 0x65e   : > { %2937 = vadd.xlane.f32.xlu0 %v2936_v5  ;;  %2940 = vadd.xlane.f32.xlu1 %v2939_v6  ;;  %v2809_v5 = vmul.f32 %v2740_v21, %v8251_v26  ;;  %v2984_v6 = vsel %vm7972_vm0, %v2806_v24, 0.0 }
 0x660   : > { %v2993_v25 = vsel %vm7972_vm0, %v2809_v5, 0.0 }
 0x662   : > { %2901 = vadd.xlane.f32.xlu0 %v2900_v48  ;;  %2958 = vadd.xlane.f32.xlu1 %v2957_v36  ;;  %v2990_v48 = vsel %vm7972_vm0, %v2808_v52, 0.0  ;;  %v2999_v36 = vsel %vm7972_vm0, %v2811_v8, 0.0  ;;  %v5073_v52 = vld [vmem:[#allocation2 + $0x24] ss:$16 sps:$4 sm:$0xff]   ;;  %v8259_v8 = vld [vmem:[#allocation61_spill] sm:$0xff] }
 0x663   : > { %3640 = vmatprep.subr.bf16.mxu0 %v5073_v52 }
 0x664   : > { %3641 = vmatpush1.bf16.msra.mxu0 %v5071_v20 }
 0x666   : > { %2943 = vadd.xlane.f32.xlu0 %v2942_v47  ;;  %2964 = vadd.xlane.f32.xlu1 %v2963_v63  ;;  %v2812_v47 = vmul.f32 %v2740_v21, %v8255_v61 }
 0x668   : > { %v3002_v63 = vsel %vm7972_vm0, %v2812_v47, 0.0  ;;  %vm4270_vm0 = vcmask 851712   ;;  %v5076_v47 = vld [vmem:[#allocation2 + $0x44] ss:$16 sps:$4 sm:$0xff]  }
 0x669   : > { %3642 = vmatprep.subr.bf16.mxu0 %v5076_v47 }
 0x66a   : > { %2961 = vadd.xlane.f32.xlu0 %v2960_v11  ;;  %2904 = vadd.xlane.f32.xlu1 %v2903_v59  ;;  %v7269_v11 = vsub.s32 %v4244_v1, %v8219_v19  ;;  %v7272_v59 = vsub.s32 %v4239_v50, %v8219_v19 }
 0x66e   : > { %2967 = vadd.xlane.f32.xlu0 %v2966_v60  ;;  %2946 = vadd.xlane.f32.xlu1 %v2945_v4  ;;  %v7276_v4 = vsub.s32 %v4258_v54, %v8219_v19 }
 0x672   : > { %2907 = vadd.xlane.f32.xlu0 %v2906_v45  ;;  %2970 = vadd.xlane.f32.xlu1 %v2969_v41  ;;  %v7283_v41 = vsub.s32 %v4251_v40, %v8219_v19  ;;  %v5074_v40 = vld [vmem:[#allocation2 + $0x40] ss:$16 sps:$4 sm:$0xff]  }
 0x673   : > { %3643 = vmatpush1.bf16.msra.mxu0 %v5074_v40 }
 0x676   : > { %2949 = vadd.xlane.f32.xlu0 %v2948_v17  ;;  %2952 = vadd.xlane.f32.xlu1 %v2951_v34  ;;  %v4286_v34 = vadd.s32 4294967176, %v8256_v55 }
 0x678   : > { %v7300_v24 = vsub.s32 %v4286_v34, %v8219_v19 }
 0x67a   : > { %2973 = vadd.xlane.f32.xlu0 %v2972_v14  ;;  %2976 = vadd.xlane.f32.xlu1 %v2975_v10  ;;  %v7292_v14 = vsub.s32 %v4265_v49, %v8219_v19  ;;  %v4279_v10 = vadd.s32 4294967184, %v8256_v55  ;;  %v5079_v49 = vld [vmem:[#allocation2 + $0x64] ss:$16 sps:$4 sm:$0xff]  }
 0x67b   : > { %3644 = vmatprep.subr.bf16.mxu0 %v5079_v49 }
 0x67e   : > { %2955 = vadd.xlane.f32.xlu0 %v2954_v29  ;;  %2982 = vadd.xlane.f32.xlu1 %v2981_v44 }
 0x682   : > { %2979 = vadd.xlane.f32.xlu0 %v2978_v56  ;;  %2988 = vadd.xlane.f32.xlu1 %v2987_v3 }
 0x686   : > { %2985 = vadd.xlane.f32.xlu0 %v2984_v6  ;;  %2994 = vadd.xlane.f32.xlu1 %v2993_v25 }
 0x68a   : > { %2991 = vadd.xlane.f32.xlu0 %v2990_v48  ;;  %3000 = vadd.xlane.f32.xlu1 %v2999_v36  ;;  %v8260_v36 = vld [vmem:[#allocation62_spill] sm:$0xff] }
 0x68e   : > { %2997 = vadd.xlane.f32.xlu0 %v2996_v58  ;;  %v7309_v58 = vsub.s32 %v4279_v10, %v8219_v19 }
 0x692   : > { %3003 = vadd.xlane.f32.xlu0 %v3002_v63 }
 0x69f   : > { %v2818_v13 = vpop.xlane.xlu0 %2817  ;;  %v2815_v15 = vpop.xlane.xlu1 %2814 }
 0x6a0   : > { %v3006_v0 = vmul.f32 0.015625, %v2818_v13  ;;  %v3005_v60 = vmul.f32 0.015625, %v2815_v15 }
 0x6a2   : > { %v4248_v37 = vrot.slane %v3006_v0, %v7269_v11  ;;  %v3069_v46 = vpack.c.bf16 %v3006_v0, %v3005_v60  ;;  %v4243_v27 = vrot.slane %v3005_v60, %v7272_v59  ;;  %v8261_v60 = vld [vmem:[#allocation68_spill] sm:$0xff] }
 0x6a3   : > { %v2824_v45 = vpop.xlane.xlu0 %2823  ;;  %v2821_v7 = vpop.xlane.xlu1 %2820 }
 0x6a4   : > { %v3171_v33 = vunpack.c.l.b16 %v3069_v46  ;;  %v3172_v9 = vunpack.c.h.b16 %v3069_v46  ;;  %v4250_v18 = vsel %vm4249_vm5, %v4248_v37, %v4243_v27  ;;  %v3008_v21 = vmul.f32 0.015625, %v2824_v45  ;;  %v8262_v37 = vld [vmem:[#allocation72_spill] sm:$0xff] }
 0x6a5   : > { %v3007_v17 = vmul.f32 0.015625, %v2821_v7 }
 0x6a6   : > { %v4262_v62 = vrot.slane %v3008_v21, %v7276_v4  ;;  %v3238_v39 = vrot.slane %v3171_v33, %v8257_v35  ;;  %v3242_v38 = vrot.slane %v3172_v9, %v8258_v31 }
 0x6a7   : > { %v3070_v29 = vpack.c.bf16 %v3008_v21, %v3007_v17  ;;  %v4255_v44 = vrot.slane %v3007_v17, %v7283_v41  ;;  %v2830_v2 = vpop.xlane.xlu0 %2829  ;;  %v2827_v28 = vpop.xlane.xlu1 %2826 }
 0x6a8   : > { %v3010_v30 = vmul.f32 0.015625, %v2830_v2  ;;  %v3009_v51 = vmul.f32 0.015625, %v2827_v28  ;;  %v3243_v16 = vsel %vm972_vm1, %v3242_v38, %v3238_v39  ;;  %v5082_v38 = vld [vmem:[#allocation2 + $0xc] ss:$16 sps:$4 sm:$0xff]  }
 0x6a9   : > { %v3173_v56 = vunpack.c.l.b16 %v3070_v29  ;;  %v3174_v3 = vunpack.c.h.b16 %v3070_v29  ;;  %v4257_v32 = vsel %vm4256_vm7, %v4255_v44, %v4250_v18  ;;  %v5251_v18 = vmov 0   ;;  %v8264_v29 = vld [vmem:[#allocation80_spill] sm:$0xff]  ;;  %v8265_v2 = vld [vmem:[#allocation81_spill] sm:$0xff] }
 0x6aa   : > { %v4276_v26 = vrot.slane %v3010_v30, %v7289_v22  ;;  %v4264_v5 = vsel %vm4263_vm9, %v4262_v62, %v4257_v32  ;;  %v3071_v6 = vpack.c.bf16 %v3010_v30, %v3009_v51  ;;  %v4269_v25 = vrot.slane %v3009_v51, %v7292_v14  ;;  %3670 = vmatprep.mubr.bf16.mxu0 %v5251_v18  ;;  %v5077_v62 = vld [vmem:[#allocation2 + $0x60] ss:$16 sps:$4 sm:$0xff]  }
 0x6ab   : > { %v3247_v48 = vrot.slane %v3173_v56, %v8259_v8  ;;  %v3252_v42 = vrot.slane %v3174_v3, %v8260_v36  ;;  %v2836_v43 = vpop.xlane.xlu0 %2835  ;;  %v2833_v61 = vpop.xlane.xlu1 %2832  ;;  %3645 = vmatpush1.bf16.msra.mxu0 %v5077_v62 }
 0x6ac   : > { %v3175_v63 = vunpack.c.l.b16 %v3071_v6  ;;  %v3176_v55 = vunpack.c.h.b16 %v3071_v6  ;;  %v4271_v1 = vsel %vm4270_vm0, %v4269_v25, %v4264_v5  ;;  %v3012_v50 = vmul.f32 0.015625, %v2836_v43  ;;  %3679 = vmatprep.subr.bf16.mxu0 %v5082_v38 }
 0x6ad   : > { %v3248_v54 = vsel %vm979_vm2, %v3247_v48, %v3243_v16  ;;  %v4278_v13 = vsel %vm4277_vm15, %v4276_v26, %v4271_v1  ;;  %v3011_v15 = vmul.f32 0.015625, %v2833_v61 }
 0x6ae   : > { %v3253_v0 = vsel %vm986_vm3, %v3252_v42, %v3248_v54  ;;  %v3257_v23 = vrot.slane %v3175_v63, %v8261_v60  ;;  %v3262_v46 = vrot.slane %v3176_v55, %v8262_v37  ;;  %v4290_v27 = vrot.slane %v3012_v50, %v7300_v24 }
 0x6af   : > { %v3072_v45 = vpack.c.bf16 %v3012_v50, %v3011_v15  ;;  %v4283_v7 = vrot.slane %v3011_v15, %v7309_v58  ;;  %v2845_v33 = vpop.xlane.xlu1 %2844  ;;  %v2839_v9 = vpop.xlane.xlu0 %2838 }
 0x6b0   : > { %v3258_v21 = vsel %vm993_vm4, %v3257_v23, %v3253_v0  ;;  %v3013_v39 = vmul.f32 0.015625, %v2839_v9  ;;  %v3015_v30 = vmul.f32 0.015625, %v2845_v33 }
 0x6b1   : > { %v3263_v17 = vsel %vm8263_vm12, %v3262_v46, %v3258_v21  ;;  %v3177_v34 = vunpack.c.l.b16 %v3072_v45  ;;  %v3178_v12 = vunpack.c.h.b16 %v3072_v45  ;;  %v4285_v53 = vsel %vm4284_vm14, %v4283_v7, %v4278_v13 }
 0x6b2   : > { %v7324_v10 = vsel %vm4291_vm13, %v4290_v27, %v4285_v53  ;;  %vm8266_vm12 = vcmask 523712   ;;  %v4296_v5 = vrot.slane %v3013_v39, %v7272_v59  ;;  %v4305_v20 = vrot.slane %v3015_v30, %v7283_v41 }
 0x6b3   : > { %v3267_v44 = vrot.slane %v3177_v34, %v8264_v29  ;;  %v3272_v28 = vrot.slane %v3178_v12, %v8265_v2  ;;  %v2863_v51 = vpop.xlane.xlu1 %2862  ;;  %v2842_v56 = vpop.xlane.xlu0 %2841 }
 0x6b4   : > { %v3014_v3 = vmul.f32 0.015625, %v2842_v56  ;;  %v3021_v63 = vmul.f32 0.015625, %v2863_v51 }
 0x6b5   : > { %v3268_v32 = vsel %vm1007_vm6, %v3267_v44, %v3263_v17 }
 0x6b6   : > { %v7330_v26 = vsel %vm8266_vm12, %v3272_v28, %v3268_v32  ;;  %v3073_v6 = vpack.c.bf16 %v3014_v3, %v3013_v39  ;;  %v4300_v25 = vrot.slane %v3014_v3, %v7269_v11  ;;  %v4335_v45 = vrot.slane %v3021_v63, %v7272_v59 }
 0x6b7   : > { %v2869_v52 = vpop.xlane.xlu1 %2868  ;;  %v2848_v16 = vpop.xlane.xlu0 %2847  ;;  %vm8267_vm12 = vcmask 392512  }
 0x6b8   : > { %v3179_v48 = vunpack.c.l.b16 %v3073_v6  ;;  %v3180_v42 = vunpack.c.h.b16 %v3073_v6  ;;  %v4301_v43 = vsel %vm4249_vm5, %v4300_v25, %v4296_v5  ;;  %v3016_v47 = vmul.f32 0.015625, %v2848_v16 }
 0x6b9   : > { %v4306_v61 = vsel %vm4256_vm7, %v4305_v20, %v4301_v43  ;;  %v3023_v55 = vmul.f32 0.015625, %v2869_v52 }
 0x6ba   : > { %v3277_v1 = vrot.slane %v3179_v48, %v8257_v35  ;;  %v3281_v50 = vrot.slane %v3180_v42, %v8258_v31  ;;  %v3074_v54 = vpack.c.bf16 %v3016_v47, %v3015_v30  ;;  %v4310_v13 = vrot.slane %v3016_v47, %v7276_v4 }
 0x6bb   : > { %v2851_v15 = vpop.xlane.xlu1 %2850  ;;  %v2866_v40 = vpop.xlane.xlu0 %2865  ;;  %v4344_v17 = vrot.slane %v3023_v55, %v7283_v41 }
 0x6bc   : > { %v3017_v0 = vmul.f32 0.015625, %v2851_v15  ;;  %v3022_v23 = vmul.f32 0.015625, %v2866_v40  ;;  %v3181_v46 = vunpack.c.l.b16 %v3074_v54  ;;  %v3182_v27 = vunpack.c.h.b16 %v3074_v54 }
 0x6bd   : > { %v4311_v49 = vsel %vm4263_vm9, %v4310_v13, %v4306_v61  ;;  %v3282_v21 = vsel %vm972_vm1, %v3281_v50, %v3277_v1 }
 0x6be   : > { %v4315_v7 = vrot.slane %v3017_v0, %v7292_v14  ;;  %v3077_v33 = vpack.c.bf16 %v3022_v23, %v3021_v63  ;;  %v4339_v9 = vrot.slane %v3022_v23, %v7269_v11  ;;  %v3286_v34 = vrot.slane %v3181_v46, %v8259_v8 }
 0x6bf   : > { %v3291_v12 = vrot.slane %v3182_v27, %v8260_v36  ;;  %v2872_v53 = vpop.xlane.xlu0 %2871  ;;  %v2911_v62 = vpop.xlane.xlu1 %2910 }
 0x6c0   : > { %v4316_v39 = vsel %vm4270_vm0, %v4315_v7, %v4311_v49  ;;  %v3187_v38 = vunpack.c.l.b16 %v3077_v33  ;;  %v3188_v44 = vunpack.c.h.b16 %v3077_v33  ;;  %v4340_v28 = vsel %vm4249_vm5, %v4339_v9, %v4335_v45 }
 0x6c1   : > { %v3287_v30 = vsel %vm979_vm2, %v3286_v34, %v3282_v21  ;;  %v4345_v51 = vsel %vm4256_vm7, %v4344_v17, %v4340_v28  ;;  %v3024_v56 = vmul.f32 0.015625, %v2872_v53  ;;  %v3037_v13 = vmul.f32 0.015625, %v2911_v62 }
 0x6c2   : > { %v3292_v3 = vsel %vm986_vm3, %v3291_v12, %v3287_v30  ;;  %v3316_v32 = vrot.slane %v3187_v38, %v8257_v35  ;;  %v3320_v5 = vrot.slane %v3188_v44, %v8258_v31 }
 0x6c3   : > { %v3078_v6 = vpack.c.bf16 %v3024_v56, %v3023_v55  ;;  %v4349_v25 = vrot.slane %v3024_v56, %v7276_v4  ;;  %v2854_v20 = vpop.xlane.xlu0 %2853  ;;  %v2875_v52 = vpop.xlane.xlu1 %2874  ;;  %v4413_v17 = vrot.slane %v3037_v13, %v7272_v59 }
 0x6c4   : > { %v3018_v16 = vmul.f32 0.015625, %v2854_v20  ;;  %v3025_v48 = vmul.f32 0.015625, %v2875_v52  ;;  %v3321_v50 = vsel %vm972_vm1, %v3320_v5, %v3316_v32 }
 0x6c5   : > { %v3189_v42 = vunpack.c.l.b16 %v3078_v6  ;;  %v3190_v43 = vunpack.c.h.b16 %v3078_v6  ;;  %v4350_v61 = vsel %vm4263_vm9, %v4349_v25, %v4345_v51 }
 0x6c6   : > { %v3075_v47 = vpack.c.bf16 %v3018_v16, %v3017_v0  ;;  %v4320_v63 = vrot.slane %v3018_v16, %v7289_v22  ;;  %v4354_v1 = vrot.slane %v3025_v48, %v7292_v14 }
 0x6c7   : > { %v3325_v54 = vrot.slane %v3189_v42, %v8259_v8  ;;  %v3330_v55 = vrot.slane %v3190_v43, %v8260_v36  ;;  %v2914_v15 = vpop.xlane.xlu0 %2913  ;;  %v2917_v40 = vpop.xlane.xlu1 %2916 }
 0x6c8   : > { %v3183_v23 = vunpack.c.l.b16 %v3075_v47  ;;  %v3184_v46 = vunpack.c.h.b16 %v3075_v47  ;;  %v4321_v27 = vsel %vm4277_vm15, %v4320_v63, %v4316_v39  ;;  %v4355_v49 = vsel %vm4270_vm0, %v4354_v1, %v4350_v61 }
 0x6c9   : > { %v3326_v0 = vsel %vm979_vm2, %v3325_v54, %v3321_v50  ;;  %v3038_v45 = vmul.f32 0.015625, %v2914_v15  ;;  %v3039_v7 = vmul.f32 0.015625, %v2917_v40 }
 0x6ca   : > { %v3331_v33 = vsel %vm986_vm3, %v3330_v55, %v3326_v0  ;;  %v3296_v9 = vrot.slane %v3183_v23, %v8261_v60  ;;  %v3301_v21 = vrot.slane %v3184_v46, %v8262_v37 }
 0x6cb   : > { %v3085_v34 = vpack.c.bf16 %v3038_v45, %v3037_v13  ;;  %v4417_v12 = vrot.slane %v3038_v45, %v7269_v11  ;;  %v4422_v53 = vrot.slane %v3039_v7, %v7283_v41  ;;  %v2878_v62 = vpop.xlane.xlu0 %2877  ;;  %v2857_v39 = vpop.xlane.xlu1 %2856 }
 0x6cc   : > { %v3297_v38 = vsel %vm993_vm4, %v3296_v9, %v3292_v3  ;;  %v3026_v44 = vmul.f32 0.015625, %v2878_v62  ;;  %v3019_v28 = vmul.f32 0.015625, %v2857_v39 }
 0x6cd   : > { %v3302_v30 = vsel %vm8267_vm12, %v3301_v21, %v3297_v38  ;;  %v3203_v51 = vunpack.c.l.b16 %v3085_v34  ;;  %v4418_v56 = vsel %vm4249_vm5, %v4417_v12, %v4413_v17  ;;  %v3204_v20 = vunpack.c.h.b16 %v3085_v34 }
 0x6ce   : > { %v4423_v32 = vsel %vm4256_vm7, %v4422_v53, %v4418_v56  ;;  %v3079_v5 = vpack.c.bf16 %v3026_v44, %v3025_v48  ;;  %v4359_v6 = vrot.slane %v3026_v44, %v7289_v22  ;;  %v4325_v25 = vrot.slane %v3019_v28, %v7309_v58 }
 0x6cf   : > { %v2920_v52 = vpop.xlane.xlu0 %2919  ;;  %v2881_v16 = vpop.xlane.xlu1 %2880  ;;  %v3394_v1 = vrot.slane %v3203_v51, %v8257_v35  ;;  %v3398_v54 = vrot.slane %v3204_v20, %v8258_v31 }
 0x6d0   : > { %v3191_v42 = vunpack.c.l.b16 %v3079_v5  ;;  %v3192_v43 = vunpack.c.h.b16 %v3079_v5  ;;  %v4360_v3 = vsel %vm4277_vm15, %v4359_v6, %v4355_v49  ;;  %v4326_v61 = vsel %vm4284_vm14, %v4325_v25, %v4321_v27 }
 0x6d1   : > { %v3040_v47 = vmul.f32 0.015625, %v2920_v52  ;;  %v3027_v63 = vmul.f32 0.015625, %v2881_v16  ;;  %v3399_v53 = vsel %vm972_vm1, %v3398_v54, %v3394_v1 }
 0x6d2   : > { %v3335_v50 = vrot.slane %v3191_v42, %v8261_v60  ;;  %v3340_v48 = vrot.slane %v3192_v43, %v8262_v37 }
 0x6d3   : > { %v3086_v55 = vpack.c.bf16 %v3040_v47, %v3039_v7  ;;  %v4427_v13 = vrot.slane %v3040_v47, %v7276_v4  ;;  %v4364_v15 = vrot.slane %v3027_v63, %v7309_v58  ;;  %v2860_v40 = vpop.xlane.xlu0 %2859  ;;  %v2923_v23 = vpop.xlane.xlu1 %2922 }
 0x6d4   : > { %v3336_v46 = vsel %vm993_vm4, %v3335_v50, %v3331_v33  ;;  %v3020_v27 = vmul.f32 0.015625, %v2860_v40  ;;  %v7386_v49 = vmul.f32 0.015625, %v2923_v23 }
 0x6d5   : > { %v3341_v0 = vsel %vm8267_vm12, %v3340_v48, %v3336_v46  ;;  %v3205_v45 = vunpack.c.l.b16 %v3086_v55  ;;  %v3206_v9 = vunpack.c.h.b16 %v3086_v55  ;;  %v4428_v21 = vsel %vm4263_vm9, %v4427_v13, %v4423_v32 }
 0x6d6   : > { %v4365_v17 = vsel %vm4284_vm14, %v4364_v15, %v4360_v3  ;;  %v3076_v7 = vpack.c.bf16 %v3020_v27, %v3019_v28  ;;  %v4330_v34 = vrot.slane %v3020_v27, %v7300_v24  ;;  %v4432_v12 = vrot.slane %v7386_v49, %v7292_v14 }
 0x6d7   : > { %v3403_v33 = vrot.slane %v3205_v45, %v8259_v8  ;;  %v3408_v62 = vrot.slane %v3206_v9, %v8260_v36  ;;  %v2884_v39 = vpop.xlane.xlu0 %2883  ;;  %v2929_v38 = vpop.xlane.xlu1 %2928  ;;  %vm8268_vm12 = vcmask 523712  }
 0x6d8   : > { %v3185_v44 = vunpack.c.l.b16 %v3076_v7  ;;  %v3186_v51 = vunpack.c.h.b16 %v3076_v7  ;;  %v4331_v56 = vsel %vm4291_vm13, %v4330_v34, %v4326_v61  ;;  %v4433_v32 = vsel %vm4270_vm0, %v4432_v12, %v4428_v21 }
 0x6d9   : > { %v3404_v28 = vsel %vm979_vm2, %v3403_v33, %v3399_v53  ;;  %v4566_v5 = vsel %vm1289_vm8, %v4331_v56, %v7324_v10  ;;  %v3028_v6 = vmul.f32 0.015625, %v2884_v39  ;;  %v3043_v43 = vmul.f32 0.015625, %v2929_v38 }
 0x6da   : > { %v7403_v25 = vsel %vm986_vm3, %v3408_v62, %v3404_v28  ;;  %v3306_v20 = vrot.slane %v3185_v44, %v8264_v29  ;;  %v3311_v52 = vrot.slane %v3186_v51, %v8265_v2 }
 0x6db   : > { %v3080_v16 = vpack.c.bf16 %v3028_v6, %v3027_v63  ;;  %v4369_v42 = vrot.slane %v3028_v6, %v7300_v24  ;;  %v2926_v3 = vpop.xlane.xlu0 %2925  ;;  %v2887_v61 = vpop.xlane.xlu1 %2886 }
 0x6dc   : > { %v3307_v47 = vsel %vm1007_vm6, %v3306_v20, %v3302_v30  ;;  %v3042_v1 = vmul.f32 0.015625, %v2926_v3  ;;  %v4442_v30 = vrot.slane %v3043_v43, %v7309_v58 }
 0x6dd   : > { %v3312_v50 = vsel %vm8268_vm12, %v3311_v52, %v3307_v47  ;;  %v3193_v10 = vunpack.c.l.b16 %v3080_v16  ;;  %v3194_v48 = vunpack.c.h.b16 %v3080_v16  ;;  %v4370_v54 = vsel %vm4291_vm13, %v4369_v42, %v4365_v17 }
 0x6de   : > { %v3547_v55 = vsel %vm1289_vm8, %v3312_v50, %v7330_v26  ;;  %v7414_v13 = vsel %vm1291_vm10, %v4370_v54, %v4566_v5  ;;  %v4437_v63 = vrot.slane %v3042_v1, %v7289_v22  ;;  %vm8269_vm8 = vmmov %vm8268_vm12  ;;  %v3029_v17 = vmul.f32 0.015625, %v2887_v61 }
 0x6df   : > { %v3345_v15 = vrot.slane %v3193_v10, %v8264_v29  ;;  %v3350_v40 = vrot.slane %v3194_v48, %v8265_v2  ;;  %v2932_v23 = vpop.xlane.xlu0 %2931  ;;  %v2893_v46 = vpop.xlane.xlu1 %2892  ;;  %v3087_v52 = vpack.c.bf16 %v3042_v1, %v7386_v49  ;;  %vm8271_vm12 = vmmov %vm8269_vm8 }
 0x6e0   : > { %v4438_v27 = vsel %vm4277_vm15, %v4437_v63, %v4433_v32  ;;  %v3044_v45 = vmul.f32 0.015625, %v2932_v23  ;;  %v3031_v12 = vmul.f32 0.015625, %v2893_v46  ;;  %v4374_v38 = vrot.slane %v3029_v17, %v7272_v59 }
 0x6e1   : > { %v3346_v9 = vsel %vm1007_vm6, %v3345_v15, %v3341_v0  ;;  %v4443_v26 = vsel %vm4284_vm14, %v4442_v30, %v4438_v27  ;;  %v3207_v1 = vunpack.c.l.b16 %v3087_v52 }
 0x6e2   : > { %v3351_v21 = vsel %vm8269_vm8, %v3350_v40, %v3346_v9  ;;  %v4447_v34 = vrot.slane %v3044_v45, %v7300_v24  ;;  %v4383_v44 = vrot.slane %v3031_v12, %v7283_v41  ;;  %v3088_v40 = vpack.c.bf16 %v3044_v45, %v3043_v43 }
 0x6e3   : > { %v7425_v7 = vsel %vm1291_vm10, %v3351_v21, %v3547_v55  ;;  %v2890_v53 = vpop.xlane.xlu0 %2889  ;;  %v2935_v33 = vpop.xlane.xlu1 %2934  ;;  %v3208_v9 = vunpack.c.h.b16 %v3087_v52  ;;  %v3413_v21 = vrot.slane %v3207_v1, %v8261_v60  ;;  %vm8270_vm10 = vcmask 392512  }
 0x6e4   : > { %v3030_v62 = vmul.f32 0.015625, %v2890_v53  ;;  %v7429_v39 = vsel %vm4291_vm13, %v4447_v34, %v4443_v26  ;;  %v7436_v20 = vmul.f32 0.015625, %v2935_v33  ;;  %v3210_v52 = vunpack.c.h.b16 %v3088_v40 }
 0x6e5   : > { %v3418_v45 = vrot.slane %v3208_v9, %v8262_v37  ;;  %vm8272_vm8 = vcmask 1044484  }
 0x6e6   : > { %v4378_v0 = vrot.slane %v3030_v62, %v7269_v11  ;;  %v4452_v48 = vrot.slane %v7436_v20, %v7272_v59  ;;  %v3081_v46 = vpack.c.bf16 %v3030_v62, %v3029_v17 }
 0x6e7   : > { %v2896_v51 = vpop.xlane.xlu0 %2895  ;;  %v2899_v56 = vpop.xlane.xlu1 %2898 }
 0x6e8   : > { %v4379_v32 = vsel %vm4249_vm5, %v4378_v0, %v4374_v38  ;;  %v3032_v28 = vmul.f32 0.015625, %v2896_v51  ;;  %v3033_v6 = vmul.f32 0.015625, %v2899_v56  ;;  %v3209_v38 = vunpack.c.l.b16 %v3088_v40 }
 0x6e9   : > { %v4384_v5 = vsel %vm4256_vm7, %v4383_v44, %v4379_v32  ;;  %v3195_v44 = vunpack.c.l.b16 %v3081_v46  ;;  %v3196_v51 = vunpack.c.h.b16 %v3081_v46 }
 0x6ea   : > { %v4388_v16 = vrot.slane %v3032_v28, %v7276_v4  ;;  %v4393_v42 = vrot.slane %v3033_v6, %v7292_v14  ;;  %v3082_v26 = vpack.c.bf16 %v3032_v28, %v3031_v12  ;;  %v3414_v12 = vsel %vm993_vm4, %v3413_v21, %v7403_v25 }
 0x6eb   : > { %v2938_v3 = vpop.xlane.xlu0 %2937  ;;  %v2941_v61 = vpop.xlane.xlu1 %2940 }
 0x6ec   : > { %v3046_v47 = vmul.f32 0.015625, %v2938_v3  ;;  %v7441_v50 = vmul.f32 0.015625, %v2941_v61  ;;  %v4389_v10 = vsel %vm4263_vm9, %v4388_v16, %v4384_v5  ;;  %v3197_v56 = vunpack.c.l.b16 %v3082_v26 }
 0x6ed   : > { %v4394_v54 = vsel %vm4270_vm0, %v4393_v42, %v4389_v10  ;;  %v3423_v16 = vrot.slane %v3209_v38, %v8264_v29  ;;  %v3355_v61 = vrot.slane %v3195_v44, %v8257_v35  ;;  %v3359_v10 = vrot.slane %v3196_v51, %v8258_v31 }
 0x6ee   : > { %v4456_v55 = vrot.slane %v3046_v47, %v7269_v11  ;;  %v4461_v49 = vrot.slane %v7441_v50, %v7283_v41  ;;  %v3364_v25 = vrot.slane %v3197_v56, %v8259_v8 }
 0x6ef   : > { %v2902_v63 = vpop.xlane.xlu0 %2901  ;;  %v2959_v15 = vpop.xlane.xlu1 %2958  ;;  %v3360_v21 = vsel %vm972_vm1, %v3359_v10, %v3355_v61 }
 0x6f0   : > { %v4457_v30 = vsel %vm4249_vm5, %v4456_v55, %v4452_v48  ;;  %v3034_v23 = vmul.f32 0.015625, %v2902_v63  ;;  %v3053_v32 = vmul.f32 0.015625, %v2959_v15  ;;  %v3419_v55 = vsel %vm8270_vm10, %v3418_v45, %v3414_v12 }
 0x6f1   : > { %v4462_v27 = vsel %vm4256_vm7, %v4461_v49, %v4457_v30  ;;  %v3198_v49 = vunpack.c.h.b16 %v3082_v26  ;;  %v3424_v26 = vsel %vm1007_vm6, %v3423_v16, %v3419_v55  ;;  %v3365_v45 = vsel %vm979_vm2, %v3364_v25, %v3360_v21 }
 0x6f2   : > { %v4398_v34 = vrot.slane %v3034_v23, %v7289_v22  ;;  %v3083_v62 = vpack.c.bf16 %v3034_v23, %v3033_v6  ;;  %v4491_v1 = vrot.slane %v3053_v32, %v7272_v59  ;;  %v3428_v23 = vrot.slane %v3210_v52, %v8265_v2 }
 0x6f3   : > { %v2944_v53 = vpop.xlane.xlu0 %2943  ;;  %v2965_v33 = vpop.xlane.xlu1 %2964 }
 0x6f4   : > { %v3048_v0 = vmul.f32 0.015625, %v2944_v53  ;;  %v4399_v43 = vsel %vm4277_vm15, %v4398_v34, %v4394_v54  ;;  %v3055_v3 = vmul.f32 0.015625, %v2965_v33  ;;  %v3199_v6 = vunpack.c.l.b16 %v3083_v62 }
 0x6f5   : > { %v3089_v34 = vpack.c.bf16 %v3046_v47, %v7436_v20  ;;  %v3369_v33 = vrot.slane %v3198_v49, %v8260_v36  ;;  %v3200_v56 = vunpack.c.h.b16 %v3083_v62  ;;  %v3429_v52 = vsel %vm8271_vm12, %v3428_v23, %v3424_v26 }
 0x6f6   : > { %v4466_v17 = vrot.slane %v3048_v0, %v7276_v4  ;;  %v4500_v46 = vrot.slane %v3055_v3, %v7283_v41 }
 0x6f7   : > { %v2962_v28 = vpop.xlane.xlu0 %2961  ;;  %v2905_v5 = vpop.xlane.xlu1 %2904  ;;  %v3370_v61 = vsel %vm986_vm3, %v3369_v33, %v3365_v45  ;;  %v3211_v10 = vunpack.c.l.b16 %v3089_v34  ;;  %v3379_v25 = vrot.slane %v3200_v56, %v8262_v37 }
 0x6f8   : > { %v4467_v42 = vsel %vm4263_vm9, %v4466_v17, %v4462_v27  ;;  %v3054_v48 = vmul.f32 0.015625, %v2962_v28  ;;  %v3035_v54 = vmul.f32 0.015625, %v2905_v5  ;;  %v3374_v17 = vrot.slane %v3199_v6, %v8261_v60 }
 0x6f9   : > { %v3090_v6 = vpack.c.bf16 %v3048_v0, %v7441_v50 }
 0x6fa   : > { %v4495_v63 = vrot.slane %v3054_v48, %v7269_v11  ;;  %v4403_v15 = vrot.slane %v3035_v54, %v7309_v58  ;;  %v3375_v49 = vsel %vm993_vm4, %v3374_v17, %v3370_v61  ;;  %v3433_v61 = vrot.slane %v3211_v10, %v8257_v35 }
 0x6fb   : > { %v2968_v40 = vpop.xlane.xlu0 %2967  ;;  %v2947_v30 = vpop.xlane.xlu1 %2946 }
 0x6fc   : > { %v3056_v27 = vmul.f32 0.015625, %v2968_v40  ;;  %v7470_v9 = vmul.f32 0.015625, %v2947_v30  ;;  %v4496_v53 = vsel %vm4249_vm5, %v4495_v63, %v4491_v1  ;;  %v4404_v38 = vsel %vm4284_vm14, %v4403_v15, %v4399_v43 }
 0x6fd   : > { %v4501_v44 = vsel %vm4256_vm7, %v4500_v46, %v4496_v53  ;;  %v3093_v40 = vpack.c.bf16 %v3054_v48, %v3053_v32  ;;  %v3212_v32 = vunpack.c.h.b16 %v3089_v34  ;;  %v3380_v48 = vsel %vm8270_vm10, %v3379_v25, %v3375_v49 }
 0x6fe   : > { %v4505_v51 = vrot.slane %v3056_v27, %v7276_v4  ;;  %v4471_v12 = vrot.slane %v7470_v9, %v7292_v14  ;;  %v3094_v46 = vpack.c.bf16 %v3056_v27, %v3055_v3  ;;  %vm8274_vm10 = vcmask 1046534  }
 0x6ff   : > { %v2908_v28 = vpop.xlane.xlu0 %2907  ;;  %v2971_v20 = vpop.xlane.xlu1 %2970  ;;  %v3219_v17 = vunpack.c.l.b16 %v3093_v40 }
 0x700   : > { %v4506_v47 = vsel %vm4263_vm9, %v4505_v51, %v4501_v44  ;;  %v3036_v5 = vmul.f32 0.015625, %v2908_v28  ;;  %v4472_v43 = vsel %vm4270_vm0, %v4471_v12, %v4467_v42  ;;  %v3057_v16 = vmul.f32 0.015625, %v2971_v20 }
 0x701   : > { %v3213_v44 = vunpack.c.l.b16 %v3090_v6  ;;  %v3220_v12 = vunpack.c.h.b16 %v3093_v40  ;;  %v3221_v34 = vunpack.c.l.b16 %v3094_v46  ;;  %v3472_v40 = vrot.slane %v3219_v17, %v8257_v35 }
 0x702   : > { %v3084_v55 = vpack.c.bf16 %v3036_v5, %v3035_v54  ;;  %v4408_v62 = vrot.slane %v3036_v5, %v7300_v24  ;;  %v4510_v1 = vrot.slane %v3057_v16, %v7292_v14  ;;  %v3222_v10 = vunpack.c.h.b16 %v3094_v46 }
 0x703   : > { %v2950_v63 = vpop.xlane.xlu0 %2949  ;;  %v2953_v15 = vpop.xlane.xlu1 %2952 }
 0x704   : > { %v3201_v30 = vunpack.c.l.b16 %v3084_v55  ;;  %v3202_v42 = vunpack.c.h.b16 %v3084_v55  ;;  %v4409_v23 = vsel %vm4291_vm13, %v4408_v62, %v4404_v38  ;;  %v4511_v26 = vsel %vm4270_vm0, %v4510_v1, %v4506_v47 }
 0x705   : > { %v4568_v54 = vsel %vm1293_vm11, %v4409_v23, %v7414_v13  ;;  %v3050_v21 = vmul.f32 0.015625, %v2950_v63  ;;  %v3051_v0 = vmul.f32 0.015625, %v2953_v15  ;;  %v3437_v55 = vrot.slane %v3212_v32, %v8258_v31 }
 0x706   : > { %v3384_v53 = vrot.slane %v3201_v30, %v8264_v29  ;;  %v3389_v50 = vrot.slane %v3202_v42, %v8265_v2  ;;  %v4569_v33 = vsel %vm8272_vm8, %v7429_v39, %v4568_v54  ;;  %v3476_v30 = vrot.slane %v3220_v12, %v8258_v31 }
 0x707   : > { %v4476_v3 = vrot.slane %v3050_v21, %v7289_v22  ;;  %v2974_v27 = vpop.xlane.xlu0 %2973  ;;  %v2977_v38 = vpop.xlane.xlu1 %2976  ;;  %v4481_v51 = vrot.slane %v3051_v0, %v7309_v58  ;;  %v3091_v63 = vpack.c.bf16 %v3050_v21, %v7470_v9  ;;  %v3442_v23 = vrot.slane %v3213_v44, %v8259_v8 }
 0x708   : > { %v3385_v13 = vsel %vm1007_vm6, %v3384_v53, %v3380_v48  ;;  %v3058_v45 = vmul.f32 0.015625, %v2974_v27  ;;  %v3059_v56 = vmul.f32 0.015625, %v2977_v38  ;;  %v3481_v54 = vrot.slane %v3221_v34, %v8259_v8 }
 0x709   : > { %v3390_v28 = vsel %vm8271_vm12, %v3389_v50, %v3385_v13  ;;  %v4477_v39 = vsel %vm4277_vm15, %v4476_v3, %v4472_v43  ;;  %v3214_v43 = vunpack.c.h.b16 %v3090_v6  ;;  %v3438_v9 = vsel %vm972_vm1, %v3437_v55, %v3433_v61 }
 0x70a   : > { %v3549_v20 = vsel %vm1293_vm11, %v3390_v28, %v7425_v7  ;;  %v4482_v47 = vsel %vm4284_vm14, %v4481_v51, %v4477_v39  ;;  %v4515_v5 = vrot.slane %v3058_v45, %v7289_v22  ;;  %v4520_v62 = vrot.slane %v3059_v56, %v7309_v58 }
 0x70b   : > { %v2956_v49 = vpop.xlane.xlu0 %2955  ;;  %v7515_v25 = vsel %vm8272_vm8, %v3429_v52, %v3549_v20  ;;  %v2983_v1 = vpop.xlane.xlu1 %2982  ;;  %v3215_v21 = vunpack.c.l.b16 %v3091_v63  ;;  %v3447_v32 = vrot.slane %v3214_v43, %v8260_v36  ;;  %v3477_v48 = vsel %vm972_vm1, %v3476_v30, %v3472_v40 }
 0x70c   : > { %v4516_v7 = vsel %vm4277_vm15, %v4515_v5, %v4511_v26  ;;  %v3052_v15 = vmul.f32 0.015625, %v2956_v49  ;;  %v3095_v26 = vpack.c.bf16 %v3058_v45, %v3057_v16  ;;  %v3486_v46 = vrot.slane %v3222_v10, %v8260_v36 }
 0x70d   : > { %v4521_v42 = vsel %vm4284_vm14, %v4520_v62, %v4516_v7  ;;  %v3443_v44 = vsel %vm979_vm2, %v3442_v23, %v3438_v9  ;;  %v3482_v27 = vsel %vm979_vm2, %v3481_v54, %v3477_v48  ;;  %v3216_v38 = vunpack.c.h.b16 %v3091_v63 }
 0x70e   : > { %v4486_v52 = vrot.slane %v3052_v15, %v7300_v24  ;;  %vm8273_vm11 = vcmask 1045509   ;;  %v3061_v51 = vmul.f32 0.015625, %v2983_v1  ;;  %v3452_v12 = vrot.slane %v3215_v21, %v8261_v60 }
 0x70f   : > { %v2980_v53 = vpop.xlane.xlu0 %2979  ;;  %v2989_v6 = vpop.xlane.xlu1 %2988  ;;  %v3223_v28 = vunpack.c.l.b16 %v3095_v26  ;;  %v3448_v20 = vsel %vm986_vm3, %v3447_v32, %v3443_v44  ;;  %v3092_v5 = vpack.c.bf16 %v3052_v15, %v3051_v0  ;;  %v3457_v55 = vrot.slane %v3216_v38, %v8262_v37 }
 0x710   : > { %v3060_v50 = vmul.f32 0.015625, %v2980_v53  ;;  %v4487_v3 = vsel %vm4291_vm13, %v4486_v52, %v4482_v47  ;;  %v3063_v39 = vmul.f32 0.015625, %v2989_v6  ;;  %v3487_v47 = vsel %vm986_vm3, %v3486_v46, %v3482_v27 }
 0x711   : > { %v4570_v13 = vsel %vm8273_vm11, %v4487_v3, %v4569_v33  ;;  %v3224_v33 = vunpack.c.h.b16 %v3095_v26  ;;  %v4530_v1 = vrot.slane %v3061_v51, %v7272_v59  ;;  %v3453_v30 = vsel %vm993_vm4, %v3452_v12, %v3448_v20 }
 0x712   : > { %v4525_v17 = vrot.slane %v3060_v50, %v7300_v24  ;;  %v3096_v62 = vpack.c.bf16 %v3060_v50, %v3059_v56  ;;  %v3491_v0 = vrot.slane %v3223_v28, %v8261_v60  ;;  %v4539_v15 = vrot.slane %v3063_v39, %v7283_v41 }
 0x713   : > { %v2986_v16 = vpop.xlane.xlu0 %2985  ;;  %v2995_v45 = vpop.xlane.xlu1 %2994  ;;  %v3217_v23 = vunpack.c.l.b16 %v3092_v5  ;;  %v3496_v27 = vrot.slane %v3224_v33, %v8262_v37  ;;  %v3218_v38 = vunpack.c.h.b16 %v3092_v5 }
 0x714   : > { %v3062_v34 = vmul.f32 0.015625, %v2986_v16  ;;  %v4526_v61 = vsel %vm4291_vm13, %v4525_v17, %v4521_v42  ;;  %v3065_v7 = vmul.f32 0.015625, %v2995_v45  ;;  %v3225_v53 = vunpack.c.l.b16 %v3096_v62 }
 0x715   : > { %v7540_v49 = vsel %vm8274_vm10, %v4526_v61, %v4570_v13  ;;  %v3492_v44 = vsel %vm993_vm4, %v3491_v0, %v3487_v47  ;;  %v3467_v33 = vrot.slane %v3218_v38, %v8265_v2  ;;  %v5102_v38 = vld [vmem:[%s7793_s6 + $0x80] sm:$0xff]  }
 0x716   : > { %v3097_v43 = vpack.c.bf16 %v3062_v34, %v3061_v51  ;;  %v4534_v63 = vrot.slane %v3062_v34, %v7269_v11  ;;  %v4549_v26 = vrot.slane %v3065_v7, %v7292_v14  ;;  %v3226_v51 = vunpack.c.h.b16 %v3096_v62 }
 0x717   : > { %v2992_v40 = vpop.xlane.xlu0 %2991  ;;  %v3001_v42 = vpop.xlane.xlu1 %3000  ;;  %v3501_v17 = vrot.slane %v3225_v53, %v8264_v29 }
 0x718   : > { %v3064_v10 = vmul.f32 0.015625, %v2992_v40  ;;  %v3227_v56 = vunpack.c.l.b16 %v3097_v43  ;;  %v3228_v54 = vunpack.c.h.b16 %v3097_v43  ;;  %v4535_v52 = vsel %vm4249_vm5, %v4534_v63, %v4530_v1 }
 0x719   : > { %v4540_v6 = vsel %vm4256_vm7, %v4539_v15, %v4535_v52  ;;  %v3067_v41 = vmul.f32 0.015625, %v3001_v42 }
 0x71a   : > { %v3098_v59 = vpack.c.bf16 %v3064_v10, %v3063_v39  ;;  %v4544_v11 = vrot.slane %v3064_v10, %v7276_v4  ;;  %v3511_v9 = vrot.slane %v3227_v56, %v8257_v35  ;;  %v3515_v21 = vrot.slane %v3228_v54, %v8258_v31 }
 0x71b   : > { %v2998_v50 = vpop.xlane.xlu0 %2997  ;;  %v3462_v35 = vrot.slane %v3217_v23, %v8264_v29  ;;  %v4559_v45 = vrot.slane %v3067_v41, %v7309_v58 }
 0x71c   : > { %v3229_v32 = vunpack.c.l.b16 %v3098_v59  ;;  %v3230_v48 = vunpack.c.h.b16 %v3098_v59  ;;  %v4545_v46 = vsel %vm4263_vm9, %v4544_v11, %v4540_v6  ;;  %v3066_v3 = vmul.f32 0.015625, %v2998_v50  ;;  %v5080_v59 = vld [vmem:[#allocation2 + $0x8] ss:$16 sps:$4 sm:$0xff]   ;;  %v5085_v11 = vld [vmem:[#allocation2 + $0x2c] ss:$16 sps:$4 sm:$0xff]  }
 0x71d   : > { %v4550_v4 = vsel %vm4270_vm0, %v4549_v26, %v4545_v46  ;;  %v3516_v16 = vsel %vm972_vm1, %v3515_v21, %v3511_v9  ;;  %vm8275_vm0 = vcmask 392512   ;;  %vm8277_vm1 = vmmov %vm8271_vm12  ;;  %vm8285_vm9 = vcmask 523264   ;;  %v5091_v9 = vld [vmem:[#allocation2 + $0x6c] ss:$16 sps:$4 sm:$0xff]   ;;  %v5089_v21 = vld [vmem:[#allocation2 + $0x68] ss:$16 sps:$4 sm:$0xff]  }
 0x71e   : > { %v3520_v31 = vrot.slane %v3229_v32, %v8259_v8  ;;  %v3099_v13 = vpack.c.bf16 %v3066_v3, %v3065_v7  ;;  %v4554_v14 = vrot.slane %v3066_v3, %v7289_v22  ;;  %v3525_v28 = vrot.slane %v3230_v48, %v8260_v36  ;;  %vm8276_vm5 = vmmov %vm8275_vm0  ;;  %v5092_v26 = vld [vmem:[%s7793_s6 + $0x40] sm:$0xff]   ;;  %v5095_v50 = vld [vmem:[%s7793_s6 + $0x8] sm:$0xff]  }
 0x71f   : > { %v3004_v12 = vpop.xlane.xlu0 %3003  ;;  %v3458_v22 = vsel %vm8275_vm0, %v3457_v55, %v3453_v30  ;;  %v3497_v61 = vsel %vm8276_vm5, %v3496_v27, %v3492_v44  ;;  %v3506_v36 = vrot.slane %v3226_v51, %v8265_v2  ;;  %4917 = vmatprep.subr.bf16.mxu1 %v5092_v26  ;;  %v5096_v32 = vld [vmem:[%s7793_s6 + $0x50] sm:$0xff]   ;;  %v5098_v46 = vld [vmem:[%s7793_s6 + $0x58] sm:$0xff]   ;;  %v5100_v44 = vld [vmem:[%s7793_s6 + $0xc0] sm:$0xff]  }
 0x720   : > { %v3231_v39 = vunpack.c.l.b16 %v3099_v13  ;;  %v3232_v34 = vunpack.c.h.b16 %v3099_v13  ;;  %v4555_v20 = vsel %vm4277_vm15, %v4554_v14, %v4550_v4  ;;  %v3521_v47 = vsel %vm979_vm2, %v3520_v31, %v3516_v16  ;;  %vm8283_vm15 = vmmov %vm8277_vm1  ;;  %v5097_v48 = vld [vmem:[%s7793_s6 + $0x10] sm:$0xff]   ;;  %v5099_v3 = vld [vmem:[%s7793_s6 + $0x18] sm:$0xff]  }
 0x721   : > { %v3068_v8 = vmul.f32 0.015625, %v3004_v12  ;;  %v4560_v5 = vsel %vm4284_vm14, %v4559_v45, %v4555_v20  ;;  %v3463_v62 = vsel %vm1007_vm6, %v3462_v35, %v3458_v22  ;;  %v3502_v63 = vsel %vm1007_vm6, %v3501_v17, %v3497_v61  ;;  %vm8279_vm14 = vmmov %vm8277_vm1  ;;  %v5101_v27 = vld [vmem:[%s7793_s6 + $0x60] sm:$0xff]   ;;  %v5104_v35 = vld [vmem:[%s7793_s6 + $0xc8] sm:$0xff]  }
 0x722   : > { %v3530_v58 = vrot.slane %v3231_v39, %v8261_v60  ;;  %v3526_v7 = vsel %vm986_vm3, %v3525_v28, %v3521_v47  ;;  %v3535_v40 = vrot.slane %v3232_v34, %v8262_v37  ;;  %v3468_v60 = vsel %vm8277_vm1, %v3467_v33, %v3463_v62  ;;  %vm8280_vm3 = vmmov %vm8275_vm0  ;;  %v5103_v4 = vld [vmem:[%s7793_s6 + $0x20] sm:$0xff]   ;;  %v5105_v31 = vld [vmem:[%s7793_s6 + $0x68] sm:$0xff]  }
 0x723   : > { %v3100_v1 = vpack.c.bf16 %v3068_v8, %v3067_v41  ;;  %v4564_v43 = vrot.slane %v3068_v8, %v7300_v24  ;;  %vm8278_vm2 = vcmask 1047559   ;;  %v3507_v24 = vsel %vm8279_vm14, %v3506_v36, %v3502_v63  ;;  %v5094_v41 = vld [vmem:[%s7793_s6 + $0x48] sm:$0xff]   ;;  %v5108_v51 = vld [vmem:[%s7793_s6 + $0xd0] sm:$0xff]   ;;  %v5112_v12 = vld [vmem:[%s7793_s6 + $0xd8] sm:$0xff]  }
 0x724   : > { %v3531_v55 = vsel %vm993_vm4, %v3530_v58, %v3526_v7  ;;  %vm8281_vm4 = vmmov %vm8273_vm11  ;;  %v5106_v13 = vld [vmem:[%s7793_s6 + $0x88] sm:$0xff]   ;;  %v5109_v17 = vld [vmem:[%s7793_s6 + $0x70] sm:$0xff]  }
 0x725   : > { %v3233_v30 = vunpack.c.l.b16 %v3100_v1  ;;  %v3234_v0 = vunpack.c.h.b16 %v3100_v1  ;;  %v4565_v15 = vsel %vm4291_vm13, %v4564_v43, %v4560_v5  ;;  %v3536_v37 = vsel %vm8280_vm3, %v3535_v40, %v3531_v55  ;;  %vm8282_vm13 = vmmov %vm8274_vm10  ;;  %v5107_v14 = vld [vmem:[%s7793_s6 + $0x28] sm:$0xff]   ;;  %v5110_v16 = vld [vmem:[%s7793_s6 + $0x90] sm:$0xff]  }
 0x726   : > { %v7582_v10 = vsel %vm8278_vm2, %v4565_v15, %v7540_v49  ;;  %v3551_v56 = vsel %vm8281_vm4, %v3468_v60, %v7515_v25  ;;  %vm8284_vm7 = vmmov %vm8278_vm2  ;;  %v5086_v25 = vld [vmem:[#allocation2 + $0x48] ss:$16 sps:$4 sm:$0xff]   ;;  %v5111_v45 = vld [vmem:[%s7793_s6 + $0x30] sm:$0xff]   ;;  %v8287_v1 = vsub.s32 1, %v8219_v19 }
 0x727   : > { %v3540_v42 = vrot.slane %v3233_v30, %v8264_v29  ;;  %v3545_v23 = vrot.slane %v3234_v0, %v8265_v2  ;;  %v3552_v52 = vsel %vm8282_vm13, %v3507_v24, %v3551_v56  ;;  %v5083_v29 = vld [vmem:[#allocation2 + $0x28] ss:$16 sps:$4 sm:$0xff]   ;;  %v5088_v2 = vld [vmem:[#allocation2 + $0x4c] ss:$16 sps:$4 sm:$0xff]   ;;  %v5116_v20 = vld [vmem:[%s7793_s6 + $0xe0] sm:$0xff]  }
 0x728   : > { %v5113_v28 = vld [vmem:[%s7793_s6 + $0x78] sm:$0xff]   ;;  %v5117_v47 = vld [vmem:[%s7793_s6 + $0xa0] sm:$0xff]   ;;  %v5118_v8 = vld [vmem:[%s7793_s6 + $0xe8] sm:$0xff]  }
 0x729   : > { %v3541_v54 = vsel %vm1007_vm6, %v3540_v42, %v3536_v37  ;;  %vm8286_vm6 = vmmov %vm8285_vm9  ;;  %v5114_v39 = vld [vmem:[%s7793_s6 + $0x98] sm:$0xff]   ;;  %v5119_v5 = vld [vmem:[%s7793_s6 + $0xa8] sm:$0xff]  }
 0x72a   : > { %v3546_v53 = vsel %vm8283_vm15, %v3545_v23, %v3541_v54  ;;  %v5115_v34 = vld [vmem:[%s7793_s6 + $0x38] sm:$0xff]   ;;  %v5120_v22 = vld [vmem:[%s7793_s6 + $0xf0] sm:$0xff]   ;;  %v3117_v62 = vld [vmem:[%s7792_s5] sm:$0xf]  ;;  %v8288_v54 = vsub.s32 2, %v8219_v19 }
 0x72b   : > { %v3553_v49 = vsel %vm8284_vm7, %v3546_v53, %v3552_v52  ;;  %v5121_v61 = vld [vmem:[%s7793_s6 + $0xb0] sm:$0xff]   ;;  %v5122_v33 = vld [vmem:[%s7793_s6 + $0xf8] sm:$0xff]   ;;  %v3122_v36 = vrot.slane %v3117_v62, %v8220_v57  ;;  %v3126_v43 = vrot.slane %v3117_v62, %v8287_v1  ;;  %v8289_v53 = vsub.s32 3, %v8219_v19  ;;  %vm8290_vm0 = vmmov %vm8286_vm6 }
 0x72c   : > { %v3554_v6 = vpack.c.b16 %v3553_v49, %v3553_v49  ;;  %v5123_v58 = vld [vmem:[%s7793_s6 + $0xb8] sm:$0xff]   ;;  %v3130_v52 = vrot.slane %v3117_v62, %v8288_v54 }
 0x72e   : > { %4702 = vmatmul.mubr.msk.bf16.vlgmr.msra.gmra.mrb[4].mxu0 %vm8285_vm9, %v3554_v6 }
 0x72f   : > { %3680 = vmatpush1.bf16.msra.mxu0 %v5080_v59  ;;  %3711 = vmatprep.mubr.bf16.mxu0 %v5251_v18  ;;  %v5093_v18 = vld [vmem:[%s7793_s6] sm:$0xff]   ;;  %v3134_v59 = vrot.slane %v3117_v62, %v8289_v53 }
 0x730   : > { %3681 = vmatprep.subr.bf16.mxu0 %v5085_v11  ;;  %4918 = vmatpush3.bf16.msra.mxu1 %v5093_v18 }
 0x731   : > { %4919 = vmatprep.subr.bf16.mxu1 %v5094_v41 }
 0x733   : > { %3682 = vmatpush1.bf16.msra.mxu0 %v5083_v29 }
 0x734   : > { %3683 = vmatprep.subr.bf16.mxu0 %v5088_v2  ;;  %4920 = vmatpush3.bf16.msra.mxu1 %v5095_v50 }
 0x735   : > { %4921 = vmatprep.subr.bf16.mxu1 %v5096_v32 }
 0x737   : > { %3684 = vmatpush1.bf16.msra.mxu0 %v5086_v25 }
 0x738   : > { %3685 = vmatprep.subr.bf16.mxu0 %v5091_v9  ;;  %4922 = vmatpush3.bf16.msra.mxu1 %v5097_v48 }
 0x739   : > { %4923 = vmatprep.subr.bf16.mxu1 %v5098_v46 }
 0x73b   : > { %3686 = vmatpush1.bf16.msra.mxu0 %v5089_v21 }
 0x73c   : > { %4924 = vmatpush3.bf16.msra.mxu1 %v5099_v3  ;;  %4939 = vmatprep.subr.bf16.mxu0 %v5100_v44 }
 0x73d   : > { %4925 = vmatprep.subr.bf16.mxu1 %v5101_v27 }
 0x73e   : > { %4703 = vmatmul.mubr.msk.bf16.vlgmr.msra.gmra.mrb[8].mxu0 %vm8286_vm6, %v3554_v6 }
 0x73f   : > { %4940 = vmatpush3.bf16.msra.mxu0 %v5102_v38 }
 0x740   : > { %4926 = vmatpush3.bf16.msra.mxu1 %v5103_v4  ;;  %4941 = vmatprep.subr.bf16.mxu0 %v5104_v35 }
 0x741   : > { %4927 = vmatprep.subr.bf16.mxu1 %v5105_v31 }
 0x743   : > { %4942 = vmatpush3.bf16.msra.mxu0 %v5106_v13 }
 0x744   : > { %4928 = vmatpush3.bf16.msra.mxu1 %v5107_v14  ;;  %4943 = vmatprep.subr.bf16.mxu0 %v5108_v51 }
 0x745   : > { %4929 = vmatprep.subr.bf16.mxu1 %v5109_v17 }
 0x747   : > { %4944 = vmatpush3.bf16.msra.mxu0 %v5110_v16 }
 0x748   : > { %4930 = vmatpush3.bf16.msra.mxu1 %v5111_v45  ;;  %4945 = vmatprep.subr.bf16.mxu0 %v5112_v12 }
 0x749   : > { %4931 = vmatprep.subr.bf16.mxu1 %v5113_v28 }
 0x74b   : > { %4946 = vmatpush3.bf16.msra.mxu0 %v5114_v39 }
 0x74c   : > { %4932 = vmatpush3.bf16.msra.mxu1 %v5115_v34  ;;  %4947 = vmatprep.subr.bf16.mxu0 %v5116_v20 }
 0x74f   : > { %4948 = vmatpush3.bf16.msra.mxu0 %v5117_v47 }
 0x750   : > { %4949 = vmatprep.subr.bf16.mxu0 %v5118_v8 }
 0x753   : > { %4950 = vmatpush3.bf16.msra.mxu0 %v5119_v5 }
 0x754   : > { %4951 = vmatprep.subr.bf16.mxu0 %v5120_v22 }
 0x757   : > { %4952 = vmatpush3.bf16.msra.mxu0 %v5121_v61 }
 0x758   : > { %4953 = vmatprep.subr.bf16.mxu0 %v5122_v33 }
 0x75b   : > { %4954 = vmatpush3.bf16.msra.mxu0 %v5123_v58 }
 0x801   : > { %v3672_v63 = vpop.f32.mrb[4].mxu0 }
 0x802   : > { %v7699_v7 = vadd.f32 %v3672_v63, %v3122_v36  ;;  %v3674_v40 = vpop.f32.mrb[5].mxu0 }
 0x803   : > { %v7701_v55 = vadd.f32 %v3674_v40, %v3126_v43  ;;  %v3676_v30 = vpop.f32.mrb[6].mxu0 }
 0x804   : > { %v7704_v0 = vmul.f32 0.70710677, %v7699_v7  ;;  %v3677_v15 = vpop.f32.mrb[7].mxu0 }
 0x805   : > { %v7707_v60 = vmul.f32 0.70710677, %v7701_v55 }
 0x806   : > { %v3728_v24 = vand.u32 2147483647, %v7704_v0  ;;  %vm3808_vm12 = vcmp.ge.f32.partialorder %v7704_v0, 0.0 }
 0x807   : > { %v3729_v57 = vand.u32 2147483647, %v7707_v60  ;;  %vm3809_vm8 = vcmp.ge.f32.partialorder %v7707_v60, 0.0 }
 0x808   : > { %v3732_v42 = vmul.f32 0.3275911, %v3728_v24  ;;  %v3784_v6 = vsub.f32 0.0, %v3728_v24 }
 0x809   : > { %v3733_v23 = vmul.f32 0.3275911, %v3729_v57  ;;  %v3785_v2 = vsub.f32 0.0, %v3729_v57 }
 0x80a   : > { %v3736_v37 = vadd.f32 1.0, %v3732_v42  ;;  %v3788_v50 = vmul.f32 %v3784_v6, %v3728_v24 }
 0x80b   : > { %v3737_v56 = vadd.f32 1.0, %v3733_v23  ;;  %v3789_v46 = vmul.f32 %v3785_v2, %v3729_v57 }
 0x80c   : > { %5132 = vrcp.f32 %v3736_v37  ;;  %v3792_v35 = vmul.f32 1.442695, %v3788_v50  ;;  %v3720_v50 = vmul.f32 0.5, %v7699_v7 }
 0x80d   : > { %5134 = vrcp.f32 %v3737_v56  ;;  %v3794_v51 = vmul.f32 1.442695, %v3789_v46  ;;  %v3721_v46 = vmul.f32 0.5, %v7701_v55 }
 0x811   : > { %v3713_v49 = vpop.f32.mrb[8].mxu0 }
 0x812   : > { %v7715_v11 = vadd.f32 %v3713_v49, %v3130_v52  ;;  %v3715_v29 = vpop.f32.mrb[9].mxu0 }
 0x813   : > { %v7717_v25 = vadd.f32 %v3715_v29, %v3134_v59  ;;  %v3717_v9 = vpop.f32.mrb[10].mxu0 }
 0x814   : > { %v7720_v21 = vmul.f32 0.70710677, %v7715_v11  ;;  %v3718_v26 = vpop.f32.mrb[11].mxu0 }
 0x815   : > { %v7723_v18 = vmul.f32 0.70710677, %v7717_v25 }
 0x816   : > { %v5133_v41 = vpop.eup %5132  ;;  %v3730_v19 = vand.u32 2147483647, %v7720_v21  ;;  %vm3810_vm11 = vcmp.ge.f32.partialorder %v7720_v21, 0.0 }
 0x817   : > { %v5135_v32 = vpop.eup %5134  ;;  %v3748_v48 = vmul.f32 1.0614054, %v5133_v41  ;;  %v3731_v3 = vand.u32 2147483647, %v7723_v18  ;;  %vm3811_vm10 = vcmp.ge.f32.partialorder %v7723_v18, 0.0 }
 0x818   : > { %v3734_v44 = vmul.f32 0.3275911, %v3730_v19  ;;  %v3749_v27 = vmul.f32 1.0614054, %v5135_v32  ;;  %v3786_v20 = vsub.f32 0.0, %v3730_v19 }
 0x819   : > { %v3752_v38 = vadd.f32 -1.4531521, %v3748_v48  ;;  %v3735_v4 = vmul.f32 0.3275911, %v3731_v3  ;;  %v3787_v5 = vsub.f32 0.0, %v3731_v3 }
 0x81a   : > { %v3738_v31 = vadd.f32 1.0, %v3734_v44  ;;  %v3753_v13 = vadd.f32 -1.4531521, %v3749_v27  ;;  %v3790_v58 = vmul.f32 %v3786_v20, %v3730_v19 }
 0x81b   : > { %v3756_v14 = vmul.f32 %v5133_v41, %v3752_v38  ;;  %v3739_v17 = vadd.f32 1.0, %v3735_v4  ;;  %v3791_v63 = vmul.f32 %v3787_v5, %v3731_v3 }
 0x81c   : > { %5136 = vrcp.f32 %v3738_v31  ;;  %v3757_v16 = vmul.f32 %v5135_v32, %v3753_v13  ;;  %v3796_v23 = vmul.f32 1.442695, %v3790_v58 }
 0x81d   : > { %v3760_v45 = vadd.f32 1.4214138, %v3756_v14  ;;  %5138 = vrcp.f32 %v3739_v17  ;;  %v3798_v53 = vmul.f32 1.442695, %v3791_v63 }
 0x81e   : > { %5140 = vpow2.f32 %v3792_v35  ;;  %v3761_v12 = vadd.f32 1.4214138, %v3757_v16 }
 0x81f   : > { %v3764_v28 = vmul.f32 %v5133_v41, %v3760_v45  ;;  %5142 = vpow2.f32 %v3794_v51 }
 0x820   : > { %v3765_v39 = vmul.f32 %v5135_v32, %v3761_v12  ;;  %5144 = vpow2.f32 %v3796_v23 }
 0x821   : > { %v3768_v34 = vadd.f32 -0.28449672, %v3764_v28  ;;  %5146 = vpow2.f32 %v3798_v53 }
 0x822   : > { %v3769_v47 = vadd.f32 -0.28449672, %v3765_v39 }
 0x823   : > { %v3772_v8 = vmul.f32 %v5133_v41, %v3768_v34 }
 0x824   : > { %v3773_v22 = vmul.f32 %v5135_v32, %v3769_v47  ;;  %v3722_v47 = vmul.f32 0.5, %v7715_v11  ;;  %v4704_v11 = vld [vmem:[%s7794_s7] ss:$0 sm:$0xff] }
 0x825   : > { %v3776_v61 = vadd.f32 0.2548296, %v3772_v8 }
 0x826   : > { %v5137_v33 = vpop.eup %5136  ;;  %v3777_v62 = vadd.f32 0.2548296, %v3773_v22  ;;  %v3723_v22 = vmul.f32 0.5, %v7717_v25 }
 0x827   : > { %v5139_v36 = vpop.eup %5138  ;;  %v3780_v1 = vmul.f32 %v5133_v41, %v3776_v61  ;;  %v3750_v43 = vmul.f32 1.0614054, %v5137_v33 }
 0x828   : > { %v5141_v40 = vpop.eup %5140  ;;  %v3781_v30 = vmul.f32 %v5135_v32, %v3777_v62  ;;  %v3751_v15 = vmul.f32 1.0614054, %v5139_v36 }
 0x829   : > { %v5143_v24 = vpop.eup %5142  ;;  %v3800_v57 = vmul.f32 %v5141_v40, %v3780_v1  ;;  %v3754_v42 = vadd.f32 -1.4531521, %v3750_v43 }
 0x82a   : > { %v3801_v37 = vmul.f32 %v5143_v24, %v3781_v30  ;;  %v3755_v56 = vadd.f32 -1.4531521, %v3751_v15  ;;  %v5145_v17 = vpop.eup %5144 }
 0x82b   : > { %v3804_v54 = vsub.f32 1.0, %v3800_v57  ;;  %v3758_v52 = vmul.f32 %v5137_v33, %v3754_v42  ;;  %v5147_v16 = vpop.eup %5146 }
 0x82c   : > { %v3805_v59 = vsub.f32 1.0, %v3801_v37  ;;  %v3759_v49 = vmul.f32 %v5139_v36, %v3755_v56 }
 0x82d   : > { %v3812_v6 = vsub.f32 0.0, %v3804_v54  ;;  %v3762_v29 = vadd.f32 1.4214138, %v3758_v52 }
 0x82e   : > { %v3813_v2 = vsub.f32 0.0, %v3805_v59  ;;  %v3763_v9 = vadd.f32 1.4214138, %v3759_v49 }
 0x82f   : > { %v3816_v26 = vsel %vm3808_vm12, %v3804_v54, %v3812_v6  ;;  %v3766_v41 = vmul.f32 %v5137_v33, %v3762_v29 }
 0x830   : > { %v3820_v19 = vadd.f32 1.0, %v3816_v26  ;;  %v3817_v32 = vsel %vm3809_vm8, %v3805_v59, %v3813_v2  ;;  %v3767_v48 = vmul.f32 %v5139_v36, %v3763_v9 }
 0x831   : > { %v3770_v3 = vadd.f32 -0.28449672, %v3766_v41  ;;  %v3821_v44 = vadd.f32 1.0, %v3817_v32 }
 0x832   : > { %v3824_v27 = vmul.f32 %v3820_v19, %v3720_v50  ;;  %v3771_v38 = vadd.f32 -0.28449672, %v3767_v48 }
 0x833   : > { %v3774_v0 = vmul.f32 %v5137_v33, %v3770_v3  ;;  %v3825_v4 = vmul.f32 %v3821_v44, %v3721_v46 }
 0x834   : > { %v3775_v35 = vmul.f32 %v5139_v36, %v3771_v38  ;;  %v3828_v14 = vpack.c.bf16 %v3824_v27, %v3824_v27 }
 0x835   : > { %v3778_v31 = vadd.f32 0.2548296, %v3774_v0  ;;  %v3829_v13 = vpack.c.bf16 %v3825_v4, %v3825_v4 }
 0x836   : > { %v3779_v60 = vadd.f32 0.2548296, %v3775_v35 }
 0x837   : > { %v3782_v51 = vmul.f32 %v5137_v33, %v3778_v31  ;;  %4127 = vmatprep.mubr.bf16.mxu1 %v3829_v13 }
 0x838   : > { %4128 = vmatmul.mubr.bf16.vlgmr.msra.gmra.mrb[8].mxu1 %v3828_v14  ;;  %v3783_v7 = vmul.f32 %v5139_v36, %v3779_v60 }
 0x839   : > { %v3802_v45 = vmul.f32 %v5145_v17, %v3782_v51 }
 0x83a   : > { %v3803_v12 = vmul.f32 %v5147_v16, %v3783_v7 }
 0x83b   : > { %v3806_v55 = vsub.f32 1.0, %v3802_v45 }
 0x83c   : > { %v3807_v28 = vsub.f32 1.0, %v3803_v12 }
 0x83d   : > { %v3814_v39 = vsub.f32 0.0, %v3806_v55 }
 0x83e   : > { %v3815_v34 = vsub.f32 0.0, %v3807_v28 }
 0x83f   : > { %v3818_v20 = vsel %vm3810_vm11, %v3806_v55, %v3814_v39 }
 0x840   : > { %v3822_v8 = vadd.f32 1.0, %v3818_v20  ;;  %v3819_v5 = vsel %vm3811_vm10, %v3807_v28, %v3815_v34 }
 0x841   : > { %v3823_v61 = vadd.f32 1.0, %v3819_v5 }
 0x842   : > { %v3826_v33 = vmul.f32 %v3822_v8, %v3722_v47 }
 0x843   : > { %v3827_v58 = vmul.f32 %v3823_v61, %v3723_v22 }
 0x844   : > { %v3830_v36 = vpack.c.bf16 %v3826_v33, %v3826_v33 }
 0x845   : > { %v3831_v62 = vpack.c.bf16 %v3827_v58, %v3827_v58 }
 0x847   : > { %4167 = vmatprep.mubr.bf16.mxu0 %v3831_v62 }
 0x848   : > { %4168 = vmatmul.mubr.bf16.vlgmr.msra.gmra.mrb[12].mxu0 %v3830_v36 }
 0x90b   : > { %v4933_v21 = vpop.f32.mrb[8].mxu1 }
 0x90c   : > { %v4934_v1 = vpop.f32.mrb[9].mxu1 }
 0x90d   : > { %v4935_v43 = vadd.f32 %v4934_v1, %v4933_v21  ;;  %v4936_v63 = vpop.f32.mrb[10].mxu1 }
 0x90e   : > { %v4937_v18 = vpop.f32.mrb[11].mxu1 }
 0x90f   : > { %v4130_v30 = vadd.f32 %v4935_v43, %v4704_v11 }
 0x91b   : > { %v4955_v25 = vpop.f32.mrb[12].mxu0 }
 0x91c   : > { %v4956_v40 = vpop.f32.mrb[13].mxu0 }
 0x91d   : > { %v4957_v15 = vadd.f32 %v4956_v40, %v4955_v25  ;;  %v4958_v24 = vpop.f32.mrb[14].mxu0 }
 0x91e   : > { %v4959_v57 = vpop.f32.mrb[15].mxu0 }
 0x91f   : > { %v4170_v42 = vadd.f32 %v4957_v15, %v4130_v30 }
 0x921   : > { %v4574_v23 = vsel %vm8290_vm0, %v4170_v42, %v7582_v10 }
 0x922   : > { %4575 = vst [vmem:[%s313_s22] sm:$0xff] %v4574_v23 }
 0x923   : > { %5189 = shalt.err (!%p5186_p7)
}
 0x924   : > { %s5190_s10 = scalar_lea.hbm %s7743_s20, 128  ;;  %s5194_s21 = scalar_lea.hbm %s7795_s8, 256 }
 0x925   : > { %p5191_p8 = scmp.ne.s32.totalorder %s7743_s20, %s5190_s10  ;;  %p5195_p1 = scmp.lt.u32.totalorder %s7743_s20, %s7795_s8 }
 0x926   : > { %p5196_p0 = scmp.lt.u32.totalorder %s5194_s21, %s5190_s10  ;;  %p5198_p6 = scmp.lt.u32.totalorder %s5190_s10, %s7743_s20 }
 0x927   : > { %p5192_p11 = pnand %p5191_p8, %p8291_p9 }
 0x928   : > { %p5197_p5 = por %p5196_p0, %p5195_p1 }
 0x929   : > { %p5193_p13 = pneg %p5192_p11 }
 0x92a   : > { %p5199_p10 = por %p5198_p6, %p5197_p5 }
 0x92c   : > { %p5200_p12 = pnand %p5199_p10, %p5193_p13 }
 0x92e   : > { %5203 = shalt.err (!%p5200_p12)
}
 0x92f   : > { %5003 = dma.vmem_to_hbm [thread:$0]  (%p8291_p9), %s7745_s23, 128, %s7743_s20, %s4577_s26  }
 0x930 PF: > { %p5015_p2 = scmp.ge.s32.totalorder %s5242_s30, 2  ;;  %s4602_s25 = sand.u32 1, %s5230_s27  }
 0x931   : > { %p8292_p3 = scmp.ne.s32.totalorder %s7978_s16, 0  ;;  %s4603_s9 = scalar_lea.sflag [#allocation4], %s4602_s25 }
 0x933   : > { %p5010_p4 = pnand %p5015_p2, %p8292_p3 }
 0x935   : > { %5225 = dma.done.wait (!%p5010_p4), %s4603_s9, 128  }
 0x936   : > { %5227 = vsyncadd (!%p5010_p4), %s4603_s9, 4294967168  ;;  %p19_p7 = scmp.ge.s32.totalorder %s5323_s11, 4   ;;  %s8293_s27 = smov %s5234_s28 }
 0x937   : > { %s8294_s28 = smov %s5238_s29  ;;  %s8295_s29 = smov %s5334_s14 }
 0x938   : > { %s8296_s30 = smov %s5323_s11  ;;  %21 = sbr.rel (!%p19_p7) target bundleno = 4 (0x4), region = 92 }
 0x93f   :  { %4608 = vsyncpa [#allocation3], 1 }
 0x940   :  { %4610 = vsyncpa [#allocation3 + $0x1], 1 }
 0x941   :  { %4611 = vsyncpa [#allocation4], 1 }
 0x942   :  { %4613 = vsyncpa [#allocation4 + $0x1], 1 }

</bundles_post_ra>
